<compile_context>
chip_gen: v6e
topology: v6e:2x2x1
jax: 0.10.0
libtpu: 0.0.40
codegen_flags: <defaults>
</compile_context>

<pallas_src>
import functools

import jax
import jax.numpy as jnp
from jax.experimental import pallas as pl
from jax.experimental.pallas import tpu as pltpu

LANE = 128


def _round_up(x, m):
    return (x + m - 1) // m * m


def _sigmoid(x):
    # Exact identity sigmoid(x) = 0.5*tanh(0.5*x) + 0.5 : one EUP op per call
    # (no exp + divide pair on the serial per-step path).
    return 0.5 * jnp.tanh(0.5 * x) + 0.5


# ----------------------------------------------------------------------------
# LSTM layer kernel: one grid step = one time block of TT timesteps.
# ----------------------------------------------------------------------------
def lstm_layer_kernel(x_ref, wih_ref, whh_ref, b_ref,
                      hseq_ref, hlast_ref, clast_ref,
                      xproj_scr, h_scr, c_scr):
    """
    x_ref       : (TT, B, Din)   f32/bf16  input slab for this time block
    wih_ref     : (Din, 4Hp)     bf16      gate-fused input weights  [i|f|g|o]
    whh_ref     : (Hp, 4Hp)      bf16      gate-fused recurrent weights
    b_ref       : (1, 4Hp)       f32       combined bias b_ih + b_hh
    hseq_ref    : (TT, B, Hp)    bf16      per-step hidden output slab
    hlast/clast : (B, Hp)        f32       final state (written on last block)
    xproj_scr   : (TT, B, 4Hp)   f32       hoisted X @ W_ih + b for the block
    h_scr/c_scr : (B, Hp)        f32       state carried across time blocks
    """
    nt = pl.program_id(0)
    tt, bb, d = x_ref.shape
    hidden = whh_ref.shape[0]          # Hp (lane-aligned)

    @pl.when(nt == 0)
    def _init():
        # hidden=None path of the PyTorch module -> zero initial state.
        h_scr[...] = jnp.zeros_like(h_scr)
        c_scr[...] = jnp.zeros_like(c_scr)

    wih = wih_ref[...]                 # bf16 (Din, 4Hp)
    whh = whh_ref[...]                 # bf16 (Hp, 4Hp)
    bias = b_ref[...]                  # f32  (1, 4Hp)

    # ---- Hoisted, lane-dense input projection for the whole time block ----
    # Off the serial recurrence path; bias folded in once per block.
    if bb % 8 == 0:
        # Collapsing (tt, bb) is layout-preserving when bb % 8 == 0: one big
        # (TT*B, Din) @ (Din, 4Hp) bf16 GEMM with f32 accumulation.
        x2d = x_ref[...].reshape(tt * bb, d).astype(jnp.bfloat16)
        xproj = jnp.dot(x2d, wih, preferred_element_type=jnp.float32) + bias
        xproj_scr[...] = xproj.reshape(tt, bb, 4 * hidden)
    else:
        # Avoid a sublane-crossing reshape: static per-t GEMMs (still hoisted).
        for t in range(tt):
            xproj_scr[t] = (
                jnp.dot(x_ref[t].astype(jnp.bfloat16), wih,
                        preferred_element_type=jnp.float32) + bias)

    # ---- Serial recurrence; (h, c) carried as values (vregs), not VMEM -----
    h = h_scr[...]                     # (B, Hp) f32
    c = c_scr[...]
    # TODO(synk): sweep partial unroll / register pressure for large TT*B*Hp.
    for t in range(tt):
        gates = xproj_scr[t] + jnp.dot(h.astype(jnp.bfloat16), whh,
                                       preferred_element_type=jnp.float32)
        # PyTorch gate order i, f, g, o; Hp-aligned -> lane-dense free slices.
        i_g = _sigmoid(gates[:, 0 * hidden:1 * hidden])
        f_g = _sigmoid(gates[:, 1 * hidden:2 * hidden])
        g_g = jnp.tanh(gates[:, 2 * hidden:3 * hidden])
        o_g = _sigmoid(gates[:, 3 * hidden:4 * hidden])
        c = f_g * c + i_g * g_g
        h = o_g * jnp.tanh(c)
        hseq_ref[t] = h.astype(hseq_ref.dtype)      # bf16 lane-dense store

    # State persists across time blocks via scratch (written once per block).
    h_scr[...] = h
    c_scr[...] = c

    @pl.when(nt == pl.num_programs(0) - 1)
    def _finalize():
        hlast_ref[...] = h
        clast_ref[...] = c


# ----------------------------------------------------------------------------
# Spec / sizing helpers.
# ----------------------------------------------------------------------------
def _const_spec(shape):
    """Whole-array block reused at every grid step (constant index_map).

    Single-buffered when the running JAX supports `pipeline_mode`: constant
    blocks never benefit from the default double buffer.
    """
    index_map = lambda nt: (0,) * len(shape)
    try:
        return pl.BlockSpec(shape, index_map, pipeline_mode=pl.Buffered(1))
    except Exception:  # older API without pipeline_mode -> default buffering
        return pl.BlockSpec(shape, index_map)


def _vmem_capacity_bytes():
    try:
        return int(pltpu.get_tpu_info().vmem_capacity_bytes)
    except Exception:
        return 64 * 1024 * 1024        # conservative (v7x per-TC VMEM)


def _layer_vmem_bytes(tt, B, D, Hp, x_itemsize):
    g4 = 4 * Hp
    weights = D * g4 * 2 + Hp * g4 * 2 + g4 * 4      # bf16 W_ih + W_hh, f32 bias
    x_blk = 2 * tt * B * D * x_itemsize              # double-buffered input slab
    h_blk = 2 * tt * B * Hp * 2                      # double-buffered bf16 hseq
    xproj = tt * B * g4 * 4                          # hoisted projection scratch
    state = 4 * B * Hp * 4                           # h/c scratch + hlast/clast
    return weights + x_blk + h_blk + xproj + state


def _time_block(T, B, D, Hp, x_itemsize, budget, cap=32):
    """Largest divisor of T (<= cap) whose resident VMEM estimate fits budget."""
    best = 1
    for tt in range(1, min(T, cap) + 1):
        if T % tt == 0 and _layer_vmem_bytes(tt, B, D, Hp, x_itemsize) <= budget:
            best = tt
    return best


def lstm_layer(x_seq, wih, whh, bias):
    """x_seq: (T, B, Din). Returns (h_seq (T,B,Hp) bf16, h_last (B,Hp), c_last (B,Hp))."""
    T, B, D = x_seq.shape
    Hp = whh.shape[0]
    cap = _vmem_capacity_bytes()
    budget = int(cap * 0.6)
    tt = _time_block(T, B, D, Hp, x_seq.dtype.itemsize, budget)
    grid = (T // tt,)                  # serial time-block axis

    grid_spec = pltpu.PrefetchScalarGridSpec(
        num_scalar_prefetch=0,
        grid=grid,
        in_specs=[
            pl.BlockSpec((tt, B, D), lambda nt: (nt, 0, 0)),
            _const_spec((D, 4 * Hp)),
            _const_spec((Hp, 4 * Hp)),
            _const_spec((1, 4 * Hp)),
        ],
        out_specs=[
            pl.BlockSpec((tt, B, Hp), lambda nt: (nt, 0, 0)),
            pl.BlockSpec((B, Hp), lambda nt: (0, 0)),
            pl.BlockSpec((B, Hp), lambda nt: (0, 0)),
        ],
        scratch_shapes=[
            pltpu.VMEM((tt, B, 4 * Hp), jnp.float32),   # hoisted X@W_ih + b
            pltpu.VMEM((B, Hp), jnp.float32),           # h state (across blocks)
            pltpu.VMEM((B, Hp), jnp.float32),           # c state (across blocks)
        ],
    )

    return pl.pallas_call(
        lstm_layer_kernel,
        out_shape=(
            jax.ShapeDtypeStruct((T, B, Hp), jnp.bfloat16),
            jax.ShapeDtypeStruct((B, Hp), jnp.float32),
            jax.ShapeDtypeStruct((B, Hp), jnp.float32),
        ),
        grid_spec=grid_spec,
        compiler_params=pltpu.CompilerParams(
            dimension_semantics=("arbitrary",),   # recurrence is serial in time
            vmem_limit_bytes=int(cap * 0.8),
        ),
    )(x_seq, wih, whh, bias)


# ----------------------------------------------------------------------------
# Regressor kernel: tiny fused linear on the B gathered rows.
# ----------------------------------------------------------------------------
def regressor_kernel(h_ref, w_ref, b_ref, o_ref):
    o_ref[...] = (jnp.dot(h_ref[...].astype(jnp.float32), w_ref[...],
                          preferred_element_type=jnp.float32) + b_ref[...])


def regressor(h_rows, w_r, b_r):
    B = h_rows.shape[0]
    O = w_r.shape[-1]
    return pl.pallas_call(
        regressor_kernel,
        out_shape=jax.ShapeDtypeStruct((B, O), jnp.float32),
    )(h_rows, w_r, b_r)


# ----------------------------------------------------------------------------
# Parameter init (PyTorch-style U(-1/sqrt(H), 1/sqrt(H)), gate-fused, padded).
# ----------------------------------------------------------------------------
def _pad_rows(w, rows):
    r = w.shape[0]
    if r == rows:
        return w
    return jnp.concatenate(
        [w, jnp.zeros((rows - r,) + w.shape[1:], w.dtype)], axis=0)


def _pad_gate_cols(w, H, Hp):
    """Pad each of the 4 PyTorch gate blocks [i|f|g|o] from H to Hp lanes with zeros."""
    if H == Hp:
        return w
    lead = w.shape[:-1]
    w4 = w.reshape(lead + (4, H))
    pad = jnp.zeros(lead + (4, Hp - H), w.dtype)
    return jnp.concatenate([w4, pad], axis=-1).reshape(lead + (4 * Hp,))


def init_params(key, input_size, hidden_size, output_size, num_layers):
    H = hidden_size
    Hp = _round_up(H, LANE)
    bound = 1.0 / float(H) ** 0.5
    params = {"lstm": []}
    for layer in range(num_layers):
        d_real = input_size if layer == 0 else H
        d_pad = input_size if layer == 0 else Hp
        key, k1, k2, k3, k4 = jax.random.split(key, 5)
        wih = jax.random.uniform(k1, (d_real, 4 * H), jnp.float32, -bound, bound)
        whh = jax.random.uniform(k2, (H, 4 * H), jnp.float32, -bound, bound)
        b_ih = jax.random.uniform(k3, (1, 4 * H), jnp.float32, -bound, bound)
        b_hh = jax.random.uniform(k4, (1, 4 * H), jnp.float32, -bound, bound)
        # Zero padding keeps the math exact: padded h/c lanes stay exactly 0.
        wih_p = _pad_gate_cols(_pad_rows(wih, d_pad), H, Hp)
        whh_p = _pad_gate_cols(_pad_rows(whh, Hp), H, Hp)
        bias_p = _pad_gate_cols(b_ih + b_hh, H, Hp)          # combined bias, f32
        params["lstm"].append((wih_p.astype(jnp.bfloat16),   # bf16 MXU inputs
                               whh_p.astype(jnp.bfloat16),
                               bias_p))
    key, k1, k2 = jax.random.split(key, 3)
    w_r = jax.random.uniform(k1, (H, output_size), jnp.float32, -bound, bound)
    b_r = jax.random.uniform(k2, (1, output_size), jnp.float32, -bound, bound)
    params["w_r"] = _pad_rows(w_r, Hp)                        # (Hp, O), zero rows
    params["b_r"] = b_r
    return params


# ----------------------------------------------------------------------------
# Forward pass reproducing the PyTorch module's semantics (incl. view quirks).
# ----------------------------------------------------------------------------
@functools.partial(jax.jit, static_argnames=("hidden_size",))
def lstm_model_forward(x, params, *, hidden_size):
    B, T, D = x.shape
    H = hidden_size
    Hp = params["lstm"][0][1].shape[0]

    # e = x.view(T, B, D): flat reshape (memory reinterpretation), NOT transpose.
    layer_in = jnp.reshape(x, (T, B, D))

    h_n_list, c_n_list = [], []
    for (wih, whh, bias) in params["lstm"]:
        h_seq, h_last, c_last = lstm_layer(layer_in, wih, whh, bias)
        h_n_list.append(h_last[:, :H])
        c_n_list.append(c_last[:, :H])
        layer_in = h_seq                      # lane-dense (T, B, Hp) bf16 slab

    # h.view(B, T, H)[:, -1, :] == flat rows b*T + (T-1) of the (T*B, H) array.
    # Gather only those B rows in XLA; feed the tiny (B, Hp) matrix to Pallas.
    rows = jnp.array([b * T + (T - 1) for b in range(B)], dtype=jnp.int32)
    picked = jnp.take(jnp.reshape(layer_in, (T * B, Hp)), rows, axis=0)
    y = regressor(picked, params["w_r"], params["b_r"])

    h_n = jnp.stack(h_n_list, axis=0)         # (num_layers, B, H)
    c_n = jnp.stack(c_n_list, axis=0)
    return y, (h_n, c_n)


if __name__ == "__main__":
    B, T, D = 2, 8, 4          # batch, seq, input_size
    H, O, L = 32, 4, 2         # hidden_layer_size, output_size, num_layers

    key = jax.random.PRNGKey(0)
    kx, kp = jax.random.split(key)
    x = jax.random.normal(kx, (B, T, D), jnp.float32)
    params = init_params(kp, D, H, O, L)

    y, (h_n, c_n) = lstm_model_forward(x, params, hidden_size=H)
    jax.block_until_ready((y, h_n, c_n))

    assert y.shape == (B, O)
    assert h_n.shape == (L, B, H) and c_n.shape == (L, B, H)
    print("KERNEL_OK")
</pallas_src>

<mosaic_0001>
module attributes {stable_mosaic.version = 11 : i64} {
  func.func @lstm_layer_kernel(%arg0: i32, %arg1: memref<8x2x4xf32, #tpu.memory_space<vmem>>, %arg2: memref<4x512xbf16, #tpu.memory_space<vmem>>, %arg3: memref<128x512xbf16, #tpu.memory_space<vmem>>, %arg4: memref<1x512xf32, #tpu.memory_space<vmem>>, %arg5: memref<8x2x128xbf16, #tpu.memory_space<vmem>>, %arg6: memref<2x128xf32, #tpu.memory_space<vmem>>, %arg7: memref<2x128xf32, #tpu.memory_space<vmem>>, %arg8: memref<8x2x512xf32, #tpu.memory_space<vmem>>, %arg9: memref<2x128xf32, #tpu.memory_space<vmem>>, %arg10: memref<2x128xf32, #tpu.memory_space<vmem>>) attributes {dimension_semantics = [#tpu.dimension_semantics<arbitrary>], iteration_bounds = array<i64: 1>, scalar_prefetch = 0 : i64, scratch_operands = 3 : i64, tpu.core_type = #tpu.core_type<tc>, window_params = [{transform_indices = @transform_0, window_bounds = array<i64: 8, 2, 4>}, {pipeline_mode = #tpu.pipeline_mode<synchronous>, transform_indices = @transform_1, window_bounds = array<i64: 4, 512>}, {pipeline_mode = #tpu.pipeline_mode<synchronous>, transform_indices = @transform_2, window_bounds = array<i64: 128, 512>}, {pipeline_mode = #tpu.pipeline_mode<synchronous>, transform_indices = @transform_3, window_bounds = array<i64: 1, 512>}, {transform_indices = @transform_4, window_bounds = array<i64: 8, 2, 128>}, {pipeline_mode = #tpu.pipeline_mode<synchronous>, transform_indices = @transform_5, window_bounds = array<i64: 2, 128>}, {pipeline_mode = #tpu.pipeline_mode<synchronous>, transform_indices = @transform_6, window_bounds = array<i64: 2, 128>}]} {
    %c0_i32 = arith.constant 0 : i32
    %0 = arith.cmpi eq, %arg0, %c0_i32 : i32
    %1 = arith.extui %0 : i1 to i32
    %c0_i32_0 = arith.constant 0 : i32
    %2 = arith.cmpi ne, %1, %c0_i32_0 : i32
    scf.if %2 {
      %cst_192 = arith.constant 0.000000e+00 : f32
      %405 = vector.broadcast %cst_192 : f32 to vector<2x128xf32>
      %c0_193 = arith.constant 0 : index
      %c0_194 = arith.constant 0 : index
      %406 = vector.load %arg9[%c0_193, %c0_194] : memref<2x128xf32, #tpu.memory_space<vmem>>, vector<2x128xf32>
      tpu.vector_store %arg9[%c0_193, %c0_194], %405 {strides = array<i32>} : memref<2x128xf32, #tpu.memory_space<vmem>>, vector<2x128xf32>,
      %cst_195 = arith.constant 0.000000e+00 : f32
      %407 = vector.broadcast %cst_195 : f32 to vector<2x128xf32>
      %c0_196 = arith.constant 0 : index
      %c0_197 = arith.constant 0 : index
      %408 = vector.load %arg10[%c0_196, %c0_197] : memref<2x128xf32, #tpu.memory_space<vmem>>, vector<2x128xf32>
      tpu.vector_store %arg10[%c0_196, %c0_197], %407 {strides = array<i32>} : memref<2x128xf32, #tpu.memory_space<vmem>>, vector<2x128xf32>,
    } else {
    }
    %c0 = arith.constant 0 : index
    %c0_1 = arith.constant 0 : index
    %3 = vector.load %arg2[%c0, %c0_1] : memref<4x512xbf16, #tpu.memory_space<vmem>>, vector<4x512xbf16>
    %c0_2 = arith.constant 0 : index
    %c0_3 = arith.constant 0 : index
    %4 = vector.load %arg3[%c0_2, %c0_3] : memref<128x512xbf16, #tpu.memory_space<vmem>>, vector<128x512xbf16>
    %c0_4 = arith.constant 0 : index
    %c0_5 = arith.constant 0 : index
    %5 = vector.load %arg4[%c0_4, %c0_5] : memref<1x512xf32, #tpu.memory_space<vmem>>, vector<1x512xf32>
    %c0_6 = arith.constant 0 : index
    %c0_7 = arith.constant 0 : index
    %c0_8 = arith.constant 0 : index
    %6 = vector.load %arg1[%c0_6, %c0_7, %c0_8] : memref<8x2x4xf32, #tpu.memory_space<vmem>>, vector<1x2x4xf32>
    %7 = vector.shape_cast %6 : vector<1x2x4xf32> to vector<2x4xf32>
    %8 = arith.truncf %7 : vector<2x4xf32> to vector<2x4xbf16>
    %cst = arith.constant dense<0.000000e+00> : vector<2x512xf32>
    %9 = tpu.matmul %8, %3, %cst {dimension_numbers = #tpu.dot_dimension_numbers<[1], [0], [0], [1], [0, 0, 1, 1], [], []>} : vector<2x4xbf16>, vector<4x512xbf16>, vector<2x512xf32> -> vector<2x512xf32>
    %10 = vector.broadcast %5 : vector<1x512xf32> to vector<2x512xf32>
    %11 = arith.addf %9, %10 : vector<2x512xf32>
    %c0_9 = arith.constant 0 : index
    %c0_10 = arith.constant 0 : index
    %c0_11 = arith.constant 0 : index
    %12 = vector.load %arg8[%c0_9, %c0_10, %c0_11] : memref<8x2x512xf32, #tpu.memory_space<vmem>>, vector<1x2x512xf32>
    %13 = vector.shape_cast %12 : vector<1x2x512xf32> to vector<2x512xf32>
    %14 = vector.shape_cast %11 : vector<2x512xf32> to vector<1x2x512xf32>
    tpu.vector_store %arg8[%c0_9, %c0_10, %c0_11], %14 {strides = array<i32>} : memref<8x2x512xf32, #tpu.memory_space<vmem>>, vector<1x2x512xf32>,
    %c1 = arith.constant 1 : index
    %c0_12 = arith.constant 0 : index
    %c0_13 = arith.constant 0 : index
    %15 = vector.load %arg1[%c1, %c0_12, %c0_13] : memref<8x2x4xf32, #tpu.memory_space<vmem>>, vector<1x2x4xf32>
    %16 = vector.shape_cast %15 : vector<1x2x4xf32> to vector<2x4xf32>
    %17 = arith.truncf %16 : vector<2x4xf32> to vector<2x4xbf16>
    %cst_14 = arith.constant dense<0.000000e+00> : vector<2x512xf32>
    %18 = tpu.matmul %17, %3, %cst_14 {dimension_numbers = #tpu.dot_dimension_numbers<[1], [0], [0], [1], [0, 0, 1, 1], [], []>} : vector<2x4xbf16>, vector<4x512xbf16>, vector<2x512xf32> -> vector<2x512xf32>
    %19 = vector.broadcast %5 : vector<1x512xf32> to vector<2x512xf32>
    %20 = arith.addf %18, %19 : vector<2x512xf32>
    %c1_15 = arith.constant 1 : index
    %c0_16 = arith.constant 0 : index
    %c0_17 = arith.constant 0 : index
    %21 = vector.load %arg8[%c1_15, %c0_16, %c0_17] : memref<8x2x512xf32, #tpu.memory_space<vmem>>, vector<1x2x512xf32>
    %22 = vector.shape_cast %21 : vector<1x2x512xf32> to vector<2x512xf32>
    %23 = vector.shape_cast %20 : vector<2x512xf32> to vector<1x2x512xf32>
    tpu.vector_store %arg8[%c1_15, %c0_16, %c0_17], %23 {strides = array<i32>} : memref<8x2x512xf32, #tpu.memory_space<vmem>>, vector<1x2x512xf32>,
    %c2 = arith.constant 2 : index
    %c0_18 = arith.constant 0 : index
    %c0_19 = arith.constant 0 : index
    %24 = vector.load %arg1[%c2, %c0_18, %c0_19] : memref<8x2x4xf32, #tpu.memory_space<vmem>>, vector<1x2x4xf32>
    %25 = vector.shape_cast %24 : vector<1x2x4xf32> to vector<2x4xf32>
    %26 = arith.truncf %25 : vector<2x4xf32> to vector<2x4xbf16>
    %cst_20 = arith.constant dense<0.000000e+00> : vector<2x512xf32>
    %27 = tpu.matmul %26, %3, %cst_20 {dimension_numbers = #tpu.dot_dimension_numbers<[1], [0], [0], [1], [0, 0, 1, 1], [], []>} : vector<2x4xbf16>, vector<4x512xbf16>, vector<2x512xf32> -> vector<2x512xf32>
    %28 = vector.broadcast %5 : vector<1x512xf32> to vector<2x512xf32>
    %29 = arith.addf %27, %28 : vector<2x512xf32>
    %c2_21 = arith.constant 2 : index
    %c0_22 = arith.constant 0 : index
    %c0_23 = arith.constant 0 : index
    %30 = vector.load %arg8[%c2_21, %c0_22, %c0_23] : memref<8x2x512xf32, #tpu.memory_space<vmem>>, vector<1x2x512xf32>
    %31 = vector.shape_cast %30 : vector<1x2x512xf32> to vector<2x512xf32>
    %32 = vector.shape_cast %29 : vector<2x512xf32> to vector<1x2x512xf32>
    tpu.vector_store %arg8[%c2_21, %c0_22, %c0_23], %32 {strides = array<i32>} : memref<8x2x512xf32, #tpu.memory_space<vmem>>, vector<1x2x512xf32>,
    %c3 = arith.constant 3 : index
    %c0_24 = arith.constant 0 : index
    %c0_25 = arith.constant 0 : index
    %33 = vector.load %arg1[%c3, %c0_24, %c0_25] : memref<8x2x4xf32, #tpu.memory_space<vmem>>, vector<1x2x4xf32>
    %34 = vector.shape_cast %33 : vector<1x2x4xf32> to vector<2x4xf32>
    %35 = arith.truncf %34 : vector<2x4xf32> to vector<2x4xbf16>
    %cst_26 = arith.constant dense<0.000000e+00> : vector<2x512xf32>
    %36 = tpu.matmul %35, %3, %cst_26 {dimension_numbers = #tpu.dot_dimension_numbers<[1], [0], [0], [1], [0, 0, 1, 1], [], []>} : vector<2x4xbf16>, vector<4x512xbf16>, vector<2x512xf32> -> vector<2x512xf32>
    %37 = vector.broadcast %5 : vector<1x512xf32> to vector<2x512xf32>
    %38 = arith.addf %36, %37 : vector<2x512xf32>
    %c3_27 = arith.constant 3 : index
    %c0_28 = arith.constant 0 : index
    %c0_29 = arith.constant 0 : index
    %39 = vector.load %arg8[%c3_27, %c0_28, %c0_29] : memref<8x2x512xf32, #tpu.memory_space<vmem>>, vector<1x2x512xf32>
    %40 = vector.shape_cast %39 : vector<1x2x512xf32> to vector<2x512xf32>
    %41 = vector.shape_cast %38 : vector<2x512xf32> to vector<1x2x512xf32>
    tpu.vector_store %arg8[%c3_27, %c0_28, %c0_29], %41 {strides = array<i32>} : memref<8x2x512xf32, #tpu.memory_space<vmem>>, vector<1x2x512xf32>,
    %c4 = arith.constant 4 : index
    %c0_30 = arith.constant 0 : index
    %c0_31 = arith.constant 0 : index
    %42 = vector.load %arg1[%c4, %c0_30, %c0_31] : memref<8x2x4xf32, #tpu.memory_space<vmem>>, vector<1x2x4xf32>
    %43 = vector.shape_cast %42 : vector<1x2x4xf32> to vector<2x4xf32>
    %44 = arith.truncf %43 : vector<2x4xf32> to vector<2x4xbf16>
    %cst_32 = arith.constant dense<0.000000e+00> : vector<2x512xf32>
    %45 = tpu.matmul %44, %3, %cst_32 {dimension_numbers = #tpu.dot_dimension_numbers<[1], [0], [0], [1], [0, 0, 1, 1], [], []>} : vector<2x4xbf16>, vector<4x512xbf16>, vector<2x512xf32> -> vector<2x512xf32>
    %46 = vector.broadcast %5 : vector<1x512xf32> to vector<2x512xf32>
    %47 = arith.addf %45, %46 : vector<2x512xf32>
    %c4_33 = arith.constant 4 : index
    %c0_34 = arith.constant 0 : index
    %c0_35 = arith.constant 0 : index
    %48 = vector.load %arg8[%c4_33, %c0_34, %c0_35] : memref<8x2x512xf32, #tpu.memory_space<vmem>>, vector<1x2x512xf32>
    %49 = vector.shape_cast %48 : vector<1x2x512xf32> to vector<2x512xf32>
    %50 = vector.shape_cast %47 : vector<2x512xf32> to vector<1x2x512xf32>
    tpu.vector_store %arg8[%c4_33, %c0_34, %c0_35], %50 {strides = array<i32>} : memref<8x2x512xf32, #tpu.memory_space<vmem>>, vector<1x2x512xf32>,
    %c5 = arith.constant 5 : index
    %c0_36 = arith.constant 0 : index
    %c0_37 = arith.constant 0 : index
    %51 = vector.load %arg1[%c5, %c0_36, %c0_37] : memref<8x2x4xf32, #tpu.memory_space<vmem>>, vector<1x2x4xf32>
    %52 = vector.shape_cast %51 : vector<1x2x4xf32> to vector<2x4xf32>
    %53 = arith.truncf %52 : vector<2x4xf32> to vector<2x4xbf16>
    %cst_38 = arith.constant dense<0.000000e+00> : vector<2x512xf32>
    %54 = tpu.matmul %53, %3, %cst_38 {dimension_numbers = #tpu.dot_dimension_numbers<[1], [0], [0], [1], [0, 0, 1, 1], [], []>} : vector<2x4xbf16>, vector<4x512xbf16>, vector<2x512xf32> -> vector<2x512xf32>
    %55 = vector.broadcast %5 : vector<1x512xf32> to vector<2x512xf32>
    %56 = arith.addf %54, %55 : vector<2x512xf32>
    %c5_39 = arith.constant 5 : index
    %c0_40 = arith.constant 0 : index
    %c0_41 = arith.constant 0 : index
    %57 = vector.load %arg8[%c5_39, %c0_40, %c0_41] : memref<8x2x512xf32, #tpu.memory_space<vmem>>, vector<1x2x512xf32>
    %58 = vector.shape_cast %57 : vector<1x2x512xf32> to vector<2x512xf32>
    %59 = vector.shape_cast %56 : vector<2x512xf32> to vector<1x2x512xf32>
    tpu.vector_store %arg8[%c5_39, %c0_40, %c0_41], %59 {strides = array<i32>} : memref<8x2x512xf32, #tpu.memory_space<vmem>>, vector<1x2x512xf32>,
    %c6 = arith.constant 6 : index
    %c0_42 = arith.constant 0 : index
    %c0_43 = arith.constant 0 : index
    %60 = vector.load %arg1[%c6, %c0_42, %c0_43] : memref<8x2x4xf32, #tpu.memory_space<vmem>>, vector<1x2x4xf32>
    %61 = vector.shape_cast %60 : vector<1x2x4xf32> to vector<2x4xf32>
    %62 = arith.truncf %61 : vector<2x4xf32> to vector<2x4xbf16>
    %cst_44 = arith.constant dense<0.000000e+00> : vector<2x512xf32>
    %63 = tpu.matmul %62, %3, %cst_44 {dimension_numbers = #tpu.dot_dimension_numbers<[1], [0], [0], [1], [0, 0, 1, 1], [], []>} : vector<2x4xbf16>, vector<4x512xbf16>, vector<2x512xf32> -> vector<2x512xf32>
    %64 = vector.broadcast %5 : vector<1x512xf32> to vector<2x512xf32>
    %65 = arith.addf %63, %64 : vector<2x512xf32>
    %c6_45 = arith.constant 6 : index
    %c0_46 = arith.constant 0 : index
    %c0_47 = arith.constant 0 : index
    %66 = vector.load %arg8[%c6_45, %c0_46, %c0_47] : memref<8x2x512xf32, #tpu.memory_space<vmem>>, vector<1x2x512xf32>
    %67 = vector.shape_cast %66 : vector<1x2x512xf32> to vector<2x512xf32>
    %68 = vector.shape_cast %65 : vector<2x512xf32> to vector<1x2x512xf32>
    tpu.vector_store %arg8[%c6_45, %c0_46, %c0_47], %68 {strides = array<i32>} : memref<8x2x512xf32, #tpu.memory_space<vmem>>, vector<1x2x512xf32>,
    %c7 = arith.constant 7 : index
    %c0_48 = arith.constant 0 : index
    %c0_49 = arith.constant 0 : index
    %69 = vector.load %arg1[%c7, %c0_48, %c0_49] : memref<8x2x4xf32, #tpu.memory_space<vmem>>, vector<1x2x4xf32>
    %70 = vector.shape_cast %69 : vector<1x2x4xf32> to vector<2x4xf32>
    %71 = arith.truncf %70 : vector<2x4xf32> to vector<2x4xbf16>
    %cst_50 = arith.constant dense<0.000000e+00> : vector<2x512xf32>
    %72 = tpu.matmul %71, %3, %cst_50 {dimension_numbers = #tpu.dot_dimension_numbers<[1], [0], [0], [1], [0, 0, 1, 1], [], []>} : vector<2x4xbf16>, vector<4x512xbf16>, vector<2x512xf32> -> vector<2x512xf32>
    %73 = vector.broadcast %5 : vector<1x512xf32> to vector<2x512xf32>
    %74 = arith.addf %72, %73 : vector<2x512xf32>
    %c7_51 = arith.constant 7 : index
    %c0_52 = arith.constant 0 : index
    %c0_53 = arith.constant 0 : index
    %75 = vector.load %arg8[%c7_51, %c0_52, %c0_53] : memref<8x2x512xf32, #tpu.memory_space<vmem>>, vector<1x2x512xf32>
    %76 = vector.shape_cast %75 : vector<1x2x512xf32> to vector<2x512xf32>
    %77 = vector.shape_cast %74 : vector<2x512xf32> to vector<1x2x512xf32>
    tpu.vector_store %arg8[%c7_51, %c0_52, %c0_53], %77 {strides = array<i32>} : memref<8x2x512xf32, #tpu.memory_space<vmem>>, vector<1x2x512xf32>,
    %c0_54 = arith.constant 0 : index
    %c0_55 = arith.constant 0 : index
    %78 = vector.load %arg9[%c0_54, %c0_55] : memref<2x128xf32, #tpu.memory_space<vmem>>, vector<2x128xf32>
    %c0_56 = arith.constant 0 : index
    %c0_57 = arith.constant 0 : index
    %79 = vector.load %arg10[%c0_56, %c0_57] : memref<2x128xf32, #tpu.memory_space<vmem>>, vector<2x128xf32>
    %c0_58 = arith.constant 0 : index
    %c0_59 = arith.constant 0 : index
    %c0_60 = arith.constant 0 : index
    %80 = vector.load %arg8[%c0_58, %c0_59, %c0_60] : memref<8x2x512xf32, #tpu.memory_space<vmem>>, vector<1x2x512xf32>
    %81 = vector.shape_cast %80 : vector<1x2x512xf32> to vector<2x512xf32>
    %82 = arith.truncf %78 : vector<2x128xf32> to vector<2x128xbf16>
    %cst_61 = arith.constant dense<0.000000e+00> : vector<2x512xf32>
    %83 = tpu.matmul %82, %4, %cst_61 {dimension_numbers = #tpu.dot_dimension_numbers<[1], [0], [0], [1], [0, 0, 1, 1], [], []>} : vector<2x128xbf16>, vector<128x512xbf16>, vector<2x512xf32> -> vector<2x512xf32>
    %84 = arith.addf %81, %83 : vector<2x512xf32>
    %85 = vector.extract_strided_slice %84 {offsets = [0, 0], sizes = [2, 128], strides = [1, 1]} : vector<2x512xf32> to vector<2x128xf32>
    %cst_62 = arith.constant 5.000000e-01 : f32
    %86 = vector.broadcast %cst_62 : f32 to vector<2x128xf32>
    %87 = arith.mulf %86, %85 : vector<2x128xf32>
    %88 = math.tanh %87 : vector<2x128xf32>
    %cst_63 = arith.constant 5.000000e-01 : f32
    %89 = vector.broadcast %cst_63 : f32 to vector<2x128xf32>
    %90 = arith.mulf %89, %88 : vector<2x128xf32>
    %cst_64 = arith.constant 5.000000e-01 : f32
    %91 = vector.broadcast %cst_64 : f32 to vector<2x128xf32>
    %92 = arith.addf %90, %91 : vector<2x128xf32>
    %93 = vector.extract_strided_slice %84 {offsets = [0, 128], sizes = [2, 128], strides = [1, 1]} : vector<2x512xf32> to vector<2x128xf32>
    %cst_65 = arith.constant 5.000000e-01 : f32
    %94 = vector.broadcast %cst_65 : f32 to vector<2x128xf32>
    %95 = arith.mulf %94, %93 : vector<2x128xf32>
    %96 = math.tanh %95 : vector<2x128xf32>
    %cst_66 = arith.constant 5.000000e-01 : f32
    %97 = vector.broadcast %cst_66 : f32 to vector<2x128xf32>
    %98 = arith.mulf %97, %96 : vector<2x128xf32>
    %cst_67 = arith.constant 5.000000e-01 : f32
    %99 = vector.broadcast %cst_67 : f32 to vector<2x128xf32>
    %100 = arith.addf %98, %99 : vector<2x128xf32>
    %101 = vector.extract_strided_slice %84 {offsets = [0, 256], sizes = [2, 128], strides = [1, 1]} : vector<2x512xf32> to vector<2x128xf32>
    %102 = math.tanh %101 : vector<2x128xf32>
    %103 = vector.extract_strided_slice %84 {offsets = [0, 384], sizes = [2, 128], strides = [1, 1]} : vector<2x512xf32> to vector<2x128xf32>
    %cst_68 = arith.constant 5.000000e-01 : f32
    %104 = vector.broadcast %cst_68 : f32 to vector<2x128xf32>
    %105 = arith.mulf %104, %103 : vector<2x128xf32>
    %106 = math.tanh %105 : vector<2x128xf32>
    %cst_69 = arith.constant 5.000000e-01 : f32
    %107 = vector.broadcast %cst_69 : f32 to vector<2x128xf32>
    %108 = arith.mulf %107, %106 : vector<2x128xf32>
    %cst_70 = arith.constant 5.000000e-01 : f32
    %109 = vector.broadcast %cst_70 : f32 to vector<2x128xf32>
    %110 = arith.addf %108, %109 : vector<2x128xf32>
    %111 = arith.mulf %100, %79 : vector<2x128xf32>
    %112 = arith.mulf %92, %102 : vector<2x128xf32>
    %113 = arith.addf %111, %112 : vector<2x128xf32>
    %114 = math.tanh %113 : vector<2x128xf32>
    %115 = arith.mulf %110, %114 : vector<2x128xf32>
    %116 = arith.truncf %115 : vector<2x128xf32> to vector<2x128xbf16>
    %c0_71 = arith.constant 0 : index
    %c0_72 = arith.constant 0 : index
    %c0_73 = arith.constant 0 : index
    %117 = vector.load %arg5[%c0_71, %c0_72, %c0_73] : memref<8x2x128xbf16, #tpu.memory_space<vmem>>, vector<1x2x128xbf16>
    %118 = vector.shape_cast %117 : vector<1x2x128xbf16> to vector<2x128xbf16>
    %119 = vector.shape_cast %116 : vector<2x128xbf16> to vector<1x2x128xbf16>
    tpu.vector_store %arg5[%c0_71, %c0_72, %c0_73], %119 {strides = array<i32>} : memref<8x2x128xbf16, #tpu.memory_space<vmem>>, vector<1x2x128xbf16>,
    %c1_74 = arith.constant 1 : index
    %c0_75 = arith.constant 0 : index
    %c0_76 = arith.constant 0 : index
    %120 = vector.load %arg8[%c1_74, %c0_75, %c0_76] : memref<8x2x512xf32, #tpu.memory_space<vmem>>, vector<1x2x512xf32>
    %121 = vector.shape_cast %120 : vector<1x2x512xf32> to vector<2x512xf32>
    %122 = arith.truncf %115 : vector<2x128xf32> to vector<2x128xbf16>
    %cst_77 = arith.constant dense<0.000000e+00> : vector<2x512xf32>
    %123 = tpu.matmul %122, %4, %cst_77 {dimension_numbers = #tpu.dot_dimension_numbers<[1], [0], [0], [1], [0, 0, 1, 1], [], []>} : vector<2x128xbf16>, vector<128x512xbf16>, vector<2x512xf32> -> vector<2x512xf32>
    %124 = arith.addf %121, %123 : vector<2x512xf32>
    %125 = vector.extract_strided_slice %124 {offsets = [0, 0], sizes = [2, 128], strides = [1, 1]} : vector<2x512xf32> to vector<2x128xf32>
    %cst_78 = arith.constant 5.000000e-01 : f32
    %126 = vector.broadcast %cst_78 : f32 to vector<2x128xf32>
    %127 = arith.mulf %126, %125 : vector<2x128xf32>
    %128 = math.tanh %127 : vector<2x128xf32>
    %cst_79 = arith.constant 5.000000e-01 : f32
    %129 = vector.broadcast %cst_79 : f32 to vector<2x128xf32>
    %130 = arith.mulf %129, %128 : vector<2x128xf32>
    %cst_80 = arith.constant 5.000000e-01 : f32
    %131 = vector.broadcast %cst_80 : f32 to vector<2x128xf32>
    %132 = arith.addf %130, %131 : vector<2x128xf32>
    %133 = vector.extract_strided_slice %124 {offsets = [0, 128], sizes = [2, 128], strides = [1, 1]} : vector<2x512xf32> to vector<2x128xf32>
    %cst_81 = arith.constant 5.000000e-01 : f32
    %134 = vector.broadcast %cst_81 : f32 to vector<2x128xf32>
    %135 = arith.mulf %134, %133 : vector<2x128xf32>
    %136 = math.tanh %135 : vector<2x128xf32>
    %cst_82 = arith.constant 5.000000e-01 : f32
    %137 = vector.broadcast %cst_82 : f32 to vector<2x128xf32>
    %138 = arith.mulf %137, %136 : vector<2x128xf32>
    %cst_83 = arith.constant 5.000000e-01 : f32
    %139 = vector.broadcast %cst_83 : f32 to vector<2x128xf32>
    %140 = arith.addf %138, %139 : vector<2x128xf32>
    %141 = vector.extract_strided_slice %124 {offsets = [0, 256], sizes = [2, 128], strides = [1, 1]} : vector<2x512xf32> to vector<2x128xf32>
    %142 = math.tanh %141 : vector<2x128xf32>
    %143 = vector.extract_strided_slice %124 {offsets = [0, 384], sizes = [2, 128], strides = [1, 1]} : vector<2x512xf32> to vector<2x128xf32>
    %cst_84 = arith.constant 5.000000e-01 : f32
    %144 = vector.broadcast %cst_84 : f32 to vector<2x128xf32>
    %145 = arith.mulf %144, %143 : vector<2x128xf32>
    %146 = math.tanh %145 : vector<2x128xf32>
    %cst_85 = arith.constant 5.000000e-01 : f32
    %147 = vector.broadcast %cst_85 : f32 to vector<2x128xf32>
    %148 = arith.mulf %147, %146 : vector<2x128xf32>
    %cst_86 = arith.constant 5.000000e-01 : f32
    %149 = vector.broadcast %cst_86 : f32 to vector<2x128xf32>
    %150 = arith.addf %148, %149 : vector<2x128xf32>
    %151 = arith.mulf %140, %113 : vector<2x128xf32>
    %152 = arith.mulf %132, %142 : vector<2x128xf32>
    %153 = arith.addf %151, %152 : vector<2x128xf32>
    %154 = math.tanh %153 : vector<2x128xf32>
    %155 = arith.mulf %150, %154 : vector<2x128xf32>
    %156 = arith.truncf %155 : vector<2x128xf32> to vector<2x128xbf16>
    %c1_87 = arith.constant 1 : index
    %c0_88 = arith.constant 0 : index
    %c0_89 = arith.constant 0 : index
    %157 = vector.load %arg5[%c1_87, %c0_88, %c0_89] : memref<8x2x128xbf16, #tpu.memory_space<vmem>>, vector<1x2x128xbf16>
    %158 = vector.shape_cast %157 : vector<1x2x128xbf16> to vector<2x128xbf16>
    %159 = vector.shape_cast %156 : vector<2x128xbf16> to vector<1x2x128xbf16>
    tpu.vector_store %arg5[%c1_87, %c0_88, %c0_89], %159 {strides = array<i32>} : memref<8x2x128xbf16, #tpu.memory_space<vmem>>, vector<1x2x128xbf16>,
    %c2_90 = arith.constant 2 : index
    %c0_91 = arith.constant 0 : index
    %c0_92 = arith.constant 0 : index
    %160 = vector.load %arg8[%c2_90, %c0_91, %c0_92] : memref<8x2x512xf32, #tpu.memory_space<vmem>>, vector<1x2x512xf32>
    %161 = vector.shape_cast %160 : vector<1x2x512xf32> to vector<2x512xf32>
    %162 = arith.truncf %155 : vector<2x128xf32> to vector<2x128xbf16>
    %cst_93 = arith.constant dense<0.000000e+00> : vector<2x512xf32>
    %163 = tpu.matmul %162, %4, %cst_93 {dimension_numbers = #tpu.dot_dimension_numbers<[1], [0], [0], [1], [0, 0, 1, 1], [], []>} : vector<2x128xbf16>, vector<128x512xbf16>, vector<2x512xf32> -> vector<2x512xf32>
    %164 = arith.addf %161, %163 : vector<2x512xf32>
    %165 = vector.extract_strided_slice %164 {offsets = [0, 0], sizes = [2, 128], strides = [1, 1]} : vector<2x512xf32> to vector<2x128xf32>
    %cst_94 = arith.constant 5.000000e-01 : f32
    %166 = vector.broadcast %cst_94 : f32 to vector<2x128xf32>
    %167 = arith.mulf %166, %165 : vector<2x128xf32>
    %168 = math.tanh %167 : vector<2x128xf32>
    %cst_95 = arith.constant 5.000000e-01 : f32
    %169 = vector.broadcast %cst_95 : f32 to vector<2x128xf32>
    %170 = arith.mulf %169, %168 : vector<2x128xf32>
    %cst_96 = arith.constant 5.000000e-01 : f32
    %171 = vector.broadcast %cst_96 : f32 to vector<2x128xf32>
    %172 = arith.addf %170, %171 : vector<2x128xf32>
    %173 = vector.extract_strided_slice %164 {offsets = [0, 128], sizes = [2, 128], strides = [1, 1]} : vector<2x512xf32> to vector<2x128xf32>
    %cst_97 = arith.constant 5.000000e-01 : f32
    %174 = vector.broadcast %cst_97 : f32 to vector<2x128xf32>
    %175 = arith.mulf %174, %173 : vector<2x128xf32>
    %176 = math.tanh %175 : vector<2x128xf32>
    %cst_98 = arith.constant 5.000000e-01 : f32
    %177 = vector.broadcast %cst_98 : f32 to vector<2x128xf32>
    %178 = arith.mulf %177, %176 : vector<2x128xf32>
    %cst_99 = arith.constant 5.000000e-01 : f32
    %179 = vector.broadcast %cst_99 : f32 to vector<2x128xf32>
    %180 = arith.addf %178, %179 : vector<2x128xf32>
    %181 = vector.extract_strided_slice %164 {offsets = [0, 256], sizes = [2, 128], strides = [1, 1]} : vector<2x512xf32> to vector<2x128xf32>
    %182 = math.tanh %181 : vector<2x128xf32>
    %183 = vector.extract_strided_slice %164 {offsets = [0, 384], sizes = [2, 128], strides = [1, 1]} : vector<2x512xf32> to vector<2x128xf32>
    %cst_100 = arith.constant 5.000000e-01 : f32
    %184 = vector.broadcast %cst_100 : f32 to vector<2x128xf32>
    %185 = arith.mulf %184, %183 : vector<2x128xf32>
    %186 = math.tanh %185 : vector<2x128xf32>
    %cst_101 = arith.constant 5.000000e-01 : f32
    %187 = vector.broadcast %cst_101 : f32 to vector<2x128xf32>
    %188 = arith.mulf %187, %186 : vector<2x128xf32>
    %cst_102 = arith.constant 5.000000e-01 : f32
    %189 = vector.broadcast %cst_102 : f32 to vector<2x128xf32>
    %190 = arith.addf %188, %189 : vector<2x128xf32>
    %191 = arith.mulf %180, %153 : vector<2x128xf32>
    %192 = arith.mulf %172, %182 : vector<2x128xf32>
    %193 = arith.addf %191, %192 : vector<2x128xf32>
    %194 = math.tanh %193 : vector<2x128xf32>
    %195 = arith.mulf %190, %194 : vector<2x128xf32>
    %196 = arith.truncf %195 : vector<2x128xf32> to vector<2x128xbf16>
    %c2_103 = arith.constant 2 : index
    %c0_104 = arith.constant 0 : index
    %c0_105 = arith.constant 0 : index
    %197 = vector.load %arg5[%c2_103, %c0_104, %c0_105] : memref<8x2x128xbf16, #tpu.memory_space<vmem>>, vector<1x2x128xbf16>
    %198 = vector.shape_cast %197 : vector<1x2x128xbf16> to vector<2x128xbf16>
    %199 = vector.shape_cast %196 : vector<2x128xbf16> to vector<1x2x128xbf16>
    tpu.vector_store %arg5[%c2_103, %c0_104, %c0_105], %199 {strides = array<i32>} : memref<8x2x128xbf16, #tpu.memory_space<vmem>>, vector<1x2x128xbf16>,
    %c3_106 = arith.constant 3 : index
    %c0_107 = arith.constant 0 : index
    %c0_108 = arith.constant 0 : index
    %200 = vector.load %arg8[%c3_106, %c0_107, %c0_108] : memref<8x2x512xf32, #tpu.memory_space<vmem>>, vector<1x2x512xf32>
    %201 = vector.shape_cast %200 : vector<1x2x512xf32> to vector<2x512xf32>
    %202 = arith.truncf %195 : vector<2x128xf32> to vector<2x128xbf16>
    %cst_109 = arith.constant dense<0.000000e+00> : vector<2x512xf32>
    %203 = tpu.matmul %202, %4, %cst_109 {dimension_numbers = #tpu.dot_dimension_numbers<[1], [0], [0], [1], [0, 0, 1, 1], [], []>} : vector<2x128xbf16>, vector<128x512xbf16>, vector<2x512xf32> -> vector<2x512xf32>
    %204 = arith.addf %201, %203 : vector<2x512xf32>
    %205 = vector.extract_strided_slice %204 {offsets = [0, 0], sizes = [2, 128], strides = [1, 1]} : vector<2x512xf32> to vector<2x128xf32>
    %cst_110 = arith.constant 5.000000e-01 : f32
    %206 = vector.broadcast %cst_110 : f32 to vector<2x128xf32>
    %207 = arith.mulf %206, %205 : vector<2x128xf32>
    %208 = math.tanh %207 : vector<2x128xf32>
    %cst_111 = arith.constant 5.000000e-01 : f32
    %209 = vector.broadcast %cst_111 : f32 to vector<2x128xf32>
    %210 = arith.mulf %209, %208 : vector<2x128xf32>
    %cst_112 = arith.constant 5.000000e-01 : f32
    %211 = vector.broadcast %cst_112 : f32 to vector<2x128xf32>
    %212 = arith.addf %210, %211 : vector<2x128xf32>
    %213 = vector.extract_strided_slice %204 {offsets = [0, 128], sizes = [2, 128], strides = [1, 1]} : vector<2x512xf32> to vector<2x128xf32>
    %cst_113 = arith.constant 5.000000e-01 : f32
    %214 = vector.broadcast %cst_113 : f32 to vector<2x128xf32>
    %215 = arith.mulf %214, %213 : vector<2x128xf32>
    %216 = math.tanh %215 : vector<2x128xf32>
    %cst_114 = arith.constant 5.000000e-01 : f32
    %217 = vector.broadcast %cst_114 : f32 to vector<2x128xf32>
    %218 = arith.mulf %217, %216 : vector<2x128xf32>
    %cst_115 = arith.constant 5.000000e-01 : f32
    %219 = vector.broadcast %cst_115 : f32 to vector<2x128xf32>
    %220 = arith.addf %218, %219 : vector<2x128xf32>
    %221 = vector.extract_strided_slice %204 {offsets = [0, 256], sizes = [2, 128], strides = [1, 1]} : vector<2x512xf32> to vector<2x128xf32>
    %222 = math.tanh %221 : vector<2x128xf32>
    %223 = vector.extract_strided_slice %204 {offsets = [0, 384], sizes = [2, 128], strides = [1, 1]} : vector<2x512xf32> to vector<2x128xf32>
    %cst_116 = arith.constant 5.000000e-01 : f32
    %224 = vector.broadcast %cst_116 : f32 to vector<2x128xf32>
    %225 = arith.mulf %224, %223 : vector<2x128xf32>
    %226 = math.tanh %225 : vector<2x128xf32>
    %cst_117 = arith.constant 5.000000e-01 : f32
    %227 = vector.broadcast %cst_117 : f32 to vector<2x128xf32>
    %228 = arith.mulf %227, %226 : vector<2x128xf32>
    %cst_118 = arith.constant 5.000000e-01 : f32
    %229 = vector.broadcast %cst_118 : f32 to vector<2x128xf32>
    %230 = arith.addf %228, %229 : vector<2x128xf32>
    %231 = arith.mulf %220, %193 : vector<2x128xf32>
    %232 = arith.mulf %212, %222 : vector<2x128xf32>
    %233 = arith.addf %231, %232 : vector<2x128xf32>
    %234 = math.tanh %233 : vector<2x128xf32>
    %235 = arith.mulf %230, %234 : vector<2x128xf32>
    %236 = arith.truncf %235 : vector<2x128xf32> to vector<2x128xbf16>
    %c3_119 = arith.constant 3 : index
    %c0_120 = arith.constant 0 : index
    %c0_121 = arith.constant 0 : index
    %237 = vector.load %arg5[%c3_119, %c0_120, %c0_121] : memref<8x2x128xbf16, #tpu.memory_space<vmem>>, vector<1x2x128xbf16>
    %238 = vector.shape_cast %237 : vector<1x2x128xbf16> to vector<2x128xbf16>
    %239 = vector.shape_cast %236 : vector<2x128xbf16> to vector<1x2x128xbf16>
    tpu.vector_store %arg5[%c3_119, %c0_120, %c0_121], %239 {strides = array<i32>} : memref<8x2x128xbf16, #tpu.memory_space<vmem>>, vector<1x2x128xbf16>,
    %c4_122 = arith.constant 4 : index
    %c0_123 = arith.constant 0 : index
    %c0_124 = arith.constant 0 : index
    %240 = vector.load %arg8[%c4_122, %c0_123, %c0_124] : memref<8x2x512xf32, #tpu.memory_space<vmem>>, vector<1x2x512xf32>
    %241 = vector.shape_cast %240 : vector<1x2x512xf32> to vector<2x512xf32>
    %242 = arith.truncf %235 : vector<2x128xf32> to vector<2x128xbf16>
    %cst_125 = arith.constant dense<0.000000e+00> : vector<2x512xf32>
    %243 = tpu.matmul %242, %4, %cst_125 {dimension_numbers = #tpu.dot_dimension_numbers<[1], [0], [0], [1], [0, 0, 1, 1], [], []>} : vector<2x128xbf16>, vector<128x512xbf16>, vector<2x512xf32> -> vector<2x512xf32>
    %244 = arith.addf %241, %243 : vector<2x512xf32>
    %245 = vector.extract_strided_slice %244 {offsets = [0, 0], sizes = [2, 128], strides = [1, 1]} : vector<2x512xf32> to vector<2x128xf32>
    %cst_126 = arith.constant 5.000000e-01 : f32
    %246 = vector.broadcast %cst_126 : f32 to vector<2x128xf32>
    %247 = arith.mulf %246, %245 : vector<2x128xf32>
    %248 = math.tanh %247 : vector<2x128xf32>
    %cst_127 = arith.constant 5.000000e-01 : f32
    %249 = vector.broadcast %cst_127 : f32 to vector<2x128xf32>
    %250 = arith.mulf %249, %248 : vector<2x128xf32>
    %cst_128 = arith.constant 5.000000e-01 : f32
    %251 = vector.broadcast %cst_128 : f32 to vector<2x128xf32>
    %252 = arith.addf %250, %251 : vector<2x128xf32>
    %253 = vector.extract_strided_slice %244 {offsets = [0, 128], sizes = [2, 128], strides = [1, 1]} : vector<2x512xf32> to vector<2x128xf32>
    %cst_129 = arith.constant 5.000000e-01 : f32
    %254 = vector.broadcast %cst_129 : f32 to vector<2x128xf32>
    %255 = arith.mulf %254, %253 : vector<2x128xf32>
    %256 = math.tanh %255 : vector<2x128xf32>
    %cst_130 = arith.constant 5.000000e-01 : f32
    %257 = vector.broadcast %cst_130 : f32 to vector<2x128xf32>
    %258 = arith.mulf %257, %256 : vector<2x128xf32>
    %cst_131 = arith.constant 5.000000e-01 : f32
    %259 = vector.broadcast %cst_131 : f32 to vector<2x128xf32>
    %260 = arith.addf %258, %259 : vector<2x128xf32>
    %261 = vector.extract_strided_slice %244 {offsets = [0, 256], sizes = [2, 128], strides = [1, 1]} : vector<2x512xf32> to vector<2x128xf32>
    %262 = math.tanh %261 : vector<2x128xf32>
    %263 = vector.extract_strided_slice %244 {offsets = [0, 384], sizes = [2, 128], strides = [1, 1]} : vector<2x512xf32> to vector<2x128xf32>
    %cst_132 = arith.constant 5.000000e-01 : f32
    %264 = vector.broadcast %cst_132 : f32 to vector<2x128xf32>
    %265 = arith.mulf %264, %263 : vector<2x128xf32>
    %266 = math.tanh %265 : vector<2x128xf32>
    %cst_133 = arith.constant 5.000000e-01 : f32
    %267 = vector.broadcast %cst_133 : f32 to vector<2x128xf32>
    %268 = arith.mulf %267, %266 : vector<2x128xf32>
    %cst_134 = arith.constant 5.000000e-01 : f32
    %269 = vector.broadcast %cst_134 : f32 to vector<2x128xf32>
    %270 = arith.addf %268, %269 : vector<2x128xf32>
    %271 = arith.mulf %260, %233 : vector<2x128xf32>
    %272 = arith.mulf %252, %262 : vector<2x128xf32>
    %273 = arith.addf %271, %272 : vector<2x128xf32>
    %274 = math.tanh %273 : vector<2x128xf32>
    %275 = arith.mulf %270, %274 : vector<2x128xf32>
    %276 = arith.truncf %275 : vector<2x128xf32> to vector<2x128xbf16>
    %c4_135 = arith.constant 4 : index
    %c0_136 = arith.constant 0 : index
    %c0_137 = arith.constant 0 : index
    %277 = vector.load %arg5[%c4_135, %c0_136, %c0_137] : memref<8x2x128xbf16, #tpu.memory_space<vmem>>, vector<1x2x128xbf16>
    %278 = vector.shape_cast %277 : vector<1x2x128xbf16> to vector<2x128xbf16>
    %279 = vector.shape_cast %276 : vector<2x128xbf16> to vector<1x2x128xbf16>
    tpu.vector_store %arg5[%c4_135, %c0_136, %c0_137], %279 {strides = array<i32>} : memref<8x2x128xbf16, #tpu.memory_space<vmem>>, vector<1x2x128xbf16>,
    %c5_138 = arith.constant 5 : index
    %c0_139 = arith.constant 0 : index
    %c0_140 = arith.constant 0 : index
    %280 = vector.load %arg8[%c5_138, %c0_139, %c0_140] : memref<8x2x512xf32, #tpu.memory_space<vmem>>, vector<1x2x512xf32>
    %281 = vector.shape_cast %280 : vector<1x2x512xf32> to vector<2x512xf32>
    %282 = arith.truncf %275 : vector<2x128xf32> to vector<2x128xbf16>
    %cst_141 = arith.constant dense<0.000000e+00> : vector<2x512xf32>
    %283 = tpu.matmul %282, %4, %cst_141 {dimension_numbers = #tpu.dot_dimension_numbers<[1], [0], [0], [1], [0, 0, 1, 1], [], []>} : vector<2x128xbf16>, vector<128x512xbf16>, vector<2x512xf32> -> vector<2x512xf32>
    %284 = arith.addf %281, %283 : vector<2x512xf32>
    %285 = vector.extract_strided_slice %284 {offsets = [0, 0], sizes = [2, 128], strides = [1, 1]} : vector<2x512xf32> to vector<2x128xf32>
    %cst_142 = arith.constant 5.000000e-01 : f32
    %286 = vector.broadcast %cst_142 : f32 to vector<2x128xf32>
    %287 = arith.mulf %286, %285 : vector<2x128xf32>
    %288 = math.tanh %287 : vector<2x128xf32>
    %cst_143 = arith.constant 5.000000e-01 : f32
    %289 = vector.broadcast %cst_143 : f32 to vector<2x128xf32>
    %290 = arith.mulf %289, %288 : vector<2x128xf32>
    %cst_144 = arith.constant 5.000000e-01 : f32
    %291 = vector.broadcast %cst_144 : f32 to vector<2x128xf32>
    %292 = arith.addf %290, %291 : vector<2x128xf32>
    %293 = vector.extract_strided_slice %284 {offsets = [0, 128], sizes = [2, 128], strides = [1, 1]} : vector<2x512xf32> to vector<2x128xf32>
    %cst_145 = arith.constant 5.000000e-01 : f32
    %294 = vector.broadcast %cst_145 : f32 to vector<2x128xf32>
    %295 = arith.mulf %294, %293 : vector<2x128xf32>
    %296 = math.tanh %295 : vector<2x128xf32>
    %cst_146 = arith.constant 5.000000e-01 : f32
    %297 = vector.broadcast %cst_146 : f32 to vector<2x128xf32>
    %298 = arith.mulf %297, %296 : vector<2x128xf32>
    %cst_147 = arith.constant 5.000000e-01 : f32
    %299 = vector.broadcast %cst_147 : f32 to vector<2x128xf32>
    %300 = arith.addf %298, %299 : vector<2x128xf32>
    %301 = vector.extract_strided_slice %284 {offsets = [0, 256], sizes = [2, 128], strides = [1, 1]} : vector<2x512xf32> to vector<2x128xf32>
    %302 = math.tanh %301 : vector<2x128xf32>
    %303 = vector.extract_strided_slice %284 {offsets = [0, 384], sizes = [2, 128], strides = [1, 1]} : vector<2x512xf32> to vector<2x128xf32>
    %cst_148 = arith.constant 5.000000e-01 : f32
    %304 = vector.broadcast %cst_148 : f32 to vector<2x128xf32>
    %305 = arith.mulf %304, %303 : vector<2x128xf32>
    %306 = math.tanh %305 : vector<2x128xf32>
    %cst_149 = arith.constant 5.000000e-01 : f32
    %307 = vector.broadcast %cst_149 : f32 to vector<2x128xf32>
    %308 = arith.mulf %307, %306 : vector<2x128xf32>
    %cst_150 = arith.constant 5.000000e-01 : f32
    %309 = vector.broadcast %cst_150 : f32 to vector<2x128xf32>
    %310 = arith.addf %308, %309 : vector<2x128xf32>
    %311 = arith.mulf %300, %273 : vector<2x128xf32>
    %312 = arith.mulf %292, %302 : vector<2x128xf32>
    %313 = arith.addf %311, %312 : vector<2x128xf32>
    %314 = math.tanh %313 : vector<2x128xf32>
    %315 = arith.mulf %310, %314 : vector<2x128xf32>
    %316 = arith.truncf %315 : vector<2x128xf32> to vector<2x128xbf16>
    %c5_151 = arith.constant 5 : index
    %c0_152 = arith.constant 0 : index
    %c0_153 = arith.constant 0 : index
    %317 = vector.load %arg5[%c5_151, %c0_152, %c0_153] : memref<8x2x128xbf16, #tpu.memory_space<vmem>>, vector<1x2x128xbf16>
    %318 = vector.shape_cast %317 : vector<1x2x128xbf16> to vector<2x128xbf16>
    %319 = vector.shape_cast %316 : vector<2x128xbf16> to vector<1x2x128xbf16>
    tpu.vector_store %arg5[%c5_151, %c0_152, %c0_153], %319 {strides = array<i32>} : memref<8x2x128xbf16, #tpu.memory_space<vmem>>, vector<1x2x128xbf16>,
    %c6_154 = arith.constant 6 : index
    %c0_155 = arith.constant 0 : index
    %c0_156 = arith.constant 0 : index
    %320 = vector.load %arg8[%c6_154, %c0_155, %c0_156] : memref<8x2x512xf32, #tpu.memory_space<vmem>>, vector<1x2x512xf32>
    %321 = vector.shape_cast %320 : vector<1x2x512xf32> to vector<2x512xf32>
    %322 = arith.truncf %315 : vector<2x128xf32> to vector<2x128xbf16>
    %cst_157 = arith.constant dense<0.000000e+00> : vector<2x512xf32>
    %323 = tpu.matmul %322, %4, %cst_157 {dimension_numbers = #tpu.dot_dimension_numbers<[1], [0], [0], [1], [0, 0, 1, 1], [], []>} : vector<2x128xbf16>, vector<128x512xbf16>, vector<2x512xf32> -> vector<2x512xf32>
    %324 = arith.addf %321, %323 : vector<2x512xf32>
    %325 = vector.extract_strided_slice %324 {offsets = [0, 0], sizes = [2, 128], strides = [1, 1]} : vector<2x512xf32> to vector<2x128xf32>
    %cst_158 = arith.constant 5.000000e-01 : f32
    %326 = vector.broadcast %cst_158 : f32 to vector<2x128xf32>
    %327 = arith.mulf %326, %325 : vector<2x128xf32>
    %328 = math.tanh %327 : vector<2x128xf32>
    %cst_159 = arith.constant 5.000000e-01 : f32
    %329 = vector.broadcast %cst_159 : f32 to vector<2x128xf32>
    %330 = arith.mulf %329, %328 : vector<2x128xf32>
    %cst_160 = arith.constant 5.000000e-01 : f32
    %331 = vector.broadcast %cst_160 : f32 to vector<2x128xf32>
    %332 = arith.addf %330, %331 : vector<2x128xf32>
    %333 = vector.extract_strided_slice %324 {offsets = [0, 128], sizes = [2, 128], strides = [1, 1]} : vector<2x512xf32> to vector<2x128xf32>
    %cst_161 = arith.constant 5.000000e-01 : f32
    %334 = vector.broadcast %cst_161 : f32 to vector<2x128xf32>
    %335 = arith.mulf %334, %333 : vector<2x128xf32>
    %336 = math.tanh %335 : vector<2x128xf32>
    %cst_162 = arith.constant 5.000000e-01 : f32
    %337 = vector.broadcast %cst_162 : f32 to vector<2x128xf32>
    %338 = arith.mulf %337, %336 : vector<2x128xf32>
    %cst_163 = arith.constant 5.000000e-01 : f32
    %339 = vector.broadcast %cst_163 : f32 to vector<2x128xf32>
    %340 = arith.addf %338, %339 : vector<2x128xf32>
    %341 = vector.extract_strided_slice %324 {offsets = [0, 256], sizes = [2, 128], strides = [1, 1]} : vector<2x512xf32> to vector<2x128xf32>
    %342 = math.tanh %341 : vector<2x128xf32>
    %343 = vector.extract_strided_slice %324 {offsets = [0, 384], sizes = [2, 128], strides = [1, 1]} : vector<2x512xf32> to vector<2x128xf32>
    %cst_164 = arith.constant 5.000000e-01 : f32
    %344 = vector.broadcast %cst_164 : f32 to vector<2x128xf32>
    %345 = arith.mulf %344, %343 : vector<2x128xf32>
    %346 = math.tanh %345 : vector<2x128xf32>
    %cst_165 = arith.constant 5.000000e-01 : f32
    %347 = vector.broadcast %cst_165 : f32 to vector<2x128xf32>
    %348 = arith.mulf %347, %346 : vector<2x128xf32>
    %cst_166 = arith.constant 5.000000e-01 : f32
    %349 = vector.broadcast %cst_166 : f32 to vector<2x128xf32>
    %350 = arith.addf %348, %349 : vector<2x128xf32>
    %351 = arith.mulf %340, %313 : vector<2x128xf32>
    %352 = arith.mulf %332, %342 : vector<2x128xf32>
    %353 = arith.addf %351, %352 : vector<2x128xf32>
    %354 = math.tanh %353 : vector<2x128xf32>
    %355 = arith.mulf %350, %354 : vector<2x128xf32>
    %356 = arith.truncf %355 : vector<2x128xf32> to vector<2x128xbf16>
    %c6_167 = arith.constant 6 : index
    %c0_168 = arith.constant 0 : index
    %c0_169 = arith.constant 0 : index
    %357 = vector.load %arg5[%c6_167, %c0_168, %c0_169] : memref<8x2x128xbf16, #tpu.memory_space<vmem>>, vector<1x2x128xbf16>
    %358 = vector.shape_cast %357 : vector<1x2x128xbf16> to vector<2x128xbf16>
    %359 = vector.shape_cast %356 : vector<2x128xbf16> to vector<1x2x128xbf16>
    tpu.vector_store %arg5[%c6_167, %c0_168, %c0_169], %359 {strides = array<i32>} : memref<8x2x128xbf16, #tpu.memory_space<vmem>>, vector<1x2x128xbf16>,
    %c7_170 = arith.constant 7 : index
    %c0_171 = arith.constant 0 : index
    %c0_172 = arith.constant 0 : index
    %360 = vector.load %arg8[%c7_170, %c0_171, %c0_172] : memref<8x2x512xf32, #tpu.memory_space<vmem>>, vector<1x2x512xf32>
    %361 = vector.shape_cast %360 : vector<1x2x512xf32> to vector<2x512xf32>
    %362 = arith.truncf %355 : vector<2x128xf32> to vector<2x128xbf16>
    %cst_173 = arith.constant dense<0.000000e+00> : vector<2x512xf32>
    %363 = tpu.matmul %362, %4, %cst_173 {dimension_numbers = #tpu.dot_dimension_numbers<[1], [0], [0], [1], [0, 0, 1, 1], [], []>} : vector<2x128xbf16>, vector<128x512xbf16>, vector<2x512xf32> -> vector<2x512xf32>
    %364 = arith.addf %361, %363 : vector<2x512xf32>
    %365 = vector.extract_strided_slice %364 {offsets = [0, 0], sizes = [2, 128], strides = [1, 1]} : vector<2x512xf32> to vector<2x128xf32>
    %cst_174 = arith.constant 5.000000e-01 : f32
    %366 = vector.broadcast %cst_174 : f32 to vector<2x128xf32>
    %367 = arith.mulf %366, %365 : vector<2x128xf32>
    %368 = math.tanh %367 : vector<2x128xf32>
    %cst_175 = arith.constant 5.000000e-01 : f32
    %369 = vector.broadcast %cst_175 : f32 to vector<2x128xf32>
    %370 = arith.mulf %369, %368 : vector<2x128xf32>
    %cst_176 = arith.constant 5.000000e-01 : f32
    %371 = vector.broadcast %cst_176 : f32 to vector<2x128xf32>
    %372 = arith.addf %370, %371 : vector<2x128xf32>
    %373 = vector.extract_strided_slice %364 {offsets = [0, 128], sizes = [2, 128], strides = [1, 1]} : vector<2x512xf32> to vector<2x128xf32>
    %cst_177 = arith.constant 5.000000e-01 : f32
    %374 = vector.broadcast %cst_177 : f32 to vector<2x128xf32>
    %375 = arith.mulf %374, %373 : vector<2x128xf32>
    %376 = math.tanh %375 : vector<2x128xf32>
    %cst_178 = arith.constant 5.000000e-01 : f32
    %377 = vector.broadcast %cst_178 : f32 to vector<2x128xf32>
    %378 = arith.mulf %377, %376 : vector<2x128xf32>
    %cst_179 = arith.constant 5.000000e-01 : f32
    %379 = vector.broadcast %cst_179 : f32 to vector<2x128xf32>
    %380 = arith.addf %378, %379 : vector<2x128xf32>
    %381 = vector.extract_strided_slice %364 {offsets = [0, 256], sizes = [2, 128], strides = [1, 1]} : vector<2x512xf32> to vector<2x128xf32>
    %382 = math.tanh %381 : vector<2x128xf32>
    %383 = vector.extract_strided_slice %364 {offsets = [0, 384], sizes = [2, 128], strides = [1, 1]} : vector<2x512xf32> to vector<2x128xf32>
    %cst_180 = arith.constant 5.000000e-01 : f32
    %384 = vector.broadcast %cst_180 : f32 to vector<2x128xf32>
    %385 = arith.mulf %384, %383 : vector<2x128xf32>
    %386 = math.tanh %385 : vector<2x128xf32>
    %cst_181 = arith.constant 5.000000e-01 : f32
    %387 = vector.broadcast %cst_181 : f32 to vector<2x128xf32>
    %388 = arith.mulf %387, %386 : vector<2x128xf32>
    %cst_182 = arith.constant 5.000000e-01 : f32
    %389 = vector.broadcast %cst_182 : f32 to vector<2x128xf32>
    %390 = arith.addf %388, %389 : vector<2x128xf32>
    %391 = arith.mulf %380, %353 : vector<2x128xf32>
    %392 = arith.mulf %372, %382 : vector<2x128xf32>
    %393 = arith.addf %391, %392 : vector<2x128xf32>
    %394 = math.tanh %393 : vector<2x128xf32>
    %395 = arith.mulf %390, %394 : vector<2x128xf32>
    %396 = arith.truncf %395 : vector<2x128xf32> to vector<2x128xbf16>
    %c7_183 = arith.constant 7 : index
    %c0_184 = arith.constant 0 : index
    %c0_185 = arith.constant 0 : index
    %397 = vector.load %arg5[%c7_183, %c0_184, %c0_185] : memref<8x2x128xbf16, #tpu.memory_space<vmem>>, vector<1x2x128xbf16>
    %398 = vector.shape_cast %397 : vector<1x2x128xbf16> to vector<2x128xbf16>
    %399 = vector.shape_cast %396 : vector<2x128xbf16> to vector<1x2x128xbf16>
    tpu.vector_store %arg5[%c7_183, %c0_184, %c0_185], %399 {strides = array<i32>} : memref<8x2x128xbf16, #tpu.memory_space<vmem>>, vector<1x2x128xbf16>,
    %c0_186 = arith.constant 0 : index
    %c0_187 = arith.constant 0 : index
    %400 = vector.load %arg9[%c0_186, %c0_187] : memref<2x128xf32, #tpu.memory_space<vmem>>, vector<2x128xf32>
    tpu.vector_store %arg9[%c0_186, %c0_187], %395 {strides = array<i32>} : memref<2x128xf32, #tpu.memory_space<vmem>>, vector<2x128xf32>,
    %c0_188 = arith.constant 0 : index
    %c0_189 = arith.constant 0 : index
    %401 = vector.load %arg10[%c0_188, %c0_189] : memref<2x128xf32, #tpu.memory_space<vmem>>, vector<2x128xf32>
    tpu.vector_store %arg10[%c0_188, %c0_189], %393 {strides = array<i32>} : memref<2x128xf32, #tpu.memory_space<vmem>>, vector<2x128xf32>,
    %c0_i32_190 = arith.constant 0 : i32
    %402 = arith.cmpi eq, %arg0, %c0_i32_190 : i32
    %403 = arith.extui %402 : i1 to i32
    %c0_i32_191 = arith.constant 0 : i32
    %404 = arith.cmpi ne, %403, %c0_i32_191 : i32
    scf.if %404 {
      %c0_192 = arith.constant 0 : index
      %c0_193 = arith.constant 0 : index
      %405 = vector.load %arg6[%c0_192, %c0_193] : memref<2x128xf32, #tpu.memory_space<vmem>>, vector<2x128xf32>
      tpu.vector_store %arg6[%c0_192, %c0_193], %395 {strides = array<i32>} : memref<2x128xf32, #tpu.memory_space<vmem>>, vector<2x128xf32>,
      %c0_194 = arith.constant 0 : index
      %c0_195 = arith.constant 0 : index
      %406 = vector.load %arg7[%c0_194, %c0_195] : memref<2x128xf32, #tpu.memory_space<vmem>>, vector<2x128xf32>
      tpu.vector_store %arg7[%c0_194, %c0_195], %393 {strides = array<i32>} : memref<2x128xf32, #tpu.memory_space<vmem>>, vector<2x128xf32>,
    } else {
    }
    return
  }
  func.func @transform_0(%arg0: i32) -> (i32, i32, i32) {
    %c0_i32 = arith.constant 0 : i32
    %c0_i32_0 = arith.constant 0 : i32
    %c0_i32_1 = arith.constant 0 : i32
    return %arg0, %c0_i32, %c0_i32_0 : i32, i32, i32
  }
  func.func @transform_1(%arg0: i32) -> (i32, i32) {
    %c0_i32 = arith.constant 0 : i32
    %c0_i32_0 = arith.constant 0 : i32
    %c0_i32_1 = arith.constant 0 : i32
    return %c0_i32, %c0_i32_0 : i32, i32
  }
  func.func @transform_2(%arg0: i32) -> (i32, i32) {
    %c0_i32 = arith.constant 0 : i32
    %c0_i32_0 = arith.constant 0 : i32
    %c0_i32_1 = arith.constant 0 : i32
    return %c0_i32, %c0_i32_0 : i32, i32
  }
  func.func @transform_3(%arg0: i32) -> (i32, i32) {
    %c0_i32 = arith.constant 0 : i32
    %c0_i32_0 = arith.constant 0 : i32
    %c0_i32_1 = arith.constant 0 : i32
    return %c0_i32, %c0_i32_0 : i32, i32
  }
  func.func @transform_4(%arg0: i32) -> (i32, i32, i32) {
    %c0_i32 = arith.constant 0 : i32
    %c0_i32_0 = arith.constant 0 : i32
    %c0_i32_1 = arith.constant 0 : i32
    return %arg0, %c0_i32, %c0_i32_0 : i32, i32, i32
  }
  func.func @transform_5(%arg0: i32) -> (i32, i32) {
    %c0_i32 = arith.constant 0 : i32
    %c0_i32_0 = arith.constant 0 : i32
    %c0_i32_1 = arith.constant 0 : i32
    return %c0_i32, %c0_i32_0 : i32, i32
  }
  func.func @transform_6(%arg0: i32) -> (i32, i32) {
    %c0_i32 = arith.constant 0 : i32
    %c0_i32_0 = arith.constant 0 : i32
    %c0_i32_1 = arith.constant 0 : i32
    return %c0_i32, %c0_i32_0 : i32, i32
  }
}

module attributes {stable_mosaic.version = 11 : i64} {
  func.func @lstm_layer_kernel(%arg0: i32, %arg1: memref<8x2x128xbf16, #tpu.memory_space<vmem>>, %arg2: memref<128x512xbf16, #tpu.memory_space<vmem>>, %arg3: memref<128x512xbf16, #tpu.memory_space<vmem>>, %arg4: memref<1x512xf32, #tpu.memory_space<vmem>>, %arg5: memref<8x2x128xbf16, #tpu.memory_space<vmem>>, %arg6: memref<2x128xf32, #tpu.memory_space<vmem>>, %arg7: memref<2x128xf32, #tpu.memory_space<vmem>>, %arg8: memref<8x2x512xf32, #tpu.memory_space<vmem>>, %arg9: memref<2x128xf32, #tpu.memory_space<vmem>>, %arg10: memref<2x128xf32, #tpu.memory_space<vmem>>) attributes {dimension_semantics = [#tpu.dimension_semantics<arbitrary>], iteration_bounds = array<i64: 1>, scalar_prefetch = 0 : i64, scratch_operands = 3 : i64, tpu.core_type = #tpu.core_type<tc>, window_params = [{transform_indices = @transform_0, window_bounds = array<i64: 8, 2, 128>}, {pipeline_mode = #tpu.pipeline_mode<synchronous>, transform_indices = @transform_1, window_bounds = array<i64: 128, 512>}, {pipeline_mode = #tpu.pipeline_mode<synchronous>, transform_indices = @transform_2, window_bounds = array<i64: 128, 512>}, {pipeline_mode = #tpu.pipeline_mode<synchronous>, transform_indices = @transform_3, window_bounds = array<i64: 1, 512>}, {transform_indices = @transform_4, window_bounds = array<i64: 8, 2, 128>}, {pipeline_mode = #tpu.pipeline_mode<synchronous>, transform_indices = @transform_5, window_bounds = array<i64: 2, 128>}, {pipeline_mode = #tpu.pipeline_mode<synchronous>, transform_indices = @transform_6, window_bounds = array<i64: 2, 128>}]} {
    %c0_i32 = arith.constant 0 : i32
    %0 = arith.cmpi eq, %arg0, %c0_i32 : i32
    %1 = arith.extui %0 : i1 to i32
    %c0_i32_0 = arith.constant 0 : i32
    %2 = arith.cmpi ne, %1, %c0_i32_0 : i32
    scf.if %2 {
      %cst_192 = arith.constant 0.000000e+00 : f32
      %397 = vector.broadcast %cst_192 : f32 to vector<2x128xf32>
      %c0_193 = arith.constant 0 : index
      %c0_194 = arith.constant 0 : index
      %398 = vector.load %arg9[%c0_193, %c0_194] : memref<2x128xf32, #tpu.memory_space<vmem>>, vector<2x128xf32>
      tpu.vector_store %arg9[%c0_193, %c0_194], %397 {strides = array<i32>} : memref<2x128xf32, #tpu.memory_space<vmem>>, vector<2x128xf32>,
      %cst_195 = arith.constant 0.000000e+00 : f32
      %399 = vector.broadcast %cst_195 : f32 to vector<2x128xf32>
      %c0_196 = arith.constant 0 : index
      %c0_197 = arith.constant 0 : index
      %400 = vector.load %arg10[%c0_196, %c0_197] : memref<2x128xf32, #tpu.memory_space<vmem>>, vector<2x128xf32>
      tpu.vector_store %arg10[%c0_196, %c0_197], %399 {strides = array<i32>} : memref<2x128xf32, #tpu.memory_space<vmem>>, vector<2x128xf32>,
    } else {
    }
    %c0 = arith.constant 0 : index
    %c0_1 = arith.constant 0 : index
    %3 = vector.load %arg2[%c0, %c0_1] : memref<128x512xbf16, #tpu.memory_space<vmem>>, vector<128x512xbf16>
    %c0_2 = arith.constant 0 : index
    %c0_3 = arith.constant 0 : index
    %4 = vector.load %arg3[%c0_2, %c0_3] : memref<128x512xbf16, #tpu.memory_space<vmem>>, vector<128x512xbf16>
    %c0_4 = arith.constant 0 : index
    %c0_5 = arith.constant 0 : index
    %5 = vector.load %arg4[%c0_4, %c0_5] : memref<1x512xf32, #tpu.memory_space<vmem>>, vector<1x512xf32>
    %c0_6 = arith.constant 0 : index
    %c0_7 = arith.constant 0 : index
    %c0_8 = arith.constant 0 : index
    %6 = vector.load %arg1[%c0_6, %c0_7, %c0_8] : memref<8x2x128xbf16, #tpu.memory_space<vmem>>, vector<1x2x128xbf16>
    %7 = vector.shape_cast %6 : vector<1x2x128xbf16> to vector<2x128xbf16>
    %cst = arith.constant dense<0.000000e+00> : vector<2x512xf32>
    %8 = tpu.matmul %7, %3, %cst {dimension_numbers = #tpu.dot_dimension_numbers<[1], [0], [0], [1], [0, 0, 1, 1], [], []>} : vector<2x128xbf16>, vector<128x512xbf16>, vector<2x512xf32> -> vector<2x512xf32>
    %9 = vector.broadcast %5 : vector<1x512xf32> to vector<2x512xf32>
    %10 = arith.addf %8, %9 : vector<2x512xf32>
    %c0_9 = arith.constant 0 : index
    %c0_10 = arith.constant 0 : index
    %c0_11 = arith.constant 0 : index
    %11 = vector.load %arg8[%c0_9, %c0_10, %c0_11] : memref<8x2x512xf32, #tpu.memory_space<vmem>>, vector<1x2x512xf32>
    %12 = vector.shape_cast %11 : vector<1x2x512xf32> to vector<2x512xf32>
    %13 = vector.shape_cast %10 : vector<2x512xf32> to vector<1x2x512xf32>
    tpu.vector_store %arg8[%c0_9, %c0_10, %c0_11], %13 {strides = array<i32>} : memref<8x2x512xf32, #tpu.memory_space<vmem>>, vector<1x2x512xf32>,
    %c1 = arith.constant 1 : index
    %c0_12 = arith.constant 0 : index
    %c0_13 = arith.constant 0 : index
    %14 = vector.load %arg1[%c1, %c0_12, %c0_13] : memref<8x2x128xbf16, #tpu.memory_space<vmem>>, vector<1x2x128xbf16>
    %15 = vector.shape_cast %14 : vector<1x2x128xbf16> to vector<2x128xbf16>
    %cst_14 = arith.constant dense<0.000000e+00> : vector<2x512xf32>
    %16 = tpu.matmul %15, %3, %cst_14 {dimension_numbers = #tpu.dot_dimension_numbers<[1], [0], [0], [1], [0, 0, 1, 1], [], []>} : vector<2x128xbf16>, vector<128x512xbf16>, vector<2x512xf32> -> vector<2x512xf32>
    %17 = vector.broadcast %5 : vector<1x512xf32> to vector<2x512xf32>
    %18 = arith.addf %16, %17 : vector<2x512xf32>
    %c1_15 = arith.constant 1 : index
    %c0_16 = arith.constant 0 : index
    %c0_17 = arith.constant 0 : index
    %19 = vector.load %arg8[%c1_15, %c0_16, %c0_17] : memref<8x2x512xf32, #tpu.memory_space<vmem>>, vector<1x2x512xf32>
    %20 = vector.shape_cast %19 : vector<1x2x512xf32> to vector<2x512xf32>
    %21 = vector.shape_cast %18 : vector<2x512xf32> to vector<1x2x512xf32>
    tpu.vector_store %arg8[%c1_15, %c0_16, %c0_17], %21 {strides = array<i32>} : memref<8x2x512xf32, #tpu.memory_space<vmem>>, vector<1x2x512xf32>,
    %c2 = arith.constant 2 : index
    %c0_18 = arith.constant 0 : index
    %c0_19 = arith.constant 0 : index
    %22 = vector.load %arg1[%c2, %c0_18, %c0_19] : memref<8x2x128xbf16, #tpu.memory_space<vmem>>, vector<1x2x128xbf16>
    %23 = vector.shape_cast %22 : vector<1x2x128xbf16> to vector<2x128xbf16>
    %cst_20 = arith.constant dense<0.000000e+00> : vector<2x512xf32>
    %24 = tpu.matmul %23, %3, %cst_20 {dimension_numbers = #tpu.dot_dimension_numbers<[1], [0], [0], [1], [0, 0, 1, 1], [], []>} : vector<2x128xbf16>, vector<128x512xbf16>, vector<2x512xf32> -> vector<2x512xf32>
    %25 = vector.broadcast %5 : vector<1x512xf32> to vector<2x512xf32>
    %26 = arith.addf %24, %25 : vector<2x512xf32>
    %c2_21 = arith.constant 2 : index
    %c0_22 = arith.constant 0 : index
    %c0_23 = arith.constant 0 : index
    %27 = vector.load %arg8[%c2_21, %c0_22, %c0_23] : memref<8x2x512xf32, #tpu.memory_space<vmem>>, vector<1x2x512xf32>
    %28 = vector.shape_cast %27 : vector<1x2x512xf32> to vector<2x512xf32>
    %29 = vector.shape_cast %26 : vector<2x512xf32> to vector<1x2x512xf32>
    tpu.vector_store %arg8[%c2_21, %c0_22, %c0_23], %29 {strides = array<i32>} : memref<8x2x512xf32, #tpu.memory_space<vmem>>, vector<1x2x512xf32>,
    %c3 = arith.constant 3 : index
    %c0_24 = arith.constant 0 : index
    %c0_25 = arith.constant 0 : index
    %30 = vector.load %arg1[%c3, %c0_24, %c0_25] : memref<8x2x128xbf16, #tpu.memory_space<vmem>>, vector<1x2x128xbf16>
    %31 = vector.shape_cast %30 : vector<1x2x128xbf16> to vector<2x128xbf16>
    %cst_26 = arith.constant dense<0.000000e+00> : vector<2x512xf32>
    %32 = tpu.matmul %31, %3, %cst_26 {dimension_numbers = #tpu.dot_dimension_numbers<[1], [0], [0], [1], [0, 0, 1, 1], [], []>} : vector<2x128xbf16>, vector<128x512xbf16>, vector<2x512xf32> -> vector<2x512xf32>
    %33 = vector.broadcast %5 : vector<1x512xf32> to vector<2x512xf32>
    %34 = arith.addf %32, %33 : vector<2x512xf32>
    %c3_27 = arith.constant 3 : index
    %c0_28 = arith.constant 0 : index
    %c0_29 = arith.constant 0 : index
    %35 = vector.load %arg8[%c3_27, %c0_28, %c0_29] : memref<8x2x512xf32, #tpu.memory_space<vmem>>, vector<1x2x512xf32>
    %36 = vector.shape_cast %35 : vector<1x2x512xf32> to vector<2x512xf32>
    %37 = vector.shape_cast %34 : vector<2x512xf32> to vector<1x2x512xf32>
    tpu.vector_store %arg8[%c3_27, %c0_28, %c0_29], %37 {strides = array<i32>} : memref<8x2x512xf32, #tpu.memory_space<vmem>>, vector<1x2x512xf32>,
    %c4 = arith.constant 4 : index
    %c0_30 = arith.constant 0 : index
    %c0_31 = arith.constant 0 : index
    %38 = vector.load %arg1[%c4, %c0_30, %c0_31] : memref<8x2x128xbf16, #tpu.memory_space<vmem>>, vector<1x2x128xbf16>
    %39 = vector.shape_cast %38 : vector<1x2x128xbf16> to vector<2x128xbf16>
    %cst_32 = arith.constant dense<0.000000e+00> : vector<2x512xf32>
    %40 = tpu.matmul %39, %3, %cst_32 {dimension_numbers = #tpu.dot_dimension_numbers<[1], [0], [0], [1], [0, 0, 1, 1], [], []>} : vector<2x128xbf16>, vector<128x512xbf16>, vector<2x512xf32> -> vector<2x512xf32>
    %41 = vector.broadcast %5 : vector<1x512xf32> to vector<2x512xf32>
    %42 = arith.addf %40, %41 : vector<2x512xf32>
    %c4_33 = arith.constant 4 : index
    %c0_34 = arith.constant 0 : index
    %c0_35 = arith.constant 0 : index
    %43 = vector.load %arg8[%c4_33, %c0_34, %c0_35] : memref<8x2x512xf32, #tpu.memory_space<vmem>>, vector<1x2x512xf32>
    %44 = vector.shape_cast %43 : vector<1x2x512xf32> to vector<2x512xf32>
    %45 = vector.shape_cast %42 : vector<2x512xf32> to vector<1x2x512xf32>
    tpu.vector_store %arg8[%c4_33, %c0_34, %c0_35], %45 {strides = array<i32>} : memref<8x2x512xf32, #tpu.memory_space<vmem>>, vector<1x2x512xf32>,
    %c5 = arith.constant 5 : index
    %c0_36 = arith.constant 0 : index
    %c0_37 = arith.constant 0 : index
    %46 = vector.load %arg1[%c5, %c0_36, %c0_37] : memref<8x2x128xbf16, #tpu.memory_space<vmem>>, vector<1x2x128xbf16>
    %47 = vector.shape_cast %46 : vector<1x2x128xbf16> to vector<2x128xbf16>
    %cst_38 = arith.constant dense<0.000000e+00> : vector<2x512xf32>
    %48 = tpu.matmul %47, %3, %cst_38 {dimension_numbers = #tpu.dot_dimension_numbers<[1], [0], [0], [1], [0, 0, 1, 1], [], []>} : vector<2x128xbf16>, vector<128x512xbf16>, vector<2x512xf32> -> vector<2x512xf32>
    %49 = vector.broadcast %5 : vector<1x512xf32> to vector<2x512xf32>
    %50 = arith.addf %48, %49 : vector<2x512xf32>
    %c5_39 = arith.constant 5 : index
    %c0_40 = arith.constant 0 : index
    %c0_41 = arith.constant 0 : index
    %51 = vector.load %arg8[%c5_39, %c0_40, %c0_41] : memref<8x2x512xf32, #tpu.memory_space<vmem>>, vector<1x2x512xf32>
    %52 = vector.shape_cast %51 : vector<1x2x512xf32> to vector<2x512xf32>
    %53 = vector.shape_cast %50 : vector<2x512xf32> to vector<1x2x512xf32>
    tpu.vector_store %arg8[%c5_39, %c0_40, %c0_41], %53 {strides = array<i32>} : memref<8x2x512xf32, #tpu.memory_space<vmem>>, vector<1x2x512xf32>,
    %c6 = arith.constant 6 : index
    %c0_42 = arith.constant 0 : index
    %c0_43 = arith.constant 0 : index
    %54 = vector.load %arg1[%c6, %c0_42, %c0_43] : memref<8x2x128xbf16, #tpu.memory_space<vmem>>, vector<1x2x128xbf16>
    %55 = vector.shape_cast %54 : vector<1x2x128xbf16> to vector<2x128xbf16>
    %cst_44 = arith.constant dense<0.000000e+00> : vector<2x512xf32>
    %56 = tpu.matmul %55, %3, %cst_44 {dimension_numbers = #tpu.dot_dimension_numbers<[1], [0], [0], [1], [0, 0, 1, 1], [], []>} : vector<2x128xbf16>, vector<128x512xbf16>, vector<2x512xf32> -> vector<2x512xf32>
    %57 = vector.broadcast %5 : vector<1x512xf32> to vector<2x512xf32>
    %58 = arith.addf %56, %57 : vector<2x512xf32>
    %c6_45 = arith.constant 6 : index
    %c0_46 = arith.constant 0 : index
    %c0_47 = arith.constant 0 : index
    %59 = vector.load %arg8[%c6_45, %c0_46, %c0_47] : memref<8x2x512xf32, #tpu.memory_space<vmem>>, vector<1x2x512xf32>
    %60 = vector.shape_cast %59 : vector<1x2x512xf32> to vector<2x512xf32>
    %61 = vector.shape_cast %58 : vector<2x512xf32> to vector<1x2x512xf32>
    tpu.vector_store %arg8[%c6_45, %c0_46, %c0_47], %61 {strides = array<i32>} : memref<8x2x512xf32, #tpu.memory_space<vmem>>, vector<1x2x512xf32>,
    %c7 = arith.constant 7 : index
    %c0_48 = arith.constant 0 : index
    %c0_49 = arith.constant 0 : index
    %62 = vector.load %arg1[%c7, %c0_48, %c0_49] : memref<8x2x128xbf16, #tpu.memory_space<vmem>>, vector<1x2x128xbf16>
    %63 = vector.shape_cast %62 : vector<1x2x128xbf16> to vector<2x128xbf16>
    %cst_50 = arith.constant dense<0.000000e+00> : vector<2x512xf32>
    %64 = tpu.matmul %63, %3, %cst_50 {dimension_numbers = #tpu.dot_dimension_numbers<[1], [0], [0], [1], [0, 0, 1, 1], [], []>} : vector<2x128xbf16>, vector<128x512xbf16>, vector<2x512xf32> -> vector<2x512xf32>
    %65 = vector.broadcast %5 : vector<1x512xf32> to vector<2x512xf32>
    %66 = arith.addf %64, %65 : vector<2x512xf32>
    %c7_51 = arith.constant 7 : index
    %c0_52 = arith.constant 0 : index
    %c0_53 = arith.constant 0 : index
    %67 = vector.load %arg8[%c7_51, %c0_52, %c0_53] : memref<8x2x512xf32, #tpu.memory_space<vmem>>, vector<1x2x512xf32>
    %68 = vector.shape_cast %67 : vector<1x2x512xf32> to vector<2x512xf32>
    %69 = vector.shape_cast %66 : vector<2x512xf32> to vector<1x2x512xf32>
    tpu.vector_store %arg8[%c7_51, %c0_52, %c0_53], %69 {strides = array<i32>} : memref<8x2x512xf32, #tpu.memory_space<vmem>>, vector<1x2x512xf32>,
    %c0_54 = arith.constant 0 : index
    %c0_55 = arith.constant 0 : index
    %70 = vector.load %arg9[%c0_54, %c0_55] : memref<2x128xf32, #tpu.memory_space<vmem>>, vector<2x128xf32>
    %c0_56 = arith.constant 0 : index
    %c0_57 = arith.constant 0 : index
    %71 = vector.load %arg10[%c0_56, %c0_57] : memref<2x128xf32, #tpu.memory_space<vmem>>, vector<2x128xf32>
    %c0_58 = arith.constant 0 : index
    %c0_59 = arith.constant 0 : index
    %c0_60 = arith.constant 0 : index
    %72 = vector.load %arg8[%c0_58, %c0_59, %c0_60] : memref<8x2x512xf32, #tpu.memory_space<vmem>>, vector<1x2x512xf32>
    %73 = vector.shape_cast %72 : vector<1x2x512xf32> to vector<2x512xf32>
    %74 = arith.truncf %70 : vector<2x128xf32> to vector<2x128xbf16>
    %cst_61 = arith.constant dense<0.000000e+00> : vector<2x512xf32>
    %75 = tpu.matmul %74, %4, %cst_61 {dimension_numbers = #tpu.dot_dimension_numbers<[1], [0], [0], [1], [0, 0, 1, 1], [], []>} : vector<2x128xbf16>, vector<128x512xbf16>, vector<2x512xf32> -> vector<2x512xf32>
    %76 = arith.addf %73, %75 : vector<2x512xf32>
    %77 = vector.extract_strided_slice %76 {offsets = [0, 0], sizes = [2, 128], strides = [1, 1]} : vector<2x512xf32> to vector<2x128xf32>
    %cst_62 = arith.constant 5.000000e-01 : f32
    %78 = vector.broadcast %cst_62 : f32 to vector<2x128xf32>
    %79 = arith.mulf %78, %77 : vector<2x128xf32>
    %80 = math.tanh %79 : vector<2x128xf32>
    %cst_63 = arith.constant 5.000000e-01 : f32
    %81 = vector.broadcast %cst_63 : f32 to vector<2x128xf32>
    %82 = arith.mulf %81, %80 : vector<2x128xf32>
    %cst_64 = arith.constant 5.000000e-01 : f32
    %83 = vector.broadcast %cst_64 : f32 to vector<2x128xf32>
    %84 = arith.addf %82, %83 : vector<2x128xf32>
    %85 = vector.extract_strided_slice %76 {offsets = [0, 128], sizes = [2, 128], strides = [1, 1]} : vector<2x512xf32> to vector<2x128xf32>
    %cst_65 = arith.constant 5.000000e-01 : f32
    %86 = vector.broadcast %cst_65 : f32 to vector<2x128xf32>
    %87 = arith.mulf %86, %85 : vector<2x128xf32>
    %88 = math.tanh %87 : vector<2x128xf32>
    %cst_66 = arith.constant 5.000000e-01 : f32
    %89 = vector.broadcast %cst_66 : f32 to vector<2x128xf32>
    %90 = arith.mulf %89, %88 : vector<2x128xf32>
    %cst_67 = arith.constant 5.000000e-01 : f32
    %91 = vector.broadcast %cst_67 : f32 to vector<2x128xf32>
    %92 = arith.addf %90, %91 : vector<2x128xf32>
    %93 = vector.extract_strided_slice %76 {offsets = [0, 256], sizes = [2, 128], strides = [1, 1]} : vector<2x512xf32> to vector<2x128xf32>
    %94 = math.tanh %93 : vector<2x128xf32>
    %95 = vector.extract_strided_slice %76 {offsets = [0, 384], sizes = [2, 128], strides = [1, 1]} : vector<2x512xf32> to vector<2x128xf32>
    %cst_68 = arith.constant 5.000000e-01 : f32
    %96 = vector.broadcast %cst_68 : f32 to vector<2x128xf32>
    %97 = arith.mulf %96, %95 : vector<2x128xf32>
    %98 = math.tanh %97 : vector<2x128xf32>
    %cst_69 = arith.constant 5.000000e-01 : f32
    %99 = vector.broadcast %cst_69 : f32 to vector<2x128xf32>
    %100 = arith.mulf %99, %98 : vector<2x128xf32>
    %cst_70 = arith.constant 5.000000e-01 : f32
    %101 = vector.broadcast %cst_70 : f32 to vector<2x128xf32>
    %102 = arith.addf %100, %101 : vector<2x128xf32>
    %103 = arith.mulf %92, %71 : vector<2x128xf32>
    %104 = arith.mulf %84, %94 : vector<2x128xf32>
    %105 = arith.addf %103, %104 : vector<2x128xf32>
    %106 = math.tanh %105 : vector<2x128xf32>
    %107 = arith.mulf %102, %106 : vector<2x128xf32>
    %108 = arith.truncf %107 : vector<2x128xf32> to vector<2x128xbf16>
    %c0_71 = arith.constant 0 : index
    %c0_72 = arith.constant 0 : index
    %c0_73 = arith.constant 0 : index
    %109 = vector.load %arg5[%c0_71, %c0_72, %c0_73] : memref<8x2x128xbf16, #tpu.memory_space<vmem>>, vector<1x2x128xbf16>
    %110 = vector.shape_cast %109 : vector<1x2x128xbf16> to vector<2x128xbf16>
    %111 = vector.shape_cast %108 : vector<2x128xbf16> to vector<1x2x128xbf16>
    tpu.vector_store %arg5[%c0_71, %c0_72, %c0_73], %111 {strides = array<i32>} : memref<8x2x128xbf16, #tpu.memory_space<vmem>>, vector<1x2x128xbf16>,
    %c1_74 = arith.constant 1 : index
    %c0_75 = arith.constant 0 : index
    %c0_76 = arith.constant 0 : index
    %112 = vector.load %arg8[%c1_74, %c0_75, %c0_76] : memref<8x2x512xf32, #tpu.memory_space<vmem>>, vector<1x2x512xf32>
    %113 = vector.shape_cast %112 : vector<1x2x512xf32> to vector<2x512xf32>
    %114 = arith.truncf %107 : vector<2x128xf32> to vector<2x128xbf16>
    %cst_77 = arith.constant dense<0.000000e+00> : vector<2x512xf32>
    %115 = tpu.matmul %114, %4, %cst_77 {dimension_numbers = #tpu.dot_dimension_numbers<[1], [0], [0], [1], [0, 0, 1, 1], [], []>} : vector<2x128xbf16>, vector<128x512xbf16>, vector<2x512xf32> -> vector<2x512xf32>
    %116 = arith.addf %113, %115 : vector<2x512xf32>
    %117 = vector.extract_strided_slice %116 {offsets = [0, 0], sizes = [2, 128], strides = [1, 1]} : vector<2x512xf32> to vector<2x128xf32>
    %cst_78 = arith.constant 5.000000e-01 : f32
    %118 = vector.broadcast %cst_78 : f32 to vector<2x128xf32>
    %119 = arith.mulf %118, %117 : vector<2x128xf32>
    %120 = math.tanh %119 : vector<2x128xf32>
    %cst_79 = arith.constant 5.000000e-01 : f32
    %121 = vector.broadcast %cst_79 : f32 to vector<2x128xf32>
    %122 = arith.mulf %121, %120 : vector<2x128xf32>
    %cst_80 = arith.constant 5.000000e-01 : f32
    %123 = vector.broadcast %cst_80 : f32 to vector<2x128xf32>
    %124 = arith.addf %122, %123 : vector<2x128xf32>
    %125 = vector.extract_strided_slice %116 {offsets = [0, 128], sizes = [2, 128], strides = [1, 1]} : vector<2x512xf32> to vector<2x128xf32>
    %cst_81 = arith.constant 5.000000e-01 : f32
    %126 = vector.broadcast %cst_81 : f32 to vector<2x128xf32>
    %127 = arith.mulf %126, %125 : vector<2x128xf32>
    %128 = math.tanh %127 : vector<2x128xf32>
    %cst_82 = arith.constant 5.000000e-01 : f32
    %129 = vector.broadcast %cst_82 : f32 to vector<2x128xf32>
    %130 = arith.mulf %129, %128 : vector<2x128xf32>
    %cst_83 = arith.constant 5.000000e-01 : f32
    %131 = vector.broadcast %cst_83 : f32 to vector<2x128xf32>
    %132 = arith.addf %130, %131 : vector<2x128xf32>
    %133 = vector.extract_strided_slice %116 {offsets = [0, 256], sizes = [2, 128], strides = [1, 1]} : vector<2x512xf32> to vector<2x128xf32>
    %134 = math.tanh %133 : vector<2x128xf32>
    %135 = vector.extract_strided_slice %116 {offsets = [0, 384], sizes = [2, 128], strides = [1, 1]} : vector<2x512xf32> to vector<2x128xf32>
    %cst_84 = arith.constant 5.000000e-01 : f32
    %136 = vector.broadcast %cst_84 : f32 to vector<2x128xf32>
    %137 = arith.mulf %136, %135 : vector<2x128xf32>
    %138 = math.tanh %137 : vector<2x128xf32>
    %cst_85 = arith.constant 5.000000e-01 : f32
    %139 = vector.broadcast %cst_85 : f32 to vector<2x128xf32>
    %140 = arith.mulf %139, %138 : vector<2x128xf32>
    %cst_86 = arith.constant 5.000000e-01 : f32
    %141 = vector.broadcast %cst_86 : f32 to vector<2x128xf32>
    %142 = arith.addf %140, %141 : vector<2x128xf32>
    %143 = arith.mulf %132, %105 : vector<2x128xf32>
    %144 = arith.mulf %124, %134 : vector<2x128xf32>
    %145 = arith.addf %143, %144 : vector<2x128xf32>
    %146 = math.tanh %145 : vector<2x128xf32>
    %147 = arith.mulf %142, %146 : vector<2x128xf32>
    %148 = arith.truncf %147 : vector<2x128xf32> to vector<2x128xbf16>
    %c1_87 = arith.constant 1 : index
    %c0_88 = arith.constant 0 : index
    %c0_89 = arith.constant 0 : index
    %149 = vector.load %arg5[%c1_87, %c0_88, %c0_89] : memref<8x2x128xbf16, #tpu.memory_space<vmem>>, vector<1x2x128xbf16>
    %150 = vector.shape_cast %149 : vector<1x2x128xbf16> to vector<2x128xbf16>
    %151 = vector.shape_cast %148 : vector<2x128xbf16> to vector<1x2x128xbf16>
    tpu.vector_store %arg5[%c1_87, %c0_88, %c0_89], %151 {strides = array<i32>} : memref<8x2x128xbf16, #tpu.memory_space<vmem>>, vector<1x2x128xbf16>,
    %c2_90 = arith.constant 2 : index
    %c0_91 = arith.constant 0 : index
    %c0_92 = arith.constant 0 : index
    %152 = vector.load %arg8[%c2_90, %c0_91, %c0_92] : memref<8x2x512xf32, #tpu.memory_space<vmem>>, vector<1x2x512xf32>
    %153 = vector.shape_cast %152 : vector<1x2x512xf32> to vector<2x512xf32>
    %154 = arith.truncf %147 : vector<2x128xf32> to vector<2x128xbf16>
    %cst_93 = arith.constant dense<0.000000e+00> : vector<2x512xf32>
    %155 = tpu.matmul %154, %4, %cst_93 {dimension_numbers = #tpu.dot_dimension_numbers<[1], [0], [0], [1], [0, 0, 1, 1], [], []>} : vector<2x128xbf16>, vector<128x512xbf16>, vector<2x512xf32> -> vector<2x512xf32>
    %156 = arith.addf %153, %155 : vector<2x512xf32>
    %157 = vector.extract_strided_slice %156 {offsets = [0, 0], sizes = [2, 128], strides = [1, 1]} : vector<2x512xf32> to vector<2x128xf32>
    %cst_94 = arith.constant 5.000000e-01 : f32
    %158 = vector.broadcast %cst_94 : f32 to vector<2x128xf32>
    %159 = arith.mulf %158, %157 : vector<2x128xf32>
    %160 = math.tanh %159 : vector<2x128xf32>
    %cst_95 = arith.constant 5.000000e-01 : f32
    %161 = vector.broadcast %cst_95 : f32 to vector<2x128xf32>
    %162 = arith.mulf %161, %160 : vector<2x128xf32>
    %cst_96 = arith.constant 5.000000e-01 : f32
    %163 = vector.broadcast %cst_96 : f32 to vector<2x128xf32>
    %164 = arith.addf %162, %163 : vector<2x128xf32>
    %165 = vector.extract_strided_slice %156 {offsets = [0, 128], sizes = [2, 128], strides = [1, 1]} : vector<2x512xf32> to vector<2x128xf32>
    %cst_97 = arith.constant 5.000000e-01 : f32
    %166 = vector.broadcast %cst_97 : f32 to vector<2x128xf32>
    %167 = arith.mulf %166, %165 : vector<2x128xf32>
    %168 = math.tanh %167 : vector<2x128xf32>
    %cst_98 = arith.constant 5.000000e-01 : f32
    %169 = vector.broadcast %cst_98 : f32 to vector<2x128xf32>
    %170 = arith.mulf %169, %168 : vector<2x128xf32>
    %cst_99 = arith.constant 5.000000e-01 : f32
    %171 = vector.broadcast %cst_99 : f32 to vector<2x128xf32>
    %172 = arith.addf %170, %171 : vector<2x128xf32>
    %173 = vector.extract_strided_slice %156 {offsets = [0, 256], sizes = [2, 128], strides = [1, 1]} : vector<2x512xf32> to vector<2x128xf32>
    %174 = math.tanh %173 : vector<2x128xf32>
    %175 = vector.extract_strided_slice %156 {offsets = [0, 384], sizes = [2, 128], strides = [1, 1]} : vector<2x512xf32> to vector<2x128xf32>
    %cst_100 = arith.constant 5.000000e-01 : f32
    %176 = vector.broadcast %cst_100 : f32 to vector<2x128xf32>
    %177 = arith.mulf %176, %175 : vector<2x128xf32>
    %178 = math.tanh %177 : vector<2x128xf32>
    %cst_101 = arith.constant 5.000000e-01 : f32
    %179 = vector.broadcast %cst_101 : f32 to vector<2x128xf32>
    %180 = arith.mulf %179, %178 : vector<2x128xf32>
    %cst_102 = arith.constant 5.000000e-01 : f32
    %181 = vector.broadcast %cst_102 : f32 to vector<2x128xf32>
    %182 = arith.addf %180, %181 : vector<2x128xf32>
    %183 = arith.mulf %172, %145 : vector<2x128xf32>
    %184 = arith.mulf %164, %174 : vector<2x128xf32>
    %185 = arith.addf %183, %184 : vector<2x128xf32>
    %186 = math.tanh %185 : vector<2x128xf32>
    %187 = arith.mulf %182, %186 : vector<2x128xf32>
    %188 = arith.truncf %187 : vector<2x128xf32> to vector<2x128xbf16>
    %c2_103 = arith.constant 2 : index
    %c0_104 = arith.constant 0 : index
    %c0_105 = arith.constant 0 : index
    %189 = vector.load %arg5[%c2_103, %c0_104, %c0_105] : memref<8x2x128xbf16, #tpu.memory_space<vmem>>, vector<1x2x128xbf16>
    %190 = vector.shape_cast %189 : vector<1x2x128xbf16> to vector<2x128xbf16>
    %191 = vector.shape_cast %188 : vector<2x128xbf16> to vector<1x2x128xbf16>
    tpu.vector_store %arg5[%c2_103, %c0_104, %c0_105], %191 {strides = array<i32>} : memref<8x2x128xbf16, #tpu.memory_space<vmem>>, vector<1x2x128xbf16>,
    %c3_106 = arith.constant 3 : index
    %c0_107 = arith.constant 0 : index
    %c0_108 = arith.constant 0 : index
    %192 = vector.load %arg8[%c3_106, %c0_107, %c0_108] : memref<8x2x512xf32, #tpu.memory_space<vmem>>, vector<1x2x512xf32>
    %193 = vector.shape_cast %192 : vector<1x2x512xf32> to vector<2x512xf32>
    %194 = arith.truncf %187 : vector<2x128xf32> to vector<2x128xbf16>
    %cst_109 = arith.constant dense<0.000000e+00> : vector<2x512xf32>
    %195 = tpu.matmul %194, %4, %cst_109 {dimension_numbers = #tpu.dot_dimension_numbers<[1], [0], [0], [1], [0, 0, 1, 1], [], []>} : vector<2x128xbf16>, vector<128x512xbf16>, vector<2x512xf32> -> vector<2x512xf32>
    %196 = arith.addf %193, %195 : vector<2x512xf32>
    %197 = vector.extract_strided_slice %196 {offsets = [0, 0], sizes = [2, 128], strides = [1, 1]} : vector<2x512xf32> to vector<2x128xf32>
    %cst_110 = arith.constant 5.000000e-01 : f32
    %198 = vector.broadcast %cst_110 : f32 to vector<2x128xf32>
    %199 = arith.mulf %198, %197 : vector<2x128xf32>
    %200 = math.tanh %199 : vector<2x128xf32>
    %cst_111 = arith.constant 5.000000e-01 : f32
    %201 = vector.broadcast %cst_111 : f32 to vector<2x128xf32>
    %202 = arith.mulf %201, %200 : vector<2x128xf32>
    %cst_112 = arith.constant 5.000000e-01 : f32
    %203 = vector.broadcast %cst_112 : f32 to vector<2x128xf32>
    %204 = arith.addf %202, %203 : vector<2x128xf32>
    %205 = vector.extract_strided_slice %196 {offsets = [0, 128], sizes = [2, 128], strides = [1, 1]} : vector<2x512xf32> to vector<2x128xf32>
    %cst_113 = arith.constant 5.000000e-01 : f32
    %206 = vector.broadcast %cst_113 : f32 to vector<2x128xf32>
    %207 = arith.mulf %206, %205 : vector<2x128xf32>
    %208 = math.tanh %207 : vector<2x128xf32>
    %cst_114 = arith.constant 5.000000e-01 : f32
    %209 = vector.broadcast %cst_114 : f32 to vector<2x128xf32>
    %210 = arith.mulf %209, %208 : vector<2x128xf32>
    %cst_115 = arith.constant 5.000000e-01 : f32
    %211 = vector.broadcast %cst_115 : f32 to vector<2x128xf32>
    %212 = arith.addf %210, %211 : vector<2x128xf32>
    %213 = vector.extract_strided_slice %196 {offsets = [0, 256], sizes = [2, 128], strides = [1, 1]} : vector<2x512xf32> to vector<2x128xf32>
    %214 = math.tanh %213 : vector<2x128xf32>
    %215 = vector.extract_strided_slice %196 {offsets = [0, 384], sizes = [2, 128], strides = [1, 1]} : vector<2x512xf32> to vector<2x128xf32>
    %cst_116 = arith.constant 5.000000e-01 : f32
    %216 = vector.broadcast %cst_116 : f32 to vector<2x128xf32>
    %217 = arith.mulf %216, %215 : vector<2x128xf32>
    %218 = math.tanh %217 : vector<2x128xf32>
    %cst_117 = arith.constant 5.000000e-01 : f32
    %219 = vector.broadcast %cst_117 : f32 to vector<2x128xf32>
    %220 = arith.mulf %219, %218 : vector<2x128xf32>
    %cst_118 = arith.constant 5.000000e-01 : f32
    %221 = vector.broadcast %cst_118 : f32 to vector<2x128xf32>
    %222 = arith.addf %220, %221 : vector<2x128xf32>
    %223 = arith.mulf %212, %185 : vector<2x128xf32>
    %224 = arith.mulf %204, %214 : vector<2x128xf32>
    %225 = arith.addf %223, %224 : vector<2x128xf32>
    %226 = math.tanh %225 : vector<2x128xf32>
    %227 = arith.mulf %222, %226 : vector<2x128xf32>
    %228 = arith.truncf %227 : vector<2x128xf32> to vector<2x128xbf16>
    %c3_119 = arith.constant 3 : index
    %c0_120 = arith.constant 0 : index
    %c0_121 = arith.constant 0 : index
    %229 = vector.load %arg5[%c3_119, %c0_120, %c0_121] : memref<8x2x128xbf16, #tpu.memory_space<vmem>>, vector<1x2x128xbf16>
    %230 = vector.shape_cast %229 : vector<1x2x128xbf16> to vector<2x128xbf16>
    %231 = vector.shape_cast %228 : vector<2x128xbf16> to vector<1x2x128xbf16>
    tpu.vector_store %arg5[%c3_119, %c0_120, %c0_121], %231 {strides = array<i32>} : memref<8x2x128xbf16, #tpu.memory_space<vmem>>, vector<1x2x128xbf16>,
    %c4_122 = arith.constant 4 : index
    %c0_123 = arith.constant 0 : index
    %c0_124 = arith.constant 0 : index
    %232 = vector.load %arg8[%c4_122, %c0_123, %c0_124] : memref<8x2x512xf32, #tpu.memory_space<vmem>>, vector<1x2x512xf32>
    %233 = vector.shape_cast %232 : vector<1x2x512xf32> to vector<2x512xf32>
    %234 = arith.truncf %227 : vector<2x128xf32> to vector<2x128xbf16>
    %cst_125 = arith.constant dense<0.000000e+00> : vector<2x512xf32>
    %235 = tpu.matmul %234, %4, %cst_125 {dimension_numbers = #tpu.dot_dimension_numbers<[1], [0], [0], [1], [0, 0, 1, 1], [], []>} : vector<2x128xbf16>, vector<128x512xbf16>, vector<2x512xf32> -> vector<2x512xf32>
    %236 = arith.addf %233, %235 : vector<2x512xf32>
    %237 = vector.extract_strided_slice %236 {offsets = [0, 0], sizes = [2, 128], strides = [1, 1]} : vector<2x512xf32> to vector<2x128xf32>
    %cst_126 = arith.constant 5.000000e-01 : f32
    %238 = vector.broadcast %cst_126 : f32 to vector<2x128xf32>
    %239 = arith.mulf %238, %237 : vector<2x128xf32>
    %240 = math.tanh %239 : vector<2x128xf32>
    %cst_127 = arith.constant 5.000000e-01 : f32
    %241 = vector.broadcast %cst_127 : f32 to vector<2x128xf32>
    %242 = arith.mulf %241, %240 : vector<2x128xf32>
    %cst_128 = arith.constant 5.000000e-01 : f32
    %243 = vector.broadcast %cst_128 : f32 to vector<2x128xf32>
    %244 = arith.addf %242, %243 : vector<2x128xf32>
    %245 = vector.extract_strided_slice %236 {offsets = [0, 128], sizes = [2, 128], strides = [1, 1]} : vector<2x512xf32> to vector<2x128xf32>
    %cst_129 = arith.constant 5.000000e-01 : f32
    %246 = vector.broadcast %cst_129 : f32 to vector<2x128xf32>
    %247 = arith.mulf %246, %245 : vector<2x128xf32>
    %248 = math.tanh %247 : vector<2x128xf32>
    %cst_130 = arith.constant 5.000000e-01 : f32
    %249 = vector.broadcast %cst_130 : f32 to vector<2x128xf32>
    %250 = arith.mulf %249, %248 : vector<2x128xf32>
    %cst_131 = arith.constant 5.000000e-01 : f32
    %251 = vector.broadcast %cst_131 : f32 to vector<2x128xf32>
    %252 = arith.addf %250, %251 : vector<2x128xf32>
    %253 = vector.extract_strided_slice %236 {offsets = [0, 256], sizes = [2, 128], strides = [1, 1]} : vector<2x512xf32> to vector<2x128xf32>
    %254 = math.tanh %253 : vector<2x128xf32>
    %255 = vector.extract_strided_slice %236 {offsets = [0, 384], sizes = [2, 128], strides = [1, 1]} : vector<2x512xf32> to vector<2x128xf32>
    %cst_132 = arith.constant 5.000000e-01 : f32
    %256 = vector.broadcast %cst_132 : f32 to vector<2x128xf32>
    %257 = arith.mulf %256, %255 : vector<2x128xf32>
    %258 = math.tanh %257 : vector<2x128xf32>
    %cst_133 = arith.constant 5.000000e-01 : f32
    %259 = vector.broadcast %cst_133 : f32 to vector<2x128xf32>
    %260 = arith.mulf %259, %258 : vector<2x128xf32>
    %cst_134 = arith.constant 5.000000e-01 : f32
    %261 = vector.broadcast %cst_134 : f32 to vector<2x128xf32>
    %262 = arith.addf %260, %261 : vector<2x128xf32>
    %263 = arith.mulf %252, %225 : vector<2x128xf32>
    %264 = arith.mulf %244, %254 : vector<2x128xf32>
    %265 = arith.addf %263, %264 : vector<2x128xf32>
    %266 = math.tanh %265 : vector<2x128xf32>
    %267 = arith.mulf %262, %266 : vector<2x128xf32>
    %268 = arith.truncf %267 : vector<2x128xf32> to vector<2x128xbf16>
    %c4_135 = arith.constant 4 : index
    %c0_136 = arith.constant 0 : index
    %c0_137 = arith.constant 0 : index
    %269 = vector.load %arg5[%c4_135, %c0_136, %c0_137] : memref<8x2x128xbf16, #tpu.memory_space<vmem>>, vector<1x2x128xbf16>
    %270 = vector.shape_cast %269 : vector<1x2x128xbf16> to vector<2x128xbf16>
    %271 = vector.shape_cast %268 : vector<2x128xbf16> to vector<1x2x128xbf16>
    tpu.vector_store %arg5[%c4_135, %c0_136, %c0_137], %271 {strides = array<i32>} : memref<8x2x128xbf16, #tpu.memory_space<vmem>>, vector<1x2x128xbf16>,
    %c5_138 = arith.constant 5 : index
    %c0_139 = arith.constant 0 : index
    %c0_140 = arith.constant 0 : index
    %272 = vector.load %arg8[%c5_138, %c0_139, %c0_140] : memref<8x2x512xf32, #tpu.memory_space<vmem>>, vector<1x2x512xf32>
    %273 = vector.shape_cast %272 : vector<1x2x512xf32> to vector<2x512xf32>
    %274 = arith.truncf %267 : vector<2x128xf32> to vector<2x128xbf16>
    %cst_141 = arith.constant dense<0.000000e+00> : vector<2x512xf32>
    %275 = tpu.matmul %274, %4, %cst_141 {dimension_numbers = #tpu.dot_dimension_numbers<[1], [0], [0], [1], [0, 0, 1, 1], [], []>} : vector<2x128xbf16>, vector<128x512xbf16>, vector<2x512xf32> -> vector<2x512xf32>
    %276 = arith.addf %273, %275 : vector<2x512xf32>
    %277 = vector.extract_strided_slice %276 {offsets = [0, 0], sizes = [2, 128], strides = [1, 1]} : vector<2x512xf32> to vector<2x128xf32>
    %cst_142 = arith.constant 5.000000e-01 : f32
    %278 = vector.broadcast %cst_142 : f32 to vector<2x128xf32>
    %279 = arith.mulf %278, %277 : vector<2x128xf32>
    %280 = math.tanh %279 : vector<2x128xf32>
    %cst_143 = arith.constant 5.000000e-01 : f32
    %281 = vector.broadcast %cst_143 : f32 to vector<2x128xf32>
    %282 = arith.mulf %281, %280 : vector<2x128xf32>
    %cst_144 = arith.constant 5.000000e-01 : f32
    %283 = vector.broadcast %cst_144 : f32 to vector<2x128xf32>
    %284 = arith.addf %282, %283 : vector<2x128xf32>
    %285 = vector.extract_strided_slice %276 {offsets = [0, 128], sizes = [2, 128], strides = [1, 1]} : vector<2x512xf32> to vector<2x128xf32>
    %cst_145 = arith.constant 5.000000e-01 : f32
    %286 = vector.broadcast %cst_145 : f32 to vector<2x128xf32>
    %287 = arith.mulf %286, %285 : vector<2x128xf32>
    %288 = math.tanh %287 : vector<2x128xf32>
    %cst_146 = arith.constant 5.000000e-01 : f32
    %289 = vector.broadcast %cst_146 : f32 to vector<2x128xf32>
    %290 = arith.mulf %289, %288 : vector<2x128xf32>
    %cst_147 = arith.constant 5.000000e-01 : f32
    %291 = vector.broadcast %cst_147 : f32 to vector<2x128xf32>
    %292 = arith.addf %290, %291 : vector<2x128xf32>
    %293 = vector.extract_strided_slice %276 {offsets = [0, 256], sizes = [2, 128], strides = [1, 1]} : vector<2x512xf32> to vector<2x128xf32>
    %294 = math.tanh %293 : vector<2x128xf32>
    %295 = vector.extract_strided_slice %276 {offsets = [0, 384], sizes = [2, 128], strides = [1, 1]} : vector<2x512xf32> to vector<2x128xf32>
    %cst_148 = arith.constant 5.000000e-01 : f32
    %296 = vector.broadcast %cst_148 : f32 to vector<2x128xf32>
    %297 = arith.mulf %296, %295 : vector<2x128xf32>
    %298 = math.tanh %297 : vector<2x128xf32>
    %cst_149 = arith.constant 5.000000e-01 : f32
    %299 = vector.broadcast %cst_149 : f32 to vector<2x128xf32>
    %300 = arith.mulf %299, %298 : vector<2x128xf32>
    %cst_150 = arith.constant 5.000000e-01 : f32
    %301 = vector.broadcast %cst_150 : f32 to vector<2x128xf32>
    %302 = arith.addf %300, %301 : vector<2x128xf32>
    %303 = arith.mulf %292, %265 : vector<2x128xf32>
    %304 = arith.mulf %284, %294 : vector<2x128xf32>
    %305 = arith.addf %303, %304 : vector<2x128xf32>
    %306 = math.tanh %305 : vector<2x128xf32>
    %307 = arith.mulf %302, %306 : vector<2x128xf32>
    %308 = arith.truncf %307 : vector<2x128xf32> to vector<2x128xbf16>
    %c5_151 = arith.constant 5 : index
    %c0_152 = arith.constant 0 : index
    %c0_153 = arith.constant 0 : index
    %309 = vector.load %arg5[%c5_151, %c0_152, %c0_153] : memref<8x2x128xbf16, #tpu.memory_space<vmem>>, vector<1x2x128xbf16>
    %310 = vector.shape_cast %309 : vector<1x2x128xbf16> to vector<2x128xbf16>
    %311 = vector.shape_cast %308 : vector<2x128xbf16> to vector<1x2x128xbf16>
    tpu.vector_store %arg5[%c5_151, %c0_152, %c0_153], %311 {strides = array<i32>} : memref<8x2x128xbf16, #tpu.memory_space<vmem>>, vector<1x2x128xbf16>,
    %c6_154 = arith.constant 6 : index
    %c0_155 = arith.constant 0 : index
    %c0_156 = arith.constant 0 : index
    %312 = vector.load %arg8[%c6_154, %c0_155, %c0_156] : memref<8x2x512xf32, #tpu.memory_space<vmem>>, vector<1x2x512xf32>
    %313 = vector.shape_cast %312 : vector<1x2x512xf32> to vector<2x512xf32>
    %314 = arith.truncf %307 : vector<2x128xf32> to vector<2x128xbf16>
    %cst_157 = arith.constant dense<0.000000e+00> : vector<2x512xf32>
    %315 = tpu.matmul %314, %4, %cst_157 {dimension_numbers = #tpu.dot_dimension_numbers<[1], [0], [0], [1], [0, 0, 1, 1], [], []>} : vector<2x128xbf16>, vector<128x512xbf16>, vector<2x512xf32> -> vector<2x512xf32>
    %316 = arith.addf %313, %315 : vector<2x512xf32>
    %317 = vector.extract_strided_slice %316 {offsets = [0, 0], sizes = [2, 128], strides = [1, 1]} : vector<2x512xf32> to vector<2x128xf32>
    %cst_158 = arith.constant 5.000000e-01 : f32
    %318 = vector.broadcast %cst_158 : f32 to vector<2x128xf32>
    %319 = arith.mulf %318, %317 : vector<2x128xf32>
    %320 = math.tanh %319 : vector<2x128xf32>
    %cst_159 = arith.constant 5.000000e-01 : f32
    %321 = vector.broadcast %cst_159 : f32 to vector<2x128xf32>
    %322 = arith.mulf %321, %320 : vector<2x128xf32>
    %cst_160 = arith.constant 5.000000e-01 : f32
    %323 = vector.broadcast %cst_160 : f32 to vector<2x128xf32>
    %324 = arith.addf %322, %323 : vector<2x128xf32>
    %325 = vector.extract_strided_slice %316 {offsets = [0, 128], sizes = [2, 128], strides = [1, 1]} : vector<2x512xf32> to vector<2x128xf32>
    %cst_161 = arith.constant 5.000000e-01 : f32
    %326 = vector.broadcast %cst_161 : f32 to vector<2x128xf32>
    %327 = arith.mulf %326, %325 : vector<2x128xf32>
    %328 = math.tanh %327 : vector<2x128xf32>
    %cst_162 = arith.constant 5.000000e-01 : f32
    %329 = vector.broadcast %cst_162 : f32 to vector<2x128xf32>
    %330 = arith.mulf %329, %328 : vector<2x128xf32>
    %cst_163 = arith.constant 5.000000e-01 : f32
    %331 = vector.broadcast %cst_163 : f32 to vector<2x128xf32>
    %332 = arith.addf %330, %331 : vector<2x128xf32>
    %333 = vector.extract_strided_slice %316 {offsets = [0, 256], sizes = [2, 128], strides = [1, 1]} : vector<2x512xf32> to vector<2x128xf32>
    %334 = math.tanh %333 : vector<2x128xf32>
    %335 = vector.extract_strided_slice %316 {offsets = [0, 384], sizes = [2, 128], strides = [1, 1]} : vector<2x512xf32> to vector<2x128xf32>
    %cst_164 = arith.constant 5.000000e-01 : f32
    %336 = vector.broadcast %cst_164 : f32 to vector<2x128xf32>
    %337 = arith.mulf %336, %335 : vector<2x128xf32>
    %338 = math.tanh %337 : vector<2x128xf32>
    %cst_165 = arith.constant 5.000000e-01 : f32
    %339 = vector.broadcast %cst_165 : f32 to vector<2x128xf32>
    %340 = arith.mulf %339, %338 : vector<2x128xf32>
    %cst_166 = arith.constant 5.000000e-01 : f32
    %341 = vector.broadcast %cst_166 : f32 to vector<2x128xf32>
    %342 = arith.addf %340, %341 : vector<2x128xf32>
    %343 = arith.mulf %332, %305 : vector<2x128xf32>
    %344 = arith.mulf %324, %334 : vector<2x128xf32>
    %345 = arith.addf %343, %344 : vector<2x128xf32>
    %346 = math.tanh %345 : vector<2x128xf32>
    %347 = arith.mulf %342, %346 : vector<2x128xf32>
    %348 = arith.truncf %347 : vector<2x128xf32> to vector<2x128xbf16>
    %c6_167 = arith.constant 6 : index
    %c0_168 = arith.constant 0 : index
    %c0_169 = arith.constant 0 : index
    %349 = vector.load %arg5[%c6_167, %c0_168, %c0_169] : memref<8x2x128xbf16, #tpu.memory_space<vmem>>, vector<1x2x128xbf16>
    %350 = vector.shape_cast %349 : vector<1x2x128xbf16> to vector<2x128xbf16>
    %351 = vector.shape_cast %348 : vector<2x128xbf16> to vector<1x2x128xbf16>
    tpu.vector_store %arg5[%c6_167, %c0_168, %c0_169], %351 {strides = array<i32>} : memref<8x2x128xbf16, #tpu.memory_space<vmem>>, vector<1x2x128xbf16>,
    %c7_170 = arith.constant 7 : index
    %c0_171 = arith.constant 0 : index
    %c0_172 = arith.constant 0 : index
    %352 = vector.load %arg8[%c7_170, %c0_171, %c0_172] : memref<8x2x512xf32, #tpu.memory_space<vmem>>, vector<1x2x512xf32>
    %353 = vector.shape_cast %352 : vector<1x2x512xf32> to vector<2x512xf32>
    %354 = arith.truncf %347 : vector<2x128xf32> to vector<2x128xbf16>
    %cst_173 = arith.constant dense<0.000000e+00> : vector<2x512xf32>
    %355 = tpu.matmul %354, %4, %cst_173 {dimension_numbers = #tpu.dot_dimension_numbers<[1], [0], [0], [1], [0, 0, 1, 1], [], []>} : vector<2x128xbf16>, vector<128x512xbf16>, vector<2x512xf32> -> vector<2x512xf32>
    %356 = arith.addf %353, %355 : vector<2x512xf32>
    %357 = vector.extract_strided_slice %356 {offsets = [0, 0], sizes = [2, 128], strides = [1, 1]} : vector<2x512xf32> to vector<2x128xf32>
    %cst_174 = arith.constant 5.000000e-01 : f32
    %358 = vector.broadcast %cst_174 : f32 to vector<2x128xf32>
    %359 = arith.mulf %358, %357 : vector<2x128xf32>
    %360 = math.tanh %359 : vector<2x128xf32>
    %cst_175 = arith.constant 5.000000e-01 : f32
    %361 = vector.broadcast %cst_175 : f32 to vector<2x128xf32>
    %362 = arith.mulf %361, %360 : vector<2x128xf32>
    %cst_176 = arith.constant 5.000000e-01 : f32
    %363 = vector.broadcast %cst_176 : f32 to vector<2x128xf32>
    %364 = arith.addf %362, %363 : vector<2x128xf32>
    %365 = vector.extract_strided_slice %356 {offsets = [0, 128], sizes = [2, 128], strides = [1, 1]} : vector<2x512xf32> to vector<2x128xf32>
    %cst_177 = arith.constant 5.000000e-01 : f32
    %366 = vector.broadcast %cst_177 : f32 to vector<2x128xf32>
    %367 = arith.mulf %366, %365 : vector<2x128xf32>
    %368 = math.tanh %367 : vector<2x128xf32>
    %cst_178 = arith.constant 5.000000e-01 : f32
    %369 = vector.broadcast %cst_178 : f32 to vector<2x128xf32>
    %370 = arith.mulf %369, %368 : vector<2x128xf32>
    %cst_179 = arith.constant 5.000000e-01 : f32
    %371 = vector.broadcast %cst_179 : f32 to vector<2x128xf32>
    %372 = arith.addf %370, %371 : vector<2x128xf32>
    %373 = vector.extract_strided_slice %356 {offsets = [0, 256], sizes = [2, 128], strides = [1, 1]} : vector<2x512xf32> to vector<2x128xf32>
    %374 = math.tanh %373 : vector<2x128xf32>
    %375 = vector.extract_strided_slice %356 {offsets = [0, 384], sizes = [2, 128], strides = [1, 1]} : vector<2x512xf32> to vector<2x128xf32>
    %cst_180 = arith.constant 5.000000e-01 : f32
    %376 = vector.broadcast %cst_180 : f32 to vector<2x128xf32>
    %377 = arith.mulf %376, %375 : vector<2x128xf32>
    %378 = math.tanh %377 : vector<2x128xf32>
    %cst_181 = arith.constant 5.000000e-01 : f32
    %379 = vector.broadcast %cst_181 : f32 to vector<2x128xf32>
    %380 = arith.mulf %379, %378 : vector<2x128xf32>
    %cst_182 = arith.constant 5.000000e-01 : f32
    %381 = vector.broadcast %cst_182 : f32 to vector<2x128xf32>
    %382 = arith.addf %380, %381 : vector<2x128xf32>
    %383 = arith.mulf %372, %345 : vector<2x128xf32>
    %384 = arith.mulf %364, %374 : vector<2x128xf32>
    %385 = arith.addf %383, %384 : vector<2x128xf32>
    %386 = math.tanh %385 : vector<2x128xf32>
    %387 = arith.mulf %382, %386 : vector<2x128xf32>
    %388 = arith.truncf %387 : vector<2x128xf32> to vector<2x128xbf16>
    %c7_183 = arith.constant 7 : index
    %c0_184 = arith.constant 0 : index
    %c0_185 = arith.constant 0 : index
    %389 = vector.load %arg5[%c7_183, %c0_184, %c0_185] : memref<8x2x128xbf16, #tpu.memory_space<vmem>>, vector<1x2x128xbf16>
    %390 = vector.shape_cast %389 : vector<1x2x128xbf16> to vector<2x128xbf16>
    %391 = vector.shape_cast %388 : vector<2x128xbf16> to vector<1x2x128xbf16>
    tpu.vector_store %arg5[%c7_183, %c0_184, %c0_185], %391 {strides = array<i32>} : memref<8x2x128xbf16, #tpu.memory_space<vmem>>, vector<1x2x128xbf16>,
    %c0_186 = arith.constant 0 : index
    %c0_187 = arith.constant 0 : index
    %392 = vector.load %arg9[%c0_186, %c0_187] : memref<2x128xf32, #tpu.memory_space<vmem>>, vector<2x128xf32>
    tpu.vector_store %arg9[%c0_186, %c0_187], %387 {strides = array<i32>} : memref<2x128xf32, #tpu.memory_space<vmem>>, vector<2x128xf32>,
    %c0_188 = arith.constant 0 : index
    %c0_189 = arith.constant 0 : index
    %393 = vector.load %arg10[%c0_188, %c0_189] : memref<2x128xf32, #tpu.memory_space<vmem>>, vector<2x128xf32>
    tpu.vector_store %arg10[%c0_188, %c0_189], %385 {strides = array<i32>} : memref<2x128xf32, #tpu.memory_space<vmem>>, vector<2x128xf32>,
    %c0_i32_190 = arith.constant 0 : i32
    %394 = arith.cmpi eq, %arg0, %c0_i32_190 : i32
    %395 = arith.extui %394 : i1 to i32
    %c0_i32_191 = arith.constant 0 : i32
    %396 = arith.cmpi ne, %395, %c0_i32_191 : i32
    scf.if %396 {
      %c0_192 = arith.constant 0 : index
      %c0_193 = arith.constant 0 : index
      %397 = vector.load %arg6[%c0_192, %c0_193] : memref<2x128xf32, #tpu.memory_space<vmem>>, vector<2x128xf32>
      tpu.vector_store %arg6[%c0_192, %c0_193], %387 {strides = array<i32>} : memref<2x128xf32, #tpu.memory_space<vmem>>, vector<2x128xf32>,
      %c0_194 = arith.constant 0 : index
      %c0_195 = arith.constant 0 : index
      %398 = vector.load %arg7[%c0_194, %c0_195] : memref<2x128xf32, #tpu.memory_space<vmem>>, vector<2x128xf32>
      tpu.vector_store %arg7[%c0_194, %c0_195], %385 {strides = array<i32>} : memref<2x128xf32, #tpu.memory_space<vmem>>, vector<2x128xf32>,
    } else {
    }
    return
  }
  func.func @transform_0(%arg0: i32) -> (i32, i32, i32) {
    %c0_i32 = arith.constant 0 : i32
    %c0_i32_0 = arith.constant 0 : i32
    %c0_i32_1 = arith.constant 0 : i32
    return %arg0, %c0_i32, %c0_i32_0 : i32, i32, i32
  }
  func.func @transform_1(%arg0: i32) -> (i32, i32) {
    %c0_i32 = arith.constant 0 : i32
    %c0_i32_0 = arith.constant 0 : i32
    %c0_i32_1 = arith.constant 0 : i32
    return %c0_i32, %c0_i32_0 : i32, i32
  }
  func.func @transform_2(%arg0: i32) -> (i32, i32) {
    %c0_i32 = arith.constant 0 : i32
    %c0_i32_0 = arith.constant 0 : i32
    %c0_i32_1 = arith.constant 0 : i32
    return %c0_i32, %c0_i32_0 : i32, i32
  }
  func.func @transform_3(%arg0: i32) -> (i32, i32) {
    %c0_i32 = arith.constant 0 : i32
    %c0_i32_0 = arith.constant 0 : i32
    %c0_i32_1 = arith.constant 0 : i32
    return %c0_i32, %c0_i32_0 : i32, i32
  }
  func.func @transform_4(%arg0: i32) -> (i32, i32, i32) {
    %c0_i32 = arith.constant 0 : i32
    %c0_i32_0 = arith.constant 0 : i32
    %c0_i32_1 = arith.constant 0 : i32
    return %arg0, %c0_i32, %c0_i32_0 : i32, i32, i32
  }
  func.func @transform_5(%arg0: i32) -> (i32, i32) {
    %c0_i32 = arith.constant 0 : i32
    %c0_i32_0 = arith.constant 0 : i32
    %c0_i32_1 = arith.constant 0 : i32
    return %c0_i32, %c0_i32_0 : i32, i32
  }
  func.func @transform_6(%arg0: i32) -> (i32, i32) {
    %c0_i32 = arith.constant 0 : i32
    %c0_i32_0 = arith.constant 0 : i32
    %c0_i32_1 = arith.constant 0 : i32
    return %c0_i32, %c0_i32_0 : i32, i32
  }
}

module attributes {stable_mosaic.version = 11 : i64} {
  func.func @regressor_kernel(%arg0: memref<2x128xbf16, #tpu.memory_space<vmem>>, %arg1: memref<128x4xf32, #tpu.memory_space<vmem>>, %arg2: memref<1x4xf32, #tpu.memory_space<vmem>>, %arg3: memref<2x4xf32, #tpu.memory_space<vmem>>) attributes {dimension_semantics = [], scalar_prefetch = 0 : i64, scratch_operands = 0 : i64, tpu.core_type = #tpu.core_type<tc>} {
    %c0 = arith.constant 0 : index
    %c0_0 = arith.constant 0 : index
    %0 = vector.load %arg0[%c0, %c0_0] : memref<2x128xbf16, #tpu.memory_space<vmem>>, vector<2x128xbf16>
    %1 = arith.extf %0 : vector<2x128xbf16> to vector<2x128xf32>
    %c0_1 = arith.constant 0 : index
    %c0_2 = arith.constant 0 : index
    %2 = vector.load %arg1[%c0_1, %c0_2] : memref<128x4xf32, #tpu.memory_space<vmem>>, vector<128x4xf32>
    %cst = arith.constant dense<0.000000e+00> : vector<2x4xf32>
    %3 = tpu.matmul %1, %2, %cst {dimension_numbers = #tpu.dot_dimension_numbers<[1], [0], [0], [1], [0, 0, 1, 1], [], []>} : vector<2x128xf32>, vector<128x4xf32>, vector<2x4xf32> -> vector<2x4xf32>
    %c0_3 = arith.constant 0 : index
    %c0_4 = arith.constant 0 : index
    %4 = vector.load %arg2[%c0_3, %c0_4] : memref<1x4xf32, #tpu.memory_space<vmem>>, vector<1x4xf32>
    %5 = vector.broadcast %4 : vector<1x4xf32> to vector<2x4xf32>
    %6 = arith.addf %3, %5 : vector<2x4xf32>
    %c0_5 = arith.constant 0 : index
    %c0_6 = arith.constant 0 : index
    %7 = vector.load %arg3[%c0_5, %c0_6] : memref<2x4xf32, #tpu.memory_space<vmem>>, vector<2x4xf32>
    tpu.vector_store %arg3[%c0_5, %c0_6], %6 {strides = array<i32>} : memref<2x4xf32, #tpu.memory_space<vmem>>, vector<2x4xf32>,
    return
  }
}

</mosaic_0001>

<bundles_post_ra>
// kernel: lstm_model_forward.5
= control target key start
LH: loop header
LB: loop body
LE: loop exit
PB: predicated region body
PF: predicated region fallthrough
CT: control target
= control target key end

     0   :  { %v204_v1 = vmov 0.0   ;;  %vm205_vm0 = vmmov 0   ;;  %s284_s0 = inlined_call_operand.vmem [shape: bf16[2,128], index: 0, kind: input, shape index: {}]   ;;  %s285_s1 = inlined_call_operand.vmem [shape: f32[128,4], index: 1, kind: input, shape index: {}]   ;;  %s286_s2 = inlined_call_operand.vmem [shape: f32[1,4], index: 2, kind: input, shape index: {}]   ;;  %s287_s3 = inlined_call_operand.hbm [shape: f32[2,4], index: 3, kind: output, shape index: {}]  }
   0x1   :  { %v32_v0 = vld [vmem:[%s285_s1 + $0x78] sm:$0xff]  ;;  %144 = vmatprep.subr.mxu0 %v204_v1  ;;  %v31_v2 = vld [vmem:[%s285_s1 + $0x70] sm:$0xff]  ;;  %176 = vmatprep.mubr.msk.f32.mxu0 %vm205_vm0, %v204_v1  ;;  %v30_v3 = vld [vmem:[%s285_s1 + $0x68] sm:$0xff] }
   0x2   :  { %145 = vmatpush3.msra.mxu0 %v32_v0  ;;  %v29_v4 = vld [vmem:[%s285_s1 + $0x60] sm:$0xff] }
   0x3   :  { %146 = vmatprep.subr.mxu0 %v204_v1 }
   0x4   :  { %147 = vmatpush3.msra.mxu0 %v31_v2 }
   0x5   :  { %148 = vmatprep.subr.mxu0 %v204_v1 }
   0x6   :  { %149 = vmatpush3.msra.mxu0 %v30_v3 }
   0x7   :  { %8 = vsyncpa [#allocation3], 0  ;;  %150 = vmatprep.subr.mxu0 %v204_v1  ;;  %v28_v5 = vld [vmem:[%s285_s1 + $0x58] sm:$0xff]  ;;  %v27_v6 = vld [vmem:[%s285_s1 + $0x50] sm:$0xff]  ;;  %vm110_vm1 = vcmask 25600  }
   0x8   :  { %151 = vmatpush3.msra.mxu0 %v29_v4  ;;  %v26_v7 = vld [vmem:[%s285_s1 + $0x48] sm:$0xff]  ;;  %v25_v8 = vld [vmem:[%s285_s1 + $0x40] sm:$0xff]  ;;  %v24_v9 = vld [vmem:[%s285_s1 + $0x38] sm:$0xff] }
   0x9   :  { %152 = vmatprep.subr.mxu0 %v204_v1  ;;  %v23_v10 = vld [vmem:[%s285_s1 + $0x30] sm:$0xff]  ;;  %v22_v11 = vld [vmem:[%s285_s1 + $0x28] sm:$0xff]  ;;  %v21_v12 = vld [vmem:[%s285_s1 + $0x20] sm:$0xff] }
   0xa   :  { %153 = vmatpush3.msra.mxu0 %v28_v5  ;;  %v20_v13 = vld [vmem:[%s285_s1 + $0x18] sm:$0xff]  ;;  %v19_v14 = vld [vmem:[%s285_s1 + $0x10] sm:$0xff]  ;;  %v15_v15 = vld [vmem:[%s284_s0] sm:$0x1]  ;;  %s206_s0 = smov [#allocation2]  }
   0xb   :  { %154 = vmatprep.subr.mxu0 %v204_v1  ;;  %v18_v16 = vld [vmem:[%s285_s1 + $0x8] sm:$0xff]  ;;  %v17_v17 = vld [vmem:[%s285_s1] sm:$0xff]  ;;  %v16_v18 = vunpack.c.l.bf16 %v15_v15  ;;  %s118_s21 = sshll.u32 %s206_s0, 4  ;;  %s119_s21 = int_to_ptr.vmem [resolvable:$true] %s118_s21 }
   0xc   :  { %155 = vmatpush3.msra.mxu0 %v27_v6  ;;  %v126_v19 = vld [vmem:[%s286_s2] ss:$0 sm:$0xff]  ;;  %s182_s22 = scalar_lea.vmem %s119_s21, 32  ;;  %p187_p1 = scmp.lt.s32.totalorder %s119_s21, %s119_s21 }
   0xd   :  { %156 = vmatprep.subr.mxu0 %v204_v1  ;;  %p183_p0 = scmp.ne.s32.totalorder %s119_s21, %s182_s22  ;;  %p188_p2 = scmp.lt.s32.totalorder %s182_s22, %s182_s22 }
   0xe   :  { %157 = vmatpush3.msra.mxu0 %v26_v7 }
   0xf   :  { %158 = vmatprep.subr.mxu0 %v204_v1  ;;  %p189_p3 = por %p188_p2, %p187_p1 }
  0x10   :  { %159 = vmatpush3.msra.mxu0 %v25_v8 }
  0x11   :  { %160 = vmatprep.subr.mxu0 %v204_v1  ;;  %p190_p4 = pnand %p189_p3, %p183_p0 }
  0x12   :  { %161 = vmatpush3.msra.mxu0 %v24_v9 }
  0x13   :  { %162 = vmatprep.subr.mxu0 %v204_v1 }
  0x14   :  { %163 = vmatpush3.msra.mxu0 %v23_v10 }
  0x15   :  { %164 = vmatprep.subr.mxu0 %v204_v1 }
  0x16   :  { %165 = vmatpush3.msra.mxu0 %v22_v11 }
  0x17   :  { %166 = vmatprep.subr.mxu0 %v204_v1 }
  0x18   :  { %167 = vmatpush3.msra.mxu0 %v21_v12 }
  0x19   :  { %168 = vmatprep.subr.mxu0 %v204_v1 }
  0x1a   :  { %169 = vmatpush3.msra.mxu0 %v20_v13 }
  0x1b   :  { %170 = vmatprep.subr.mxu0 %v204_v1 }
  0x1c   :  { %171 = vmatpush3.msra.mxu0 %v19_v14 }
  0x1d   :  { %172 = vmatprep.subr.mxu0 %v204_v1 }
  0x1e   :  { %173 = vmatpush3.msra.mxu0 %v18_v16 }
  0x1f   :  { %174 = vmatprep.subr.mxu0 %v204_v1 }
  0x20   :  { %175 = vmatpush3.msra.mxu0 %v17_v17 }
  0x21   :  { %177 = vmatmul.mubr.f32.vlgmr.msra.gmra.mxu0 %v16_v18 }
  0xe1   :  { %v106_v20 = vpop.f32.mrf.mxu0 }
  0xe2   :  { %v107_v21 = vadd.f32 %v126_v19, %v106_v20 }
  0xe3   :  { %v178_v22 = vpop.f32.mrf.mxu0 }
  0xe4   :  { %111 = vst.msk [vmem:[#allocation2] sm:$0x3] %vm110_vm1, %v107_v21 }
  0xe5   :  { %193 = shalt.err (!%p190_p4)
}
  0xe6   :  { %121 = dma.vmem_to_hbm [thread:$0]  %s119_s21, 32, %s287_s3, [#allocation3]  }
  0xe7   :  { %202 = dma.done.wait [#allocation3], 32  }
  0xe8   :  { %203 = vsyncadd [#allocation3], 4294967264 }
  0xe9   :  { %125 = vsyncpa [#allocation3], 1 }

// kernel: lstm_model_forward.3
= control target key start
LH: loop header
LB: loop body
LE: loop exit
PB: predicated region body
PF: predicated region fallthrough
CT: control target
= control target key end

     0   :  { %12 = vsyncpa [#allocation6], 0  ;;  %s3386_s0 = inlined_call_operand.vmem [shape: f32[8,2,4], index: 0, kind: input, shape index: {}]   ;;  %s3387_s1 = inlined_call_operand.hbm [shape: bf16[4,512], index: 1, kind: input, shape index: {}]   ;;  %s3388_s2 = inlined_call_operand.hbm [shape: bf16[128,512], index: 2, kind: input, shape index: {}]   ;;  %s3389_s3 = inlined_call_operand.hbm [shape: f32[1,512], index: 3, kind: input, shape index: {}]   ;;  %s3390_s4 = inlined_call_operand.vmem [shape: bf16[8,2,128], index: 4, kind: output, shape index: {0}]   ;;  %s3391_s5 = inlined_call_operand.vmem [shape: f32[2,128], index: 5, kind: output, shape index: {1}]   ;;  %s3392_s6 = inlined_call_operand.vmem [shape: f32[2,128], index: 6, kind: output, shape index: {2}]  }
   0x1   :  { %13 = vsyncpa [#allocation8], 0  ;;  %s2611_s21 = smov [#allocation7]  }
   0x2   :  { %s31_s22 = sshll.u32 %s2611_s21, 4  ;;  %s32_s22 = int_to_ptr.vmem [resolvable:$true] %s31_s22 }
   0x3   :  { %s2555_s23 = scalar_lea.vmem %s32_s22, 4096  ;;  %p2560_p1 = scmp.lt.s32.totalorder %s32_s22, %s32_s22 }
   0x4   :  { %p2556_p0 = scmp.ne.s32.totalorder %s32_s22, %s2555_s23  ;;  %p2561_p2 = scmp.lt.s32.totalorder %s2555_s23, %s2555_s23 }
   0x6   :  { %p2562_p3 = por %p2561_p2, %p2560_p1 }
   0x8   :  { %p2563_p4 = pnand %p2562_p3, %p2556_p0 }
   0xa   :  { %2566 = shalt.err (!%p2563_p4)
}
   0xb   :  { %s2612_s24 = smov 256   ;;  %s2613_s25 = smov 16  }
   0xc   :  { %37 = dma.hbm_to_vmem [thread:$0]  %s3388_s2, 4096, %s32_s22, [#allocation8], %s2612_s24, %s2612_s24, %s2613_s25  }
   0xd   :  { %s2614_s28 = smov [#allocation5]   ;;  %s2615_s30 = smov [#allocation9]  }
   0xe   :  { %s22_s29 = sshll.u32 %s2614_s28, 4  ;;  %s44_s7 = sshll.u32 %s2615_s30, 4  ;;  %s23_s29 = int_to_ptr.vmem [resolvable:$true] %s22_s29  ;;  %s45_s7 = int_to_ptr.vmem [resolvable:$true] %s44_s7 }
   0xf   :  { %s2575_s8 = scalar_lea.vmem %s23_s29, 128  ;;  %p2580_p6 = scmp.lt.s32.totalorder %s23_s29, %s23_s29 }
  0x10   :  { %p2576_p5 = scmp.ne.s32.totalorder %s23_s29, %s2575_s8  ;;  %p2581_p7 = scmp.lt.s32.totalorder %s2575_s8, %s2575_s8 }
  0x12   :  { %p2582_p8 = por %p2581_p7, %p2580_p6 }
  0x14   :  { %p2583_p9 = pnand %p2582_p8, %p2576_p5 }
  0x16   :  { %2586 = shalt.err (!%p2583_p9)
}
  0x17   :  { %25 = dma.hbm_to_vmem [thread:$0]  %s3387_s1, 128, %s23_s29, [#allocation6]  }
  0x18   :  { %s2595_s11 = scalar_lea.vmem %s45_s7, 64  ;;  %p2600_p11 = scmp.lt.s32.totalorder %s45_s7, %s45_s7 }
  0x19   :  { %p2596_p10 = scmp.ne.s32.totalorder %s45_s7, %s2595_s11  ;;  %p2601_p12 = scmp.lt.s32.totalorder %s2595_s11, %s2595_s11 }
  0x1b   :  { %p2602_p13 = por %p2601_p12, %p2600_p11 }
  0x1d   :  { %p2603_p0 = pnand %p2602_p13, %p2596_p10 }
  0x1f   :  { %2606 = shalt.err (!%p2603_p0)
}
  0x20   :  { %47 = dma.hbm_to_vmem [thread:$0]  %s3389_s3, 64, %s45_s7, [#allocation8]  }
  0x21   :  { %2607 = dma.done.wait [#allocation6], 128  }
  0x22   :  { %2608 = vsyncadd [#allocation6], 4294967168 }
  0x23   :  { %2609 = dma.done.wait [#allocation8], 4160  }
  0x24   :  { %2610 = vsyncadd [#allocation8], 4294963136  ;;  %v101_v0 = vlaneseq  ;;  %v2616_v1 = vmov 1983009808   ;;  %v3393_v3 = vmov 0   ;;  %v2618_v5 = vmov 0.0  }
  0x25   :  { %v124_v2 = vunpack.c.l.s4 %v2616_v1  ;;  %188 = vmatprep.mubr.bf16.mxu0 %v3393_v3  ;;  %229 = vmatprep.mubr.bf16.mxu1 %v3393_v3  ;;  %62 = vst [vmem:[#allocation3] sm:$0x3] %v2618_v5  ;;  %63 = vst [vmem:[#allocation4] sm:$0x3] %v2618_v5  ;;  %v64_v8 = vld [vmem:[#allocation5] sm:$0xff]  ;;  %vm143_vm0 = vcmask 1041408  }
  0x26   :  { %v2665_v4 = vshrl.u32 %v101_v0, 7  ;;  %v122_v10 = vcombine.high %v64_v8, %v64_v8  ;;  %v98_v11 = vld [vmem:[%s3386_s0] sm:$0x3]  ;;  %vm139_vm1 = vcmask 31744   ;;  %v2304_v18 = vld [vmem:[%s3386_s0 + $0x2] sm:$0x3] }
  0x27   :  { %v125_v6 = vunpack.c.0.s8 %v124_v2  ;;  %v99_v17 = vpack.c.bf16 %v98_v11, %v98_v11  ;;  %v263_v19 = vpack.c.bf16 %v2304_v18, %v2304_v18  ;;  %v2309_v20 = vld [vmem:[%s3386_s0 + $0x4] sm:$0x3]  ;;  %v2314_v22 = vld [vmem:[%s3386_s0 + $0x6] sm:$0x3]  ;;  %v2319_v24 = vld [vmem:[%s3386_s0 + $0x8] sm:$0x3] }
  0x28   :  { %v375_v21 = vpack.c.bf16 %v2309_v20, %v2309_v20  ;;  %v487_v23 = vpack.c.bf16 %v2314_v22, %v2314_v22  ;;  %v599_v25 = vpack.c.bf16 %v2319_v24, %v2319_v24  ;;  %v2324_v26 = vld [vmem:[%s3386_s0 + $0xa] sm:$0x3]  ;;  %v2329_v28 = vld [vmem:[%s3386_s0 + $0xc] sm:$0x3]  ;;  %v2773_v30 = vld [vmem:[#allocation7 + $0xe4] ss:$16 sps:$4 sm:$0xff]  }
  0x29   :  { %v2668_v7 = vsub.s32 %v125_v6, %v2665_v4  ;;  %v711_v27 = vpack.c.bf16 %v2324_v26, %v2324_v26  ;;  %v823_v29 = vpack.c.bf16 %v2329_v28, %v2329_v28  ;;  %v2776_v31 = vld [vmem:[#allocation7 + $0xec] ss:$16 sps:$4 sm:$0xff]   ;;  %v2334_v32 = vld [vmem:[%s3386_s0 + $0xe] sm:$0x3]  ;;  %v2790_v35 = vld [vmem:[#allocation7 + $0xc4] ss:$16 sps:$4 sm:$0xff]  }
  0x2a   :  { %v935_v33 = vpack.c.bf16 %v2334_v32, %v2334_v32  ;;  %v2788_v34 = vld [vmem:[#allocation7 + $0xe0] ss:$16 sps:$4 sm:$0xff]   ;;  %v2792_v36 = vld [vmem:[#allocation7 + $0xe8] ss:$16 sps:$4 sm:$0xff]   ;;  %v2795_v37 = vld [vmem:[#allocation7 + $0xcc] ss:$16 sps:$4 sm:$0xff]  }
  0x2b   :  { %v129_v9 = vrot.slane %v64_v8, %v2668_v7  ;;  %v136_v14 = vrot.slane %v122_v10, %v2668_v7  ;;  %v2798_v38 = vld [vmem:[#allocation7 + $0xc0] ss:$16 sps:$4 sm:$0xff]   ;;  %v2803_v39 = vld [vmem:[#allocation7 + $0xa4] ss:$16 sps:$4 sm:$0xff]   ;;  %v2806_v40 = vld [vmem:[#allocation7 + $0xc8] ss:$16 sps:$4 sm:$0xff]  }
  0x2c   :  { %v2810_v41 = vld [vmem:[#allocation7 + $0xac] ss:$16 sps:$4 sm:$0xff]   ;;  %v2813_v42 = vld [vmem:[#allocation7 + $0xa0] ss:$16 sps:$4 sm:$0xff]   ;;  %v2816_v43 = vld [vmem:[#allocation7 + $0x84] ss:$16 sps:$4 sm:$0xff]  }
  0x2d   :  { %v2674_v12 = vcombine.high %v129_v9, %v129_v9  ;;  %v2677_v13 = vsel %vm143_vm0, %v129_v9, 0  ;;  %v2682_v15 = vcombine.high %v136_v14, %v136_v14  ;;  %v2685_v16 = vsel %vm143_vm0, %v136_v14, 0  ;;  %v2819_v44 = vld [vmem:[#allocation7 + $0xa8] ss:$16 sps:$4 sm:$0xff]   ;;  %v2822_v45 = vld [vmem:[#allocation7 + $0x8c] ss:$16 sps:$4 sm:$0xff]  }
  0x2e   :  { %v2825_v46 = vld [vmem:[#allocation7 + $0x80] ss:$16 sps:$4 sm:$0xff]   ;;  %v2828_v47 = vld [vmem:[#allocation7 + $0x64] ss:$16 sps:$4 sm:$0xff]   ;;  %v2831_v48 = vld [vmem:[#allocation7 + $0x88] ss:$16 sps:$4 sm:$0xff]  }
  0x2f   :  { %2300 = vmatprep.subr.msk.bf16.mxu0 %vm143_vm0, %v2674_v12  ;;  %2302 = vmatprep.subr.msk.bf16.mxu1 %vm143_vm0, %v2682_v15  ;;  %v2834_v49 = vld [vmem:[#allocation7 + $0x6c] ss:$16 sps:$4 sm:$0xff]   ;;  %v2837_v50 = vld [vmem:[#allocation7 + $0x60] ss:$16 sps:$4 sm:$0xff]   ;;  %v2840_v51 = vld [vmem:[#allocation7 + $0x44] ss:$16 sps:$4 sm:$0xff]  }
  0x30   :  { %171 = vmatpush1.bf16.msra.mxu0 %v2677_v13  ;;  %212 = vmatpush1.bf16.msra.mxu1 %v2685_v16  ;;  %v2843_v52 = vld [vmem:[#allocation7 + $0x68] ss:$16 sps:$4 sm:$0xff]   ;;  %v2846_v53 = vld [vmem:[#allocation7 + $0x4c] ss:$16 sps:$4 sm:$0xff]   ;;  %v2849_v54 = vld [vmem:[#allocation7 + $0x40] ss:$16 sps:$4 sm:$0xff]  }
  0x31   :  { %2305 = vmatprep.subr.msk.bf16.mxu0 %vm143_vm0, %v2674_v12  ;;  %2307 = vmatprep.subr.msk.bf16.mxu1 %vm143_vm0, %v2682_v15  ;;  %v2852_v55 = vld [vmem:[#allocation7 + $0x24] ss:$16 sps:$4 sm:$0xff]   ;;  %v2855_v56 = vld [vmem:[#allocation7 + $0x48] ss:$16 sps:$4 sm:$0xff]   ;;  %v2858_v57 = vld [vmem:[#allocation7 + $0x2c] ss:$16 sps:$4 sm:$0xff]  }
  0x32   :  { %v2861_v58 = vld [vmem:[#allocation7 + $0x20] ss:$16 sps:$4 sm:$0xff]   ;;  %v2864_v59 = vld [vmem:[#allocation7 + $0x4] ss:$16 sps:$4 sm:$0xff]   ;;  %v2867_v60 = vld [vmem:[#allocation7 + $0x28] ss:$16 sps:$4 sm:$0xff]  }
  0x33   :  { %2301 = vmatmul.mubr.msk.bf16.vlgmr.msra.gmra.mxu0 %vm139_vm1, %v99_v17  ;;  %2303 = vmatmul.mubr.msk.bf16.vlgmr.msra.gmra.mxu1 %vm139_vm1, %v99_v17  ;;  %v2870_v61 = vld [vmem:[#allocation7 + $0xc] ss:$16 sps:$4 sm:$0xff]   ;;  %v2873_v62 = vld [vmem:[#allocation7] ss:$16 sps:$4 sm:$0xff]   ;;  %v1045_v63 = vld [vmem:[#allocation3] sm:$0x3] }
  0x34   :  { %282 = vmatpush1.bf16.msra.mxu0 %v2677_v13  ;;  %299 = vmatprep.mubr.bf16.mxu0 %v3393_v3  ;;  %v2877_v0 = vld [vmem:[#allocation7 + $0x8] ss:$16 sps:$4 sm:$0xff]   ;;  %v1048_v1 = vpack.c.bf16 %v1045_v63, %v1045_v63  ;;  %v103_v2 = vsub.s32 0, %v2665_v4  ;;  %v97_v5 = vld [vmem:[#allocation9] sm:$0xf]  ;;  %v107_v6 = vsub.s32 1, %v2665_v4 }
  0x35   :  { %2310 = vmatprep.subr.msk.bf16.mxu0 %vm143_vm0, %v2674_v12  ;;  %323 = vmatpush1.bf16.msra.mxu1 %v2685_v16  ;;  %v111_v9 = vsub.s32 2, %v2665_v4  ;;  %v115_v10 = vsub.s32 3, %v2665_v4 }
  0x36   :  { %340 = vmatprep.mubr.bf16.mxu1 %v3393_v3  ;;  %2312 = vmatprep.subr.msk.bf16.mxu1 %vm143_vm0, %v2682_v15  ;;  %v2920_v8 = vrot.slane %v97_v5, %v103_v2  ;;  %v2924_v11 = vrot.slane %v97_v5, %v107_v6 }
  0x37   :  { %v2927_v14 = vrot.slane %v97_v5, %v111_v9 }
  0x3b   :  { %2306 = vmatmul.mubr.msk.bf16.vlgmr.msra.gmra.mxu0 %vm139_vm1, %v263_v19  ;;  %2308 = vmatmul.mubr.msk.bf16.vlgmr.msra.gmra.mxu1 %vm139_vm1, %v263_v19 }
  0x3c   :  { %394 = vmatpush1.bf16.msra.mxu0 %v2677_v13  ;;  %411 = vmatprep.mubr.bf16.mxu0 %v3393_v3 }
  0x3d   :  { %2315 = vmatprep.subr.msk.bf16.mxu0 %vm143_vm0, %v2674_v12  ;;  %435 = vmatpush1.bf16.msra.mxu1 %v2685_v16 }
  0x3e   :  { %452 = vmatprep.mubr.bf16.mxu1 %v3393_v3  ;;  %2317 = vmatprep.subr.msk.bf16.mxu1 %vm143_vm0, %v2682_v15 }
  0x43   :  { %2311 = vmatmul.mubr.msk.bf16.vlgmr.msra.gmra.mxu0 %vm139_vm1, %v375_v21  ;;  %2313 = vmatmul.mubr.msk.bf16.vlgmr.msra.gmra.mxu1 %vm139_vm1, %v375_v21 }
  0x44   :  { %506 = vmatpush1.bf16.msra.mxu0 %v2677_v13  ;;  %523 = vmatprep.mubr.bf16.mxu0 %v3393_v3 }
  0x45   :  { %2320 = vmatprep.subr.msk.bf16.mxu0 %vm143_vm0, %v2674_v12  ;;  %547 = vmatpush1.bf16.msra.mxu1 %v2685_v16 }
  0x46   :  { %564 = vmatprep.mubr.bf16.mxu1 %v3393_v3  ;;  %2322 = vmatprep.subr.msk.bf16.mxu1 %vm143_vm0, %v2682_v15 }
  0x4b   :  { %2316 = vmatmul.mubr.msk.bf16.vlgmr.msra.gmra.mxu0 %vm139_vm1, %v487_v23  ;;  %2318 = vmatmul.mubr.msk.bf16.vlgmr.msra.gmra.mxu1 %vm139_vm1, %v487_v23 }
  0x4c   :  { %618 = vmatpush1.bf16.msra.mxu0 %v2677_v13  ;;  %635 = vmatprep.mubr.bf16.mxu0 %v3393_v3 }
  0x4d   :  { %2325 = vmatprep.subr.msk.bf16.mxu0 %vm143_vm0, %v2674_v12  ;;  %659 = vmatpush1.bf16.msra.mxu1 %v2685_v16 }
  0x4e   :  { %676 = vmatprep.mubr.bf16.mxu1 %v3393_v3  ;;  %2327 = vmatprep.subr.msk.bf16.mxu1 %vm143_vm0, %v2682_v15 }
  0x53   :  { %2321 = vmatmul.mubr.msk.bf16.vlgmr.msra.gmra.mxu0 %vm139_vm1, %v599_v25  ;;  %2323 = vmatmul.mubr.msk.bf16.vlgmr.msra.gmra.mxu1 %vm139_vm1, %v599_v25 }
  0x54   :  { %730 = vmatpush1.bf16.msra.mxu0 %v2677_v13  ;;  %747 = vmatprep.mubr.bf16.mxu0 %v3393_v3 }
  0x55   :  { %2330 = vmatprep.subr.msk.bf16.mxu0 %vm143_vm0, %v2674_v12  ;;  %771 = vmatpush1.bf16.msra.mxu1 %v2685_v16 }
  0x56   :  { %788 = vmatprep.mubr.bf16.mxu1 %v3393_v3  ;;  %2332 = vmatprep.subr.msk.bf16.mxu1 %vm143_vm0, %v2682_v15 }
  0x5b   :  { %2326 = vmatmul.mubr.msk.bf16.vlgmr.msra.gmra.mxu0 %vm139_vm1, %v711_v27  ;;  %2328 = vmatmul.mubr.msk.bf16.vlgmr.msra.gmra.mxu1 %vm139_vm1, %v711_v27 }
  0x5c   :  { %842 = vmatpush1.bf16.msra.mxu0 %v2677_v13  ;;  %859 = vmatprep.mubr.bf16.mxu0 %v3393_v3 }
  0x5d   :  { %2335 = vmatprep.subr.msk.bf16.mxu0 %vm143_vm0, %v2674_v12  ;;  %883 = vmatpush1.bf16.msra.mxu1 %v2685_v16 }
  0x5e   :  { %900 = vmatprep.mubr.bf16.mxu1 %v3393_v3  ;;  %2337 = vmatprep.subr.msk.bf16.mxu1 %vm143_vm0, %v2682_v15  ;;  %v2929_v15 = vrot.slane %v97_v5, %v115_v10 }
  0x63   :  { %2331 = vmatmul.mubr.msk.bf16.vlgmr.msra.gmra.mxu0 %vm139_vm1, %v823_v29  ;;  %2333 = vmatmul.mubr.msk.bf16.vlgmr.msra.gmra.mxu1 %vm139_vm1, %v823_v29 }
  0x64   :  { %954 = vmatpush1.bf16.msra.mxu0 %v2677_v13  ;;  %971 = vmatprep.mubr.bf16.mxu0 %v3393_v3 }
  0x65   :  { %1209 = vmatprep.subr.bf16.mxu0 %v2773_v30  ;;  %995 = vmatpush1.bf16.msra.mxu1 %v2685_v16 }
  0x66   :  { %1012 = vmatprep.mubr.bf16.mxu1 %v3393_v3  ;;  %1250 = vmatprep.subr.bf16.mxu1 %v2776_v31 }
  0x6b   :  { %2336 = vmatmul.mubr.msk.bf16.vlgmr.msra.gmra.mxu0 %vm139_vm1, %v935_v33  ;;  %2338 = vmatmul.mubr.msk.bf16.vlgmr.msra.gmra.mxu1 %vm139_vm1, %v935_v33 }
  0x6c   :  { %1210 = vmatpush1.bf16.msra.mxu0 %v2788_v34  ;;  %1241 = vmatprep.mubr.bf16.mxu0 %v3393_v3 }
  0x6d   :  { %1211 = vmatprep.subr.bf16.mxu0 %v2790_v35  ;;  %1251 = vmatpush1.bf16.msra.mxu1 %v2792_v36 }
  0x6e   :  { %1282 = vmatprep.mubr.bf16.mxu1 %v3393_v3  ;;  %1252 = vmatprep.subr.bf16.mxu1 %v2795_v37 }
  0x70   :  { %1212 = vmatpush1.bf16.msra.mxu0 %v2798_v38 }
  0x71   :  { %1213 = vmatprep.subr.bf16.mxu0 %v2803_v39  ;;  %1253 = vmatpush1.bf16.msra.mxu1 %v2806_v40 }
  0x72   :  { %1254 = vmatprep.subr.bf16.mxu1 %v2810_v41 }
  0x74   :  { %1214 = vmatpush1.bf16.msra.mxu0 %v2813_v42 }
  0x75   :  { %1215 = vmatprep.subr.bf16.mxu0 %v2816_v43  ;;  %1255 = vmatpush1.bf16.msra.mxu1 %v2819_v44 }
  0x76   :  { %1256 = vmatprep.subr.bf16.mxu1 %v2822_v45 }
  0x78   :  { %1216 = vmatpush1.bf16.msra.mxu0 %v2825_v46 }
  0x79   :  { %1217 = vmatprep.subr.bf16.mxu0 %v2828_v47  ;;  %1257 = vmatpush1.bf16.msra.mxu1 %v2831_v48 }
  0x7a   :  { %1258 = vmatprep.subr.bf16.mxu1 %v2834_v49 }
  0x7c   :  { %1218 = vmatpush1.bf16.msra.mxu0 %v2837_v50 }
  0x7d   :  { %1219 = vmatprep.subr.bf16.mxu0 %v2840_v51  ;;  %1259 = vmatpush1.bf16.msra.mxu1 %v2843_v52 }
  0x7e   :  { %1260 = vmatprep.subr.bf16.mxu1 %v2846_v53 }
  0x80   :  { %1220 = vmatpush1.bf16.msra.mxu0 %v2849_v54 }
  0x81   :  { %1221 = vmatprep.subr.bf16.mxu0 %v2852_v55  ;;  %1261 = vmatpush1.bf16.msra.mxu1 %v2855_v56 }
  0x82   :  { %1262 = vmatprep.subr.bf16.mxu1 %v2858_v57 }
  0x84   :  { %1222 = vmatpush1.bf16.msra.mxu0 %v2861_v58 }
  0x85   :  { %1223 = vmatprep.subr.bf16.mxu0 %v2864_v59  ;;  %1263 = vmatpush1.bf16.msra.mxu1 %v2867_v60 }
  0x86   :  { %1264 = vmatprep.subr.bf16.mxu1 %v2870_v61 }
  0x88   :  { %1224 = vmatpush1.bf16.msra.mxu0 %v2873_v62 }
  0x89   :  { %1342 = vmatprep.subr.bf16.mxu0 %v2773_v30  ;;  %1265 = vmatpush1.bf16.msra.mxu1 %v2877_v0 }
  0x8a   :  { %1383 = vmatprep.subr.bf16.mxu1 %v2776_v31 }
  0x8b   :  { %1242 = vmatmul.mubr.bf16.vlgmr.msra.gmra.mxu0 %v1048_v1 }
  0x8c   :  { %1343 = vmatpush1.bf16.msra.mxu0 %v2788_v34  ;;  %1374 = vmatprep.mubr.bf16.mxu0 %v3393_v3 }
  0x8d   :  { %1283 = vmatmul.mubr.bf16.vlgmr.msra.gmra.mxu1 %v1048_v1  ;;  %1344 = vmatprep.subr.bf16.mxu0 %v2790_v35 }
  0x8e   :  { %1384 = vmatpush1.bf16.msra.mxu1 %v2792_v36  ;;  %1415 = vmatprep.mubr.bf16.mxu1 %v3393_v3 }
  0x8f   :  { %1385 = vmatprep.subr.bf16.mxu1 %v2795_v37 }
  0x90   :  { %1345 = vmatpush1.bf16.msra.mxu0 %v2798_v38 }
  0x91   :  { %1346 = vmatprep.subr.bf16.mxu0 %v2803_v39 }
  0x92   :  { %1386 = vmatpush1.bf16.msra.mxu1 %v2806_v40 }
  0x93   :  { %1387 = vmatprep.subr.bf16.mxu1 %v2810_v41 }
  0x94   :  { %1347 = vmatpush1.bf16.msra.mxu0 %v2813_v42 }
  0x95   :  { %1348 = vmatprep.subr.bf16.mxu0 %v2816_v43 }
  0x96   :  { %1388 = vmatpush1.bf16.msra.mxu1 %v2819_v44 }
  0x97   :  { %1389 = vmatprep.subr.bf16.mxu1 %v2822_v45 }
  0x98   :  { %1349 = vmatpush1.bf16.msra.mxu0 %v2825_v46 }
  0x99   :  { %1350 = vmatprep.subr.bf16.mxu0 %v2828_v47 }
  0x9a   :  { %1390 = vmatpush1.bf16.msra.mxu1 %v2831_v48 }
  0x9b   :  { %1391 = vmatprep.subr.bf16.mxu1 %v2834_v49 }
  0x9c   :  { %1351 = vmatpush1.bf16.msra.mxu0 %v2837_v50 }
  0x9d   :  { %1352 = vmatprep.subr.bf16.mxu0 %v2840_v51 }
  0x9e   :  { %1392 = vmatpush1.bf16.msra.mxu1 %v2843_v52 }
  0x9f   :  { %1393 = vmatprep.subr.bf16.mxu1 %v2846_v53 }
  0xa0   :  { %1353 = vmatpush1.bf16.msra.mxu0 %v2849_v54 }
  0xa1   :  { %1354 = vmatprep.subr.bf16.mxu0 %v2852_v55 }
  0xa2   :  { %1394 = vmatpush1.bf16.msra.mxu1 %v2855_v56 }
  0xa3   :  { %1395 = vmatprep.subr.bf16.mxu1 %v2858_v57 }
  0xa4   :  { %1355 = vmatpush1.bf16.msra.mxu0 %v2861_v58 }
  0xa5   :  { %1356 = vmatprep.subr.bf16.mxu0 %v2864_v59 }
  0xa6   :  { %1396 = vmatpush1.bf16.msra.mxu1 %v2867_v60 }
  0xa7   :  { %1397 = vmatprep.subr.bf16.mxu1 %v2870_v61 }
  0xa8   :  { %1357 = vmatpush1.bf16.msra.mxu0 %v2873_v62 }
  0xa9   :  { %1476 = vmatprep.subr.bf16.mxu0 %v2773_v30 }
  0xaa   :  { %1398 = vmatpush1.bf16.msra.mxu1 %v2877_v0 }
  0xab   :  { %1517 = vmatprep.subr.bf16.mxu1 %v2776_v31 }
  0xf3   :  { %v190_v12 = vpop.f32.mrf.mxu0  ;;  %v231_v17 = vpop.f32.mrf.mxu1 }
  0xf4   :  { %v191_v13 = vadd.f32 %v190_v12, %v2920_v8  ;;  %v232_v22 = vadd.f32 %v231_v17, %v2927_v14 }
  0xf5   :  { %v192_v16 = vpop.f32.mrf.mxu0  ;;  %v233_v20 = vpop.f32.mrf.mxu1 }
  0xf6   :  { %v193_v18 = vadd.f32 %v192_v16, %v2924_v11  ;;  %v234_v4 = vadd.f32 %v233_v20, %v2929_v15 }
  0xf7   :  { %v194_v19 = vpop.f32.mrf.mxu0  ;;  %v235_v24 = vpop.f32.mrf.mxu1 }
  0xf8   :  { %v242_v21 = vcombine.low %v191_v13, %v193_v18  ;;  %v243_v25 = vcombine.low %v232_v22, %v234_v4 }
  0xf9   :  { %v195_v23 = vpop.f32.mrf.mxu0  ;;  %v236_v26 = vpop.f32.mrf.mxu1 }
  0xfa   :  { %v2935_v28 = vrot.slane %v242_v21, %v2668_v7  ;;  %v2938_v29 = vrot.slane %v243_v25, %v2668_v7 }
  0xfb   :  { %v301_v27 = vpop.f32.mrf.mxu0  ;;  %v342_v63 = vpop.f32.mrf.mxu1 }
  0xfc   :  { %v302_v32 = vadd.f32 %v301_v27, %v2920_v8  ;;  %v343_v5 = vadd.f32 %v342_v63, %v2927_v14 }
  0xfd   :  { %v303_v33 = vpop.f32.mrf.mxu0  ;;  %v344_v9 = vpop.f32.mrf.mxu1 }
  0xfe   :  { %v304_v2 = vadd.f32 %v303_v33, %v2924_v11  ;;  %v345_v12 = vadd.f32 %v344_v9, %v2929_v15 }
  0xff   :  { %v305_v6 = vpop.f32.mrf.mxu0  ;;  %v346_v16 = vpop.f32.mrf.mxu1 }
 0x100   :  { %v353_v10 = vcombine.low %v302_v32, %v304_v2  ;;  %v354_v17 = vcombine.low %v343_v5, %v345_v12 }
 0x101   :  { %v306_v13 = vpop.f32.mrf.mxu0  ;;  %v347_v18 = vpop.f32.mrf.mxu1 }
 0x102   :  { %v2947_v20 = vrot.slane %v353_v10, %v2668_v7  ;;  %v2950_v21 = vrot.slane %v354_v17, %v2668_v7 }
 0x103   :  { %v413_v19 = vpop.f32.mrf.mxu0  ;;  %v454_v23 = vpop.f32.mrf.mxu1 }
 0x104   :  { %v414_v22 = vadd.f32 %v413_v19, %v2920_v8  ;;  %v455_v26 = vadd.f32 %v454_v23, %v2927_v14 }
 0x105   :  { %v415_v4 = vpop.f32.mrf.mxu0  ;;  %v456_v32 = vpop.f32.mrf.mxu1 }
 0x106   :  { %v416_v25 = vadd.f32 %v415_v4, %v2924_v11  ;;  %v457_v63 = vadd.f32 %v456_v32, %v2929_v15 }
 0x107   :  { %v417_v27 = vpop.f32.mrf.mxu0  ;;  %v458_v5 = vpop.f32.mrf.mxu1 }
 0x108   :  { %v465_v33 = vcombine.low %v414_v22, %v416_v25  ;;  %v466_v6 = vcombine.low %v455_v26, %v457_v63 }
 0x109   :  { %v418_v2 = vpop.f32.mrf.mxu0  ;;  %v459_v9 = vpop.f32.mrf.mxu1 }
 0x10a   :  { %v2959_v12 = vrot.slane %v465_v33, %v2668_v7  ;;  %v2962_v13 = vrot.slane %v466_v6, %v2668_v7 }
 0x10b   :  { %v525_v10 = vpop.f32.mrf.mxu0  ;;  %v566_v18 = vpop.f32.mrf.mxu1 }
 0x10c   :  { %v526_v16 = vadd.f32 %v525_v10, %v2920_v8  ;;  %v567_v4 = vadd.f32 %v566_v18, %v2927_v14 }
 0x10d   :  { %v527_v17 = vpop.f32.mrf.mxu0  ;;  %v568_v25 = vpop.f32.mrf.mxu1 }
 0x10e   :  { %v528_v22 = vadd.f32 %v527_v17, %v2924_v11  ;;  %v569_v27 = vadd.f32 %v568_v25, %v2929_v15 }
 0x10f   :  { %v529_v23 = vpop.f32.mrf.mxu0  ;;  %v570_v33 = vpop.f32.mrf.mxu1 }
 0x110   :  { %v577_v26 = vcombine.low %v526_v16, %v528_v22  ;;  %v578_v63 = vcombine.low %v567_v4, %v569_v27 }
 0x111   :  { %v530_v32 = vpop.f32.mrf.mxu0  ;;  %v571_v2 = vpop.f32.mrf.mxu1 }
 0x112   :  { %v2971_v6 = vrot.slane %v577_v26, %v2668_v7  ;;  %v2974_v9 = vrot.slane %v578_v63, %v2668_v7 }
 0x113   :  { %v637_v5 = vpop.f32.mrf.mxu0  ;;  %v678_v18 = vpop.f32.mrf.mxu1 }
 0x114   :  { %v638_v10 = vadd.f32 %v637_v5, %v2920_v8  ;;  %v679_v23 = vadd.f32 %v678_v18, %v2927_v14 }
 0x115   :  { %v639_v17 = vpop.f32.mrf.mxu0  ;;  %v680_v25 = vpop.f32.mrf.mxu1 }
 0x116   :  { %v640_v22 = vadd.f32 %v639_v17, %v2924_v11  ;;  %v681_v26 = vadd.f32 %v680_v25, %v2929_v15 }
 0x117   :  { %v641_v4 = vpop.f32.mrf.mxu0  ;;  %v682_v33 = vpop.f32.mrf.mxu1 }
 0x118   :  { %v689_v27 = vcombine.low %v638_v10, %v640_v22  ;;  %v690_v63 = vcombine.low %v679_v23, %v681_v26 }
 0x119   :  { %v642_v32 = vpop.f32.mrf.mxu0  ;;  %v683_v2 = vpop.f32.mrf.mxu1 }
 0x11a   :  { %v2983_v5 = vrot.slane %v689_v27, %v2668_v7  ;;  %v2986_v24 = vrot.slane %v690_v63, %v2668_v7 }
 0x11b   :  { %v749_v19 = vpop.f32.mrf.mxu0  ;;  %v790_v18 = vpop.f32.mrf.mxu1 }
 0x11c   :  { %3398 = vst [vmem:[#allocation12_spill] sm:$0xff] %v2983_v5  ;;  %3399 = vst [vmem:[#allocation13_spill] sm:$0xff] %v2986_v24  ;;  %v750_v17 = vadd.f32 %v749_v19, %v2920_v8  ;;  %v791_v4 = vadd.f32 %v790_v18, %v2927_v14 }
 0x11d   :  { %v751_v16 = vpop.f32.mrf.mxu0  ;;  %v792_v25 = vpop.f32.mrf.mxu1 }
 0x11e   :  { %v752_v22 = vadd.f32 %v751_v16, %v2924_v11  ;;  %v793_v27 = vadd.f32 %v792_v25, %v2929_v15 }
 0x11f   :  { %v753_v23 = vpop.f32.mrf.mxu0  ;;  %v794_v33 = vpop.f32.mrf.mxu1 }
 0x120   :  { %v801_v26 = vcombine.low %v750_v17, %v752_v22  ;;  %v802_v63 = vcombine.low %v791_v4, %v793_v27 }
 0x121   :  { %v754_v32 = vpop.f32.mrf.mxu0  ;;  %v795_v2 = vpop.f32.mrf.mxu1 }
 0x122   :  { %v2995_v19 = vrot.slane %v801_v26, %v2668_v7  ;;  %v2998_v1 = vrot.slane %v802_v63, %v2668_v7 }
 0x123   :  { %v861_v3 = vpop.f32.mrf.mxu0  ;;  %v902_v18 = vpop.f32.mrf.mxu1 }
 0x124   :  { %v862_v16 = vadd.f32 %v861_v3, %v2920_v8  ;;  %v903_v23 = vadd.f32 %v902_v18, %v2927_v14 }
 0x125   :  { %v863_v10 = vpop.f32.mrf.mxu0  ;;  %v904_v25 = vpop.f32.mrf.mxu1 }
 0x126   :  { %v864_v22 = vadd.f32 %v863_v10, %v2924_v11  ;;  %v905_v26 = vadd.f32 %v904_v25, %v2929_v15 }
 0x127   :  { %v865_v4 = vpop.f32.mrf.mxu0  ;;  %v906_v33 = vpop.f32.mrf.mxu1 }
 0x128   :  { %v913_v27 = vcombine.low %v862_v16, %v864_v22  ;;  %v914_v63 = vcombine.low %v903_v23, %v905_v26 }
 0x129   :  { %v866_v32 = vpop.f32.mrf.mxu0  ;;  %v907_v2 = vpop.f32.mrf.mxu1 }
 0x12a   :  { %v3007_v3 = vrot.slane %v913_v27, %v2668_v7  ;;  %v3010_v5 = vrot.slane %v914_v63, %v2668_v7 }
 0x12b   :  { %v973_v24 = vpop.f32.mrf.mxu0  ;;  %v1014_v18 = vpop.f32.mrf.mxu1 }
 0x12c   :  { %v974_v10 = vadd.f32 %v973_v24, %v2920_v8  ;;  %v1015_v4 = vadd.f32 %v1014_v18, %v2927_v14 }
 0x12d   :  { %v975_v17 = vpop.f32.mrf.mxu0  ;;  %v1016_v25 = vpop.f32.mrf.mxu1 }
 0x12e   :  { %v976_v22 = vadd.f32 %v975_v17, %v2924_v11  ;;  %v1017_v27 = vadd.f32 %v1016_v25, %v2929_v15 }
 0x12f   :  { %v977_v23 = vpop.f32.mrf.mxu0  ;;  %v1018_v33 = vpop.f32.mrf.mxu1 }
 0x130   :  { %v1025_v26 = vcombine.low %v974_v10, %v976_v22  ;;  %v1026_v63 = vcombine.low %v1015_v4, %v1017_v27 }
 0x131   :  { %v978_v32 = vpop.f32.mrf.mxu0  ;;  %v1019_v2 = vpop.f32.mrf.mxu1 }
 0x132   :  { %v3019_v8 = vrot.slane %v1025_v26, %v2668_v7  ;;  %v3022_v24 = vrot.slane %v1026_v63, %v2668_v7  ;;  %v3401_v63 = vcombine.low %v2935_v28, %v2938_v29 }
 0x134   :  { %3400 = vst [vmem:[#allocation14_spill] sm:$0xff] %v3022_v24 }
 0x14b   :  { %v1243_v17 = vpop.f32.mrf.mxu0 }
 0x14d   :  { %v1245_v14 = vpop.f32.mrf.mxu0  ;;  %v1284_v18 = vpop.f32.mrf.mxu1 }
 0x14e   :  { %v1295_v23 = vcombine.low %v1243_v17, %v1245_v14 }
 0x14f   :  { %v1247_v10 = vpop.f32.mrf.mxu0  ;;  %v1286_v22 = vpop.f32.mrf.mxu1 }
 0x150   :  { %v1296_v15 = vcombine.low %v1284_v18, %v1286_v22  ;;  %v1303_v4 = vrot.slane %v1295_v23, %v2668_v7 }
 0x151   :  { %v1248_v25 = vpop.f32.mrf.mxu0  ;;  %v1288_v32 = vpop.f32.mrf.mxu1 }
 0x152   :  { %v1310_v26 = vrot.slane %v1296_v15, %v2668_v7  ;;  %v1046_v32 = vld [vmem:[#allocation4] sm:$0x3] }
 0x153   :  { %v1289_v27 = vpop.f32.mrf.mxu1 }
 0x154   :  { %v1311_v33 = vcombine.low %v1303_v4, %v1310_v26 }
 0x156   :  { %v1313_v2 = vadd.f32 %v1311_v33, %v3401_v63 }
 0x158   :  { %v1314_v11 = vmul.f32 0.5, %v1313_v2  ;;  %v1319_v16 = vrot.slane %v1313_v2, 2  ;;  %v1325_v17 = vrot.slane %v1313_v2, 4  ;;  %v1328_v14 = vrot.slane %v1313_v2, 6 }
 0x15a   :  { %2435 = vtanh.f32 %v1314_v11  ;;  %v1321_v24 = vmul.f32 0.5, %v1319_v16  ;;  %v1330_v18 = vmul.f32 0.5, %v1328_v14 }
 0x15c   :  { %2437 = vtanh.f32 %v1321_v24 }
 0x15d   :  { %2439 = vtanh.f32 %v1325_v17  ;;  %v3402_v17 = vmov 0  }
 0x15e   :  { %2441 = vtanh.f32 %v1330_v18 }
 0x167   :  { %v2436_v10 = vpop.eup %2435 }
 0x168   :  { %v1316_v22 = vmul.f32 0.5, %v2436_v10 }
 0x169   :  { %v2438_v23 = vpop.eup %2437 }
 0x16a   :  { %v1317_v25 = vadd.f32 0.5, %v1316_v22  ;;  %v1323_v15 = vmul.f32 0.5, %v2438_v23  ;;  %v2440_v26 = vpop.eup %2439 }
 0x16b   :  { %v2442_v16 = vpop.eup %2441 }
 0x16c   :  { %v1324_v4 = vadd.f32 0.5, %v1323_v15  ;;  %v1335_v29 = vmul.f32 %v2440_v26, %v1317_v25  ;;  %v1332_v24 = vmul.f32 0.5, %v2442_v16 }
 0x16e   :  { %v1334_v28 = vmul.f32 %v1324_v4, %v1046_v32  ;;  %v1333_v11 = vadd.f32 0.5, %v1332_v24  ;;  %v3403_v24 = vcombine.low %v2947_v20, %v2950_v21 }
 0x170   :  { %v3031_v27 = vadd.f32 %v1335_v29, %v1334_v28 }
 0x172   :  { %2443 = vtanh.f32 %v3031_v27 }
 0x17f   :  { %v2444_v33 = vpop.eup %2443 }
 0x180   :  { %v1338_v63 = vmul.f32 %v2444_v33, %v1333_v11 }
 0x182   :  { %v1339_v2 = vpack.c.bf16 %v1338_v63, %v1338_v63 }
 0x184   :  { %1340 = vst [vmem:[%s3390_s4] sm:$0x1] %v1339_v2  ;;  %1375 = vmatmul.mubr.bf16.vlgmr.msra.gmra.mxu0 %v1339_v2  ;;  %1416 = vmatmul.mubr.bf16.vlgmr.msra.gmra.mxu1 %v1339_v2 }
 0x185   :  { %1477 = vmatpush1.bf16.msra.mxu0 %v2788_v34  ;;  %1518 = vmatpush1.bf16.msra.mxu1 %v2792_v36 }
 0x186   :  { %1478 = vmatprep.subr.bf16.mxu0 %v2790_v35  ;;  %1519 = vmatprep.subr.bf16.mxu1 %v2795_v37 }
 0x187   :  { %1508 = vmatprep.mubr.bf16.mxu0 %v3402_v17  ;;  %1549 = vmatprep.mubr.bf16.mxu1 %v3402_v17 }
 0x189   :  { %1479 = vmatpush1.bf16.msra.mxu0 %v2798_v38  ;;  %1520 = vmatpush1.bf16.msra.mxu1 %v2806_v40 }
 0x18a   :  { %1480 = vmatprep.subr.bf16.mxu0 %v2803_v39  ;;  %1521 = vmatprep.subr.bf16.mxu1 %v2810_v41 }
 0x18d   :  { %1481 = vmatpush1.bf16.msra.mxu0 %v2813_v42  ;;  %1522 = vmatpush1.bf16.msra.mxu1 %v2819_v44 }
 0x18e   :  { %1482 = vmatprep.subr.bf16.mxu0 %v2816_v43  ;;  %1523 = vmatprep.subr.bf16.mxu1 %v2822_v45 }
 0x191   :  { %1483 = vmatpush1.bf16.msra.mxu0 %v2825_v46  ;;  %1524 = vmatpush1.bf16.msra.mxu1 %v2831_v48 }
 0x192   :  { %1484 = vmatprep.subr.bf16.mxu0 %v2828_v47  ;;  %1525 = vmatprep.subr.bf16.mxu1 %v2834_v49 }
 0x195   :  { %1485 = vmatpush1.bf16.msra.mxu0 %v2837_v50  ;;  %1526 = vmatpush1.bf16.msra.mxu1 %v2843_v52 }
 0x196   :  { %1486 = vmatprep.subr.bf16.mxu0 %v2840_v51  ;;  %1527 = vmatprep.subr.bf16.mxu1 %v2846_v53 }
 0x199   :  { %1487 = vmatpush1.bf16.msra.mxu0 %v2849_v54  ;;  %1528 = vmatpush1.bf16.msra.mxu1 %v2855_v56 }
 0x19a   :  { %1488 = vmatprep.subr.bf16.mxu0 %v2852_v55  ;;  %1529 = vmatprep.subr.bf16.mxu1 %v2858_v57 }
 0x19d   :  { %1489 = vmatpush1.bf16.msra.mxu0 %v2861_v58  ;;  %1530 = vmatpush1.bf16.msra.mxu1 %v2867_v60 }
 0x19e   :  { %1490 = vmatprep.subr.bf16.mxu0 %v2864_v59  ;;  %1531 = vmatprep.subr.bf16.mxu1 %v2870_v61 }
 0x1a1   :  { %1491 = vmatpush1.bf16.msra.mxu0 %v2873_v62  ;;  %1532 = vmatpush1.bf16.msra.mxu1 %v2877_v0 }
 0x1a2   :  { %1610 = vmatprep.subr.bf16.mxu0 %v2773_v30  ;;  %1651 = vmatprep.subr.bf16.mxu1 %v2776_v31 }
 0x244   :  { %v1376_v14 = vpop.f32.mrf.mxu0  ;;  %v1417_v18 = vpop.f32.mrf.mxu1 }
 0x246   :  { %v1378_v10 = vpop.f32.mrf.mxu0  ;;  %v1419_v22 = vpop.f32.mrf.mxu1 }
 0x247   :  { %v1428_v23 = vcombine.low %v1376_v14, %v1378_v10  ;;  %v1429_v25 = vcombine.low %v1417_v18, %v1419_v22 }
 0x248   :  { %v1380_v15 = vpop.f32.mrf.mxu0  ;;  %v1421_v32 = vpop.f32.mrf.mxu1 }
 0x249   :  { %v1436_v4 = vrot.slane %v1428_v23, %v2668_v7  ;;  %v1443_v26 = vrot.slane %v1429_v25, %v2668_v7 }
 0x24a   :  { %v1381_v28 = vpop.f32.mrf.mxu0  ;;  %v1422_v29 = vpop.f32.mrf.mxu1 }
 0x24b   :  { %v1444_v16 = vcombine.low %v1436_v4, %v1443_v26 }
 0x24d   :  { %v1446_v11 = vadd.f32 %v1444_v16, %v3403_v24 }
 0x24f   :  { %v1447_v33 = vmul.f32 0.5, %v1446_v11  ;;  %v1452_v63 = vrot.slane %v1446_v11, 2  ;;  %v1458_v14 = vrot.slane %v1446_v11, 4  ;;  %v1461_v18 = vrot.slane %v1446_v11, 6 }
 0x251   :  { %2445 = vtanh.f32 %v1447_v33  ;;  %v1454_v2 = vmul.f32 0.5, %v1452_v63  ;;  %v1463_v10 = vmul.f32 0.5, %v1461_v18 }
 0x253   :  { %2447 = vtanh.f32 %v1454_v2 }
 0x254   :  { %2449 = vtanh.f32 %v1458_v14 }
 0x255   :  { %2451 = vtanh.f32 %v1463_v10 }
 0x25e   :  { %v2446_v22 = vpop.eup %2445 }
 0x25f   :  { %v1449_v23 = vmul.f32 0.5, %v2446_v22 }
 0x260   :  { %v2448_v15 = vpop.eup %2447 }
 0x261   :  { %v1450_v25 = vadd.f32 0.5, %v1449_v23  ;;  %v1456_v32 = vmul.f32 0.5, %v2448_v15  ;;  %v2450_v26 = vpop.eup %2449 }
 0x262   :  { %v2452_v29 = vpop.eup %2451 }
 0x263   :  { %v1457_v4 = vadd.f32 0.5, %v1456_v32  ;;  %v1468_v21 = vmul.f32 %v2450_v26, %v1450_v25  ;;  %v1465_v16 = vmul.f32 0.5, %v2452_v29 }
 0x265   :  { %v1467_v20 = vmul.f32 %v1457_v4, %v3031_v27  ;;  %v1466_v24 = vadd.f32 0.5, %v1465_v16 }
 0x267   :  { %v3077_v28 = vadd.f32 %v1468_v21, %v1467_v20  ;;  %v3404_v21 = vcombine.low %v2959_v12, %v2962_v13 }
 0x269   :  { %2453 = vtanh.f32 %v3077_v28 }
 0x276   :  { %v2454_v11 = vpop.eup %2453 }
 0x277   :  { %v1471_v33 = vmul.f32 %v2454_v11, %v1466_v24 }
 0x279   :  { %v1472_v63 = vpack.c.bf16 %v1471_v33, %v1471_v33 }
 0x27b   :  { %2371 = vst [vmem:[%s3390_s4 + $0x1] sm:$0x1] %v1472_v63  ;;  %1509 = vmatmul.mubr.bf16.vlgmr.msra.gmra.mxu0 %v1472_v63  ;;  %1550 = vmatmul.mubr.bf16.vlgmr.msra.gmra.mxu1 %v1472_v63 }
 0x27c   :  { %1611 = vmatpush1.bf16.msra.mxu0 %v2788_v34  ;;  %1652 = vmatpush1.bf16.msra.mxu1 %v2792_v36 }
 0x27d   :  { %1612 = vmatprep.subr.bf16.mxu0 %v2790_v35  ;;  %1653 = vmatprep.subr.bf16.mxu1 %v2795_v37 }
 0x27e   :  { %1642 = vmatprep.mubr.bf16.mxu0 %v3402_v17  ;;  %1683 = vmatprep.mubr.bf16.mxu1 %v3402_v17 }
 0x280   :  { %1613 = vmatpush1.bf16.msra.mxu0 %v2798_v38  ;;  %1654 = vmatpush1.bf16.msra.mxu1 %v2806_v40 }
 0x281   :  { %1614 = vmatprep.subr.bf16.mxu0 %v2803_v39  ;;  %1655 = vmatprep.subr.bf16.mxu1 %v2810_v41 }
 0x284   :  { %1615 = vmatpush1.bf16.msra.mxu0 %v2813_v42  ;;  %1656 = vmatpush1.bf16.msra.mxu1 %v2819_v44 }
 0x285   :  { %1616 = vmatprep.subr.bf16.mxu0 %v2816_v43  ;;  %1657 = vmatprep.subr.bf16.mxu1 %v2822_v45 }
 0x288   :  { %1617 = vmatpush1.bf16.msra.mxu0 %v2825_v46  ;;  %1658 = vmatpush1.bf16.msra.mxu1 %v2831_v48 }
 0x289   :  { %1618 = vmatprep.subr.bf16.mxu0 %v2828_v47  ;;  %1659 = vmatprep.subr.bf16.mxu1 %v2834_v49 }
 0x28c   :  { %1619 = vmatpush1.bf16.msra.mxu0 %v2837_v50  ;;  %1660 = vmatpush1.bf16.msra.mxu1 %v2843_v52 }
 0x28d   :  { %1620 = vmatprep.subr.bf16.mxu0 %v2840_v51  ;;  %1661 = vmatprep.subr.bf16.mxu1 %v2846_v53 }
 0x290   :  { %1621 = vmatpush1.bf16.msra.mxu0 %v2849_v54  ;;  %1662 = vmatpush1.bf16.msra.mxu1 %v2855_v56 }
 0x291   :  { %1622 = vmatprep.subr.bf16.mxu0 %v2852_v55  ;;  %1663 = vmatprep.subr.bf16.mxu1 %v2858_v57 }
 0x294   :  { %1623 = vmatpush1.bf16.msra.mxu0 %v2861_v58  ;;  %1664 = vmatpush1.bf16.msra.mxu1 %v2867_v60 }
 0x295   :  { %1624 = vmatprep.subr.bf16.mxu0 %v2864_v59  ;;  %1665 = vmatprep.subr.bf16.mxu1 %v2870_v61 }
 0x298   :  { %1625 = vmatpush1.bf16.msra.mxu0 %v2873_v62  ;;  %1666 = vmatpush1.bf16.msra.mxu1 %v2877_v0 }
 0x299   :  { %1744 = vmatprep.subr.bf16.mxu0 %v2773_v30  ;;  %1785 = vmatprep.subr.bf16.mxu1 %v2776_v31 }
 0x33b   :  { %v1510_v27 = vpop.f32.mrf.mxu0  ;;  %v1551_v2 = vpop.f32.mrf.mxu1 }
 0x33d   :  { %v1512_v14 = vpop.f32.mrf.mxu0  ;;  %v1553_v18 = vpop.f32.mrf.mxu1 }
 0x33e   :  { %v1562_v10 = vcombine.low %v1510_v27, %v1512_v14  ;;  %v1563_v22 = vcombine.low %v1551_v2, %v1553_v18 }
 0x33f   :  { %v1514_v23 = vpop.f32.mrf.mxu0  ;;  %v1555_v15 = vpop.f32.mrf.mxu1 }
 0x340   :  { %v1570_v25 = vrot.slane %v1562_v10, %v2668_v7  ;;  %v1577_v32 = vrot.slane %v1563_v22, %v2668_v7 }
 0x341   :  { %v1515_v4 = vpop.f32.mrf.mxu0  ;;  %v1556_v26 = vpop.f32.mrf.mxu1 }
 0x342   :  { %v1578_v20 = vcombine.low %v1570_v25, %v1577_v32 }
 0x344   :  { %v1580_v29 = vadd.f32 %v1578_v20, %v3404_v21 }
 0x346   :  { %v1581_v16 = vmul.f32 0.5, %v1580_v29  ;;  %v1586_v24 = vrot.slane %v1580_v29, 2  ;;  %v1592_v33 = vrot.slane %v1580_v29, 4  ;;  %v1595_v63 = vrot.slane %v1580_v29, 6 }
 0x348   :  { %2455 = vtanh.f32 %v1581_v16  ;;  %v1588_v11 = vmul.f32 0.5, %v1586_v24  ;;  %v1597_v27 = vmul.f32 0.5, %v1595_v63 }
 0x34a   :  { %2457 = vtanh.f32 %v1588_v11 }
 0x34b   :  { %2459 = vtanh.f32 %v1592_v33 }
 0x34c   :  { %2461 = vtanh.f32 %v1597_v27 }
 0x355   :  { %v2456_v2 = vpop.eup %2455 }
 0x356   :  { %v1583_v14 = vmul.f32 0.5, %v2456_v2 }
 0x357   :  { %v2458_v18 = vpop.eup %2457 }
 0x358   :  { %v1584_v10 = vadd.f32 0.5, %v1583_v14  ;;  %v1590_v22 = vmul.f32 0.5, %v2458_v18  ;;  %v2460_v15 = vpop.eup %2459 }
 0x359   :  { %v2462_v32 = vpop.eup %2461 }
 0x35a   :  { %v1591_v23 = vadd.f32 0.5, %v1590_v22  ;;  %v1602_v13 = vmul.f32 %v2460_v15, %v1584_v10  ;;  %v1599_v4 = vmul.f32 0.5, %v2462_v32  ;;  %v3181_v32 = vld [vmem:[#allocation7 + $0xc4] ss:$16 sps:$4 sm:$0xff]  }
 0x35c   :  { %v1601_v12 = vmul.f32 %v1591_v23, %v3077_v28  ;;  %v1600_v26 = vadd.f32 0.5, %v1599_v4  ;;  %v3184_v4 = vld [vmem:[#allocation7 + $0xcc] ss:$16 sps:$4 sm:$0xff]  }
 0x35e   :  { %v3123_v25 = vadd.f32 %v1602_v13, %v1601_v12  ;;  %v3175_v13 = vld [vmem:[#allocation7 + $0xe0] ss:$16 sps:$4 sm:$0xff]  }
 0x360   :  { %2463 = vtanh.f32 %v3123_v25 }
 0x36d   :  { %v2464_v20 = vpop.eup %2463 }
 0x36e   :  { %v1605_v21 = vmul.f32 %v2464_v20, %v1600_v26  ;;  %v3189_v26 = vld [vmem:[#allocation7 + $0xc0] ss:$16 sps:$4 sm:$0xff]   ;;  %v3192_v20 = vld [vmem:[#allocation7 + $0xc8] ss:$16 sps:$4 sm:$0xff]  }
 0x370   :  { %v1606_v29 = vpack.c.bf16 %v1605_v21, %v1605_v21  ;;  %v3195_v21 = vld [vmem:[#allocation7 + $0xa4] ss:$16 sps:$4 sm:$0xff]  }
 0x372   :  { %2372 = vst [vmem:[%s3390_s4 + $0x2] sm:$0x1] %v1606_v29  ;;  %1643 = vmatmul.mubr.bf16.vlgmr.msra.gmra.mxu0 %v1606_v29  ;;  %1684 = vmatmul.mubr.bf16.vlgmr.msra.gmra.mxu1 %v1606_v29  ;;  %v3198_v29 = vld [vmem:[#allocation7 + $0xac] ss:$16 sps:$4 sm:$0xff]  }
 0x373   :  { %1745 = vmatpush1.bf16.msra.mxu0 %v2788_v34  ;;  %1786 = vmatpush1.bf16.msra.mxu1 %v2792_v36 }
 0x374   :  { %1746 = vmatprep.subr.bf16.mxu0 %v2790_v35  ;;  %1787 = vmatprep.subr.bf16.mxu1 %v2795_v37 }
 0x375   :  { %1776 = vmatprep.mubr.bf16.mxu0 %v3402_v17  ;;  %1817 = vmatprep.mubr.bf16.mxu1 %v3402_v17 }
 0x377   :  { %1747 = vmatpush1.bf16.msra.mxu0 %v2798_v38  ;;  %1788 = vmatpush1.bf16.msra.mxu1 %v2806_v40 }
 0x378   :  { %1748 = vmatprep.subr.bf16.mxu0 %v2803_v39  ;;  %1789 = vmatprep.subr.bf16.mxu1 %v2810_v41 }
 0x37b   :  { %1749 = vmatpush1.bf16.msra.mxu0 %v2813_v42  ;;  %1790 = vmatpush1.bf16.msra.mxu1 %v2819_v44 }
 0x37c   :  { %1750 = vmatprep.subr.bf16.mxu0 %v2816_v43  ;;  %1791 = vmatprep.subr.bf16.mxu1 %v2822_v45 }
 0x37f   :  { %1751 = vmatpush1.bf16.msra.mxu0 %v2825_v46  ;;  %1792 = vmatpush1.bf16.msra.mxu1 %v2831_v48 }
 0x380   :  { %1752 = vmatprep.subr.bf16.mxu0 %v2828_v47  ;;  %1793 = vmatprep.subr.bf16.mxu1 %v2834_v49 }
 0x383   :  { %1753 = vmatpush1.bf16.msra.mxu0 %v2837_v50  ;;  %1794 = vmatpush1.bf16.msra.mxu1 %v2843_v52 }
 0x384   :  { %1754 = vmatprep.subr.bf16.mxu0 %v2840_v51  ;;  %1795 = vmatprep.subr.bf16.mxu1 %v2846_v53 }
 0x387   :  { %1755 = vmatpush1.bf16.msra.mxu0 %v2849_v54  ;;  %1796 = vmatpush1.bf16.msra.mxu1 %v2855_v56 }
 0x388   :  { %1756 = vmatprep.subr.bf16.mxu0 %v2852_v55  ;;  %1797 = vmatprep.subr.bf16.mxu1 %v2858_v57 }
 0x38b   :  { %1757 = vmatpush1.bf16.msra.mxu0 %v2861_v58  ;;  %1798 = vmatpush1.bf16.msra.mxu1 %v2867_v60 }
 0x38c   :  { %1758 = vmatprep.subr.bf16.mxu0 %v2864_v59  ;;  %1799 = vmatprep.subr.bf16.mxu1 %v2870_v61 }
 0x38f   :  { %1759 = vmatpush1.bf16.msra.mxu0 %v2873_v62  ;;  %1800 = vmatpush1.bf16.msra.mxu1 %v2877_v0 }
 0x390   :  { %1878 = vmatprep.subr.bf16.mxu0 %v2773_v30  ;;  %1919 = vmatprep.subr.bf16.mxu1 %v2776_v31  ;;  %v3405_v30 = vcombine.low %v2971_v6, %v2974_v9 }
 0x432   :  { %v1644_v34 = vpop.f32.mrf.mxu0  ;;  %v1685_v35 = vpop.f32.mrf.mxu1 }
 0x434   :  { %v1646_v36 = vpop.f32.mrf.mxu0  ;;  %v1687_v37 = vpop.f32.mrf.mxu1 }
 0x435   :  { %v1696_v38 = vcombine.low %v1644_v34, %v1646_v36  ;;  %v1697_v39 = vcombine.low %v1685_v35, %v1687_v37  ;;  %v3201_v34 = vld [vmem:[#allocation7 + $0xa0] ss:$16 sps:$4 sm:$0xff]   ;;  %v3204_v35 = vld [vmem:[#allocation7 + $0xa8] ss:$16 sps:$4 sm:$0xff]   ;;  %v3207_v36 = vld [vmem:[#allocation7 + $0x84] ss:$16 sps:$4 sm:$0xff]  }
 0x436   :  { %v1648_v40 = vpop.f32.mrf.mxu0  ;;  %v1689_v41 = vpop.f32.mrf.mxu1  ;;  %v3210_v37 = vld [vmem:[#allocation7 + $0x8c] ss:$16 sps:$4 sm:$0xff]  }
 0x437   :  { %v1704_v42 = vrot.slane %v1696_v38, %v2668_v7  ;;  %v1711_v43 = vrot.slane %v1697_v39, %v2668_v7  ;;  %v3213_v38 = vld [vmem:[#allocation7 + $0x80] ss:$16 sps:$4 sm:$0xff]   ;;  %v3216_v39 = vld [vmem:[#allocation7 + $0x88] ss:$16 sps:$4 sm:$0xff]   ;;  %v3219_v40 = vld [vmem:[#allocation7 + $0x64] ss:$16 sps:$4 sm:$0xff]  }
 0x438   :  { %v1649_v44 = vpop.f32.mrf.mxu0  ;;  %v1690_v45 = vpop.f32.mrf.mxu1  ;;  %v3222_v41 = vld [vmem:[#allocation7 + $0x6c] ss:$16 sps:$4 sm:$0xff]  }
 0x439   :  { %v1712_v46 = vcombine.low %v1704_v42, %v1711_v43  ;;  %v3225_v42 = vld [vmem:[#allocation7 + $0x60] ss:$16 sps:$4 sm:$0xff]   ;;  %v3229_v43 = vld [vmem:[#allocation7 + $0x44] ss:$16 sps:$4 sm:$0xff]  }
 0x43b   :  { %v1714_v47 = vadd.f32 %v1712_v46, %v3405_v30  ;;  %v3406_v30 = vld [vmem:[#allocation12_spill] sm:$0xff] }
 0x43d   :  { %v1715_v31 = vmul.f32 0.5, %v1714_v47  ;;  %v1720_v48 = vrot.slane %v1714_v47, 2  ;;  %v1726_v50 = vrot.slane %v1714_v47, 4  ;;  %v1729_v51 = vrot.slane %v1714_v47, 6  ;;  %v3407_v47 = vld [vmem:[#allocation13_spill] sm:$0xff] }
 0x43f   :  { %2465 = vtanh.f32 %v1715_v31  ;;  %v1722_v49 = vmul.f32 0.5, %v1720_v48  ;;  %v1731_v28 = vmul.f32 0.5, %v1729_v51  ;;  %v3408_v31 = vcombine.low %v3406_v30, %v3407_v47  ;;  %v3314_v30 = vld [vmem:[#allocation7 + $0x8] ss:$16 sps:$4 sm:$0xff]  }
 0x441   :  { %2467 = vtanh.f32 %v1722_v49 }
 0x442   :  { %2469 = vtanh.f32 %v1726_v50 }
 0x443   :  { %2471 = vtanh.f32 %v1731_v28 }
 0x44c   :  { %v2466_v16 = vpop.eup %2465 }
 0x44d   :  { %v1717_v24 = vmul.f32 0.5, %v2466_v16 }
 0x44e   :  { %v2468_v11 = vpop.eup %2467 }
 0x44f   :  { %v1718_v33 = vadd.f32 0.5, %v1717_v24  ;;  %v1724_v63 = vmul.f32 0.5, %v2468_v11  ;;  %v2470_v2 = vpop.eup %2469 }
 0x450   :  { %v2472_v18 = vpop.eup %2471 }
 0x451   :  { %v1725_v27 = vadd.f32 0.5, %v1724_v63  ;;  %v1736_v9 = vmul.f32 %v2470_v2, %v1718_v33  ;;  %v1733_v10 = vmul.f32 0.5, %v2472_v18 }
 0x453   :  { %v1735_v6 = vmul.f32 %v1725_v27, %v3123_v25  ;;  %v1734_v22 = vadd.f32 0.5, %v1733_v10  ;;  %v3178_v25 = vld [vmem:[#allocation7 + $0xe8] ss:$16 sps:$4 sm:$0xff]  }
 0x455   :  { %v3169_v14 = vadd.f32 %v1736_v9, %v1735_v6 }
 0x457   :  { %2473 = vtanh.f32 %v3169_v14 }
 0x464   :  { %v2474_v23 = vpop.eup %2473 }
 0x465   :  { %v1739_v15 = vmul.f32 %v2474_v23, %v1734_v22 }
 0x467   :  { %v1740_v12 = vpack.c.bf16 %v1739_v15, %v1739_v15 }
 0x469   :  { %2373 = vst [vmem:[%s3390_s4 + $0x3] sm:$0x1] %v1740_v12  ;;  %1777 = vmatmul.mubr.bf16.vlgmr.msra.gmra.mxu0 %v1740_v12  ;;  %1818 = vmatmul.mubr.bf16.vlgmr.msra.gmra.mxu1 %v1740_v12 }
 0x46a   :  { %1879 = vmatpush1.bf16.msra.mxu0 %v3175_v13  ;;  %1920 = vmatpush1.bf16.msra.mxu1 %v3178_v25 }
 0x46b   :  { %1880 = vmatprep.subr.bf16.mxu0 %v3181_v32  ;;  %1921 = vmatprep.subr.bf16.mxu1 %v3184_v4 }
 0x46c   :  { %1910 = vmatprep.mubr.bf16.mxu0 %v3402_v17  ;;  %1951 = vmatprep.mubr.bf16.mxu1 %v3402_v17 }
 0x46e   :  { %1881 = vmatpush1.bf16.msra.mxu0 %v3189_v26  ;;  %1922 = vmatpush1.bf16.msra.mxu1 %v3192_v20 }
 0x46f   :  { %1882 = vmatprep.subr.bf16.mxu0 %v3195_v21  ;;  %1923 = vmatprep.subr.bf16.mxu1 %v3198_v29 }
 0x472   :  { %1883 = vmatpush1.bf16.msra.mxu0 %v3201_v34  ;;  %1924 = vmatpush1.bf16.msra.mxu1 %v3204_v35 }
 0x473   :  { %1884 = vmatprep.subr.bf16.mxu0 %v3207_v36  ;;  %1925 = vmatprep.subr.bf16.mxu1 %v3210_v37 }
 0x476   :  { %1885 = vmatpush1.bf16.msra.mxu0 %v3213_v38  ;;  %1926 = vmatpush1.bf16.msra.mxu1 %v3216_v39 }
 0x477   :  { %1886 = vmatprep.subr.bf16.mxu0 %v3219_v40  ;;  %1927 = vmatprep.subr.bf16.mxu1 %v3222_v41 }
 0x47a   :  { %1887 = vmatpush1.bf16.msra.mxu0 %v3225_v42  ;;  %1928 = vmatpush1.bf16.msra.mxu1 %v2843_v52  ;;  %v3243_v52 = vld [vmem:[#allocation7 + $0xe4] ss:$16 sps:$4 sm:$0xff]  }
 0x47b   :  { %1888 = vmatprep.subr.bf16.mxu0 %v3229_v43  ;;  %1929 = vmatprep.subr.bf16.mxu1 %v2846_v53  ;;  %v3246_v53 = vld [vmem:[#allocation7 + $0xec] ss:$16 sps:$4 sm:$0xff]  }
 0x47e   :  { %1889 = vmatpush1.bf16.msra.mxu0 %v2849_v54  ;;  %1930 = vmatpush1.bf16.msra.mxu1 %v2855_v56 }
 0x47f   :  { %1890 = vmatprep.subr.bf16.mxu0 %v2852_v55  ;;  %1931 = vmatprep.subr.bf16.mxu1 %v2858_v57 }
 0x482   :  { %1891 = vmatpush1.bf16.msra.mxu0 %v2861_v58  ;;  %1932 = vmatpush1.bf16.msra.mxu1 %v2867_v60 }
 0x483   :  { %1892 = vmatprep.subr.bf16.mxu0 %v2864_v59  ;;  %1933 = vmatprep.subr.bf16.mxu1 %v2870_v61 }
 0x486   :  { %1893 = vmatpush1.bf16.msra.mxu0 %v2873_v62  ;;  %1934 = vmatpush1.bf16.msra.mxu1 %v2877_v0 }
 0x487   :  { %2012 = vmatprep.subr.bf16.mxu0 %v3243_v52  ;;  %2053 = vmatprep.subr.bf16.mxu1 %v3246_v53 }
 0x529   :  { %v1778_v54 = vpop.f32.mrf.mxu0  ;;  %v1819_v55 = vpop.f32.mrf.mxu1 }
 0x52b   :  { %v1780_v56 = vpop.f32.mrf.mxu0  ;;  %v1821_v57 = vpop.f32.mrf.mxu1 }
 0x52c   :  { %v1830_v58 = vcombine.low %v1778_v54, %v1780_v56  ;;  %v1831_v59 = vcombine.low %v1819_v55, %v1821_v57  ;;  %v3284_v57 = vld [vmem:[#allocation7 + $0x4c] ss:$16 sps:$4 sm:$0xff]  }
 0x52d   :  { %v1782_v60 = vpop.f32.mrf.mxu0  ;;  %v1823_v61 = vpop.f32.mrf.mxu1 }
 0x52e   :  { %v1838_v62 = vrot.slane %v1830_v58, %v2668_v7  ;;  %v1845_v0 = vrot.slane %v1831_v59, %v2668_v7  ;;  %v3287_v58 = vld [vmem:[#allocation7 + $0x40] ss:$16 sps:$4 sm:$0xff]   ;;  %v3290_v59 = vld [vmem:[#allocation7 + $0x48] ss:$16 sps:$4 sm:$0xff]   ;;  %v3293_v60 = vld [vmem:[#allocation7 + $0x24] ss:$16 sps:$4 sm:$0xff]  }
 0x52f   :  { %v1783_v44 = vpop.f32.mrf.mxu0  ;;  %v1824_v45 = vpop.f32.mrf.mxu1  ;;  %v3296_v61 = vld [vmem:[#allocation7 + $0x2c] ss:$16 sps:$4 sm:$0xff]  }
 0x530   :  { %v1846_v46 = vcombine.low %v1838_v62, %v1845_v0  ;;  %v3299_v62 = vld [vmem:[#allocation7 + $0x20] ss:$16 sps:$4 sm:$0xff]   ;;  %v3302_v0 = vld [vmem:[#allocation7 + $0x28] ss:$16 sps:$4 sm:$0xff]   ;;  %v3305_v44 = vld [vmem:[#allocation7 + $0x4] ss:$16 sps:$4 sm:$0xff]  }
 0x531   :  { %v3308_v45 = vld [vmem:[#allocation7 + $0xc] ss:$16 sps:$4 sm:$0xff]  }
 0x532   :  { %v1848_v48 = vadd.f32 %v1846_v46, %v3408_v31  ;;  %v3311_v46 = vld [vmem:[#allocation7] ss:$16 sps:$4 sm:$0xff]  }
 0x534   :  { %v1849_v49 = vmul.f32 0.5, %v1848_v48  ;;  %v1854_v50 = vrot.slane %v1848_v48, 2  ;;  %v1860_v28 = vrot.slane %v1848_v48, 4  ;;  %v1863_v16 = vrot.slane %v1848_v48, 6 }
 0x536   :  { %2475 = vtanh.f32 %v1849_v49  ;;  %v1856_v51 = vmul.f32 0.5, %v1854_v50  ;;  %v1865_v24 = vmul.f32 0.5, %v1863_v16 }
 0x538   :  { %2477 = vtanh.f32 %v1856_v51 }
 0x539   :  { %2479 = vtanh.f32 %v1860_v28 }
 0x53a   :  { %2481 = vtanh.f32 %v1865_v24 }
 0x543   :  { %v2476_v11 = vpop.eup %2475 }
 0x544   :  { %v1851_v33 = vmul.f32 0.5, %v2476_v11 }
 0x545   :  { %v2478_v63 = vpop.eup %2477 }
 0x546   :  { %v1852_v27 = vadd.f32 0.5, %v1851_v33  ;;  %v1858_v2 = vmul.f32 0.5, %v2478_v63  ;;  %v2480_v9 = vpop.eup %2479 }
 0x547   :  { %v2482_v23 = vpop.eup %2481 }
 0x548   :  { %v1859_v6 = vadd.f32 0.5, %v1858_v2  ;;  %v1870_v10 = vmul.f32 %v2480_v9, %v1852_v27  ;;  %v1867_v15 = vmul.f32 0.5, %v2482_v23 }
 0x54a   :  { %v1869_v18 = vmul.f32 %v1859_v6, %v3169_v14  ;;  %v1868_v12 = vadd.f32 0.5, %v1867_v15  ;;  %v3280_v14 = vld [vmem:[#allocation7 + $0x68] ss:$16 sps:$4 sm:$0xff]  }
 0x54c   :  { %v3255_v22 = vadd.f32 %v1870_v10, %v1869_v18 }
 0x54e   :  { %2483 = vtanh.f32 %v3255_v22 }
 0x55b   :  { %v2484_v54 = vpop.eup %2483 }
 0x55c   :  { %v1873_v55 = vmul.f32 %v2484_v54, %v1868_v12 }
 0x55e   :  { %v1874_v56 = vpack.c.bf16 %v1873_v55, %v1873_v55 }
 0x560   :  { %2374 = vst [vmem:[%s3390_s4 + $0x4] sm:$0x1] %v1874_v56  ;;  %1911 = vmatmul.mubr.bf16.vlgmr.msra.gmra.mxu0 %v1874_v56  ;;  %1952 = vmatmul.mubr.bf16.vlgmr.msra.gmra.mxu1 %v1874_v56 }
 0x561   :  { %2013 = vmatpush1.bf16.msra.mxu0 %v3175_v13  ;;  %2054 = vmatpush1.bf16.msra.mxu1 %v3178_v25 }
 0x562   :  { %2014 = vmatprep.subr.bf16.mxu0 %v3181_v32  ;;  %2055 = vmatprep.subr.bf16.mxu1 %v3184_v4 }
 0x563   :  { %2044 = vmatprep.mubr.bf16.mxu0 %v3402_v17  ;;  %2085 = vmatprep.mubr.bf16.mxu1 %v3402_v17 }
 0x565   :  { %2015 = vmatpush1.bf16.msra.mxu0 %v3189_v26  ;;  %2056 = vmatpush1.bf16.msra.mxu1 %v3192_v20 }
 0x566   :  { %2016 = vmatprep.subr.bf16.mxu0 %v3195_v21  ;;  %2057 = vmatprep.subr.bf16.mxu1 %v3198_v29 }
 0x569   :  { %2017 = vmatpush1.bf16.msra.mxu0 %v3201_v34  ;;  %2058 = vmatpush1.bf16.msra.mxu1 %v3204_v35 }
 0x56a   :  { %2018 = vmatprep.subr.bf16.mxu0 %v3207_v36  ;;  %2059 = vmatprep.subr.bf16.mxu1 %v3210_v37 }
 0x56d   :  { %2019 = vmatpush1.bf16.msra.mxu0 %v3213_v38  ;;  %2060 = vmatpush1.bf16.msra.mxu1 %v3216_v39 }
 0x56e   :  { %2020 = vmatprep.subr.bf16.mxu0 %v3219_v40  ;;  %2061 = vmatprep.subr.bf16.mxu1 %v3222_v41 }
 0x571   :  { %2021 = vmatpush1.bf16.msra.mxu0 %v3225_v42  ;;  %2062 = vmatpush1.bf16.msra.mxu1 %v3280_v14 }
 0x572   :  { %2022 = vmatprep.subr.bf16.mxu0 %v3229_v43  ;;  %2063 = vmatprep.subr.bf16.mxu1 %v3284_v57 }
 0x575   :  { %2023 = vmatpush1.bf16.msra.mxu0 %v3287_v58  ;;  %2064 = vmatpush1.bf16.msra.mxu1 %v3290_v59 }
 0x576   :  { %2024 = vmatprep.subr.bf16.mxu0 %v3293_v60  ;;  %2065 = vmatprep.subr.bf16.mxu1 %v3296_v61 }
 0x579   :  { %2025 = vmatpush1.bf16.msra.mxu0 %v3299_v62  ;;  %2066 = vmatpush1.bf16.msra.mxu1 %v3302_v0 }
 0x57a   :  { %2026 = vmatprep.subr.bf16.mxu0 %v3305_v44  ;;  %2067 = vmatprep.subr.bf16.mxu1 %v3308_v45 }
 0x57d   :  { %2027 = vmatpush1.bf16.msra.mxu0 %v3311_v46  ;;  %2068 = vmatpush1.bf16.msra.mxu1 %v3314_v30 }
 0x57e   :  { %2146 = vmatprep.subr.bf16.mxu0 %v3243_v52  ;;  %2187 = vmatprep.subr.bf16.mxu1 %v3246_v53  ;;  %v3409_v52 = vcombine.low %v2995_v19, %v2998_v1 }
 0x620   :  { %v1912_v47 = vpop.f32.mrf.mxu0  ;;  %v1953_v31 = vpop.f32.mrf.mxu1 }
 0x622   :  { %v1914_v48 = vpop.f32.mrf.mxu0  ;;  %v1955_v49 = vpop.f32.mrf.mxu1 }
 0x623   :  { %v1964_v50 = vcombine.low %v1912_v47, %v1914_v48  ;;  %v1965_v51 = vcombine.low %v1953_v31, %v1955_v49 }
 0x624   :  { %v1916_v28 = vpop.f32.mrf.mxu0  ;;  %v1957_v16 = vpop.f32.mrf.mxu1 }
 0x625   :  { %v1972_v24 = vrot.slane %v1964_v50, %v2668_v7  ;;  %v1979_v11 = vrot.slane %v1965_v51, %v2668_v7 }
 0x626   :  { %v1917_v33 = vpop.f32.mrf.mxu0  ;;  %v1958_v63 = vpop.f32.mrf.mxu1 }
 0x627   :  { %v1980_v27 = vcombine.low %v1972_v24, %v1979_v11 }
 0x629   :  { %v1982_v2 = vadd.f32 %v1980_v27, %v3409_v52 }
 0x62b   :  { %v1983_v53 = vmul.f32 0.5, %v1982_v2  ;;  %v1988_v6 = vrot.slane %v1982_v2, 2  ;;  %v1994_v18 = vrot.slane %v1982_v2, 4  ;;  %v1997_v10 = vrot.slane %v1982_v2, 6 }
 0x62d   :  { %2485 = vtanh.f32 %v1983_v53  ;;  %v1990_v9 = vmul.f32 0.5, %v1988_v6  ;;  %v1999_v23 = vmul.f32 0.5, %v1997_v10 }
 0x62f   :  { %2487 = vtanh.f32 %v1990_v9 }
 0x630   :  { %2489 = vtanh.f32 %v1994_v18 }
 0x631   :  { %2491 = vtanh.f32 %v1999_v23 }
 0x63a   :  { %v2486_v15 = vpop.eup %2485 }
 0x63b   :  { %v1985_v12 = vmul.f32 0.5, %v2486_v15 }
 0x63c   :  { %v2488_v54 = vpop.eup %2487 }
 0x63d   :  { %v1986_v55 = vadd.f32 0.5, %v1985_v12  ;;  %v1992_v56 = vmul.f32 0.5, %v2488_v54  ;;  %v2490_v31 = vpop.eup %2489 }
 0x63e   :  { %v2492_v49 = vpop.eup %2491 }
 0x63f   :  { %v1993_v47 = vadd.f32 0.5, %v1992_v56  ;;  %v2004_v19 = vmul.f32 %v2490_v31, %v1986_v55  ;;  %v2001_v50 = vmul.f32 0.5, %v2492_v49  ;;  %v3411_v56 = vld [vmem:[#allocation14_spill] sm:$0xff] }
 0x641   :  { %v2003_v1 = vmul.f32 %v1993_v47, %v3255_v22  ;;  %v2002_v51 = vadd.f32 0.5, %v2001_v50  ;;  %v3412_v47 = vcombine.low %v3019_v8, %v3411_v56 }
 0x643   :  { %v3325_v48 = vadd.f32 %v2004_v19, %v2003_v1 }
 0x645   :  { %2493 = vtanh.f32 %v3325_v48 }
 0x652   :  { %v2494_v28 = vpop.eup %2493 }
 0x653   :  { %v2007_v16 = vmul.f32 %v2494_v28, %v2002_v51 }
 0x655   :  { %v2008_v24 = vpack.c.bf16 %v2007_v16, %v2007_v16 }
 0x657   :  { %2375 = vst [vmem:[%s3390_s4 + $0x5] sm:$0x1] %v2008_v24  ;;  %2045 = vmatmul.mubr.bf16.vlgmr.msra.gmra.mxu0 %v2008_v24  ;;  %2086 = vmatmul.mubr.bf16.vlgmr.msra.gmra.mxu1 %v2008_v24 }
 0x658   :  { %2147 = vmatpush1.bf16.msra.mxu0 %v3175_v13  ;;  %2188 = vmatpush1.bf16.msra.mxu1 %v3178_v25 }
 0x659   :  { %2148 = vmatprep.subr.bf16.mxu0 %v3181_v32  ;;  %2189 = vmatprep.subr.bf16.mxu1 %v3184_v4 }
 0x65a   :  { %2178 = vmatprep.mubr.bf16.mxu0 %v3402_v17  ;;  %2219 = vmatprep.mubr.bf16.mxu1 %v3402_v17 }
 0x65c   :  { %2149 = vmatpush1.bf16.msra.mxu0 %v3189_v26  ;;  %2190 = vmatpush1.bf16.msra.mxu1 %v3192_v20 }
 0x65d   :  { %2150 = vmatprep.subr.bf16.mxu0 %v3195_v21  ;;  %2191 = vmatprep.subr.bf16.mxu1 %v3198_v29 }
 0x660   :  { %2151 = vmatpush1.bf16.msra.mxu0 %v3201_v34  ;;  %2192 = vmatpush1.bf16.msra.mxu1 %v3204_v35 }
 0x661   :  { %2152 = vmatprep.subr.bf16.mxu0 %v3207_v36  ;;  %2193 = vmatprep.subr.bf16.mxu1 %v3210_v37 }
 0x664   :  { %2153 = vmatpush1.bf16.msra.mxu0 %v3213_v38  ;;  %2194 = vmatpush1.bf16.msra.mxu1 %v3216_v39  ;;  %v3410_v38 = vcombine.low %v3007_v3, %v3010_v5 }
 0x665   :  { %2154 = vmatprep.subr.bf16.mxu0 %v3219_v40  ;;  %2195 = vmatprep.subr.bf16.mxu1 %v3222_v41 }
 0x668   :  { %2155 = vmatpush1.bf16.msra.mxu0 %v3225_v42  ;;  %2196 = vmatpush1.bf16.msra.mxu1 %v3280_v14 }
 0x669   :  { %2156 = vmatprep.subr.bf16.mxu0 %v3229_v43  ;;  %2197 = vmatprep.subr.bf16.mxu1 %v3284_v57 }
 0x66c   :  { %2157 = vmatpush1.bf16.msra.mxu0 %v3287_v58  ;;  %2198 = vmatpush1.bf16.msra.mxu1 %v3290_v59 }
 0x66d   :  { %2158 = vmatprep.subr.bf16.mxu0 %v3293_v60  ;;  %2199 = vmatprep.subr.bf16.mxu1 %v3296_v61 }
 0x670   :  { %2159 = vmatpush1.bf16.msra.mxu0 %v3299_v62  ;;  %2200 = vmatpush1.bf16.msra.mxu1 %v3302_v0 }
 0x671   :  { %2160 = vmatprep.subr.bf16.mxu0 %v3305_v44  ;;  %2201 = vmatprep.subr.bf16.mxu1 %v3308_v45 }
 0x674   :  { %2161 = vmatpush1.bf16.msra.mxu0 %v3311_v46  ;;  %2202 = vmatpush1.bf16.msra.mxu1 %v3314_v30 }
 0x717   :  { %v2046_v17 = vpop.f32.mrf.mxu0  ;;  %v2087_v13 = vpop.f32.mrf.mxu1 }
 0x719   :  { %v2048_v25 = vpop.f32.mrf.mxu0  ;;  %v2089_v32 = vpop.f32.mrf.mxu1 }
 0x71a   :  { %v2098_v4 = vcombine.low %v2046_v17, %v2048_v25  ;;  %v2099_v26 = vcombine.low %v2087_v13, %v2089_v32 }
 0x71b   :  { %v2050_v20 = vpop.f32.mrf.mxu0  ;;  %v2091_v21 = vpop.f32.mrf.mxu1 }
 0x71c   :  { %v2106_v29 = vrot.slane %v2098_v4, %v2668_v7  ;;  %v2113_v34 = vrot.slane %v2099_v26, %v2668_v7 }
 0x71d   :  { %v2051_v35 = vpop.f32.mrf.mxu0  ;;  %v2092_v36 = vpop.f32.mrf.mxu1 }
 0x71e   :  { %v2114_v37 = vcombine.low %v2106_v29, %v2113_v34 }
 0x720   :  { %v2116_v39 = vadd.f32 %v2114_v37, %v3410_v38 }
 0x722   :  { %v2117_v40 = vmul.f32 0.5, %v2116_v39  ;;  %v2122_v41 = vrot.slane %v2116_v39, 2  ;;  %v2128_v43 = vrot.slane %v2116_v39, 4  ;;  %v2131_v22 = vrot.slane %v2116_v39, 6 }
 0x724   :  { %2495 = vtanh.f32 %v2117_v40  ;;  %v2124_v42 = vmul.f32 0.5, %v2122_v41  ;;  %v2133_v14 = vmul.f32 0.5, %v2131_v22 }
 0x726   :  { %2497 = vtanh.f32 %v2124_v42 }
 0x727   :  { %2499 = vtanh.f32 %v2128_v43 }
 0x728   :  { %2501 = vtanh.f32 %v2133_v14 }
 0x731   :  { %v2496_v57 = vpop.eup %2495 }
 0x732   :  { %v2119_v58 = vmul.f32 0.5, %v2496_v57 }
 0x733   :  { %v2498_v59 = vpop.eup %2497 }
 0x734   :  { %v2120_v60 = vadd.f32 0.5, %v2119_v58  ;;  %v2126_v61 = vmul.f32 0.5, %v2498_v59  ;;  %v2500_v0 = vpop.eup %2499 }
 0x735   :  { %v2502_v45 = vpop.eup %2501 }
 0x736   :  { %v2127_v62 = vadd.f32 0.5, %v2126_v61  ;;  %v2138_v3 = vmul.f32 %v2500_v0, %v2120_v60  ;;  %v2135_v46 = vmul.f32 0.5, %v2502_v45 }
 0x738   :  { %v2137_v5 = vmul.f32 %v2127_v62, %v3325_v48  ;;  %v2136_v30 = vadd.f32 0.5, %v2135_v46 }
 0x73a   :  { %v2139_v44 = vadd.f32 %v2138_v3, %v2137_v5 }
 0x73c   :  { %2503 = vtanh.f32 %v2139_v44 }
 0x749   :  { %v2504_v11 = vpop.eup %2503 }
 0x74a   :  { %v2141_v33 = vmul.f32 %v2504_v11, %v2136_v30 }
 0x74c   :  { %v2142_v63 = vpack.c.bf16 %v2141_v33, %v2141_v33 }
 0x74e   :  { %2376 = vst [vmem:[%s3390_s4 + $0x6] sm:$0x1] %v2142_v63  ;;  %2179 = vmatmul.mubr.bf16.vlgmr.msra.gmra.mxu0 %v2142_v63  ;;  %2220 = vmatmul.mubr.bf16.vlgmr.msra.gmra.mxu1 %v2142_v63 }
 0x80e   :  { %v2180_v27 = vpop.f32.mrf.mxu0  ;;  %v2221_v52 = vpop.f32.mrf.mxu1 }
 0x810   :  { %v2182_v2 = vpop.f32.mrf.mxu0  ;;  %v2223_v53 = vpop.f32.mrf.mxu1 }
 0x811   :  { %v2232_v6 = vcombine.low %v2180_v27, %v2182_v2  ;;  %v2233_v9 = vcombine.low %v2221_v52, %v2223_v53 }
 0x812   :  { %v2184_v18 = vpop.f32.mrf.mxu0  ;;  %v2225_v10 = vpop.f32.mrf.mxu1 }
 0x813   :  { %v2240_v23 = vrot.slane %v2232_v6, %v2668_v7  ;;  %v2247_v15 = vrot.slane %v2233_v9, %v2668_v7 }
 0x814   :  { %v2185_v12 = vpop.f32.mrf.mxu0  ;;  %v2226_v54 = vpop.f32.mrf.mxu1 }
 0x815   :  { %v2248_v55 = vcombine.low %v2240_v23, %v2247_v15 }
 0x817   :  { %v2250_v31 = vadd.f32 %v2248_v55, %v3412_v47 }
 0x819   :  { %v2251_v1 = vmul.f32 0.5, %v2250_v31  ;;  %v2256_v19 = vrot.slane %v2250_v31, 2  ;;  %v2262_v49 = vrot.slane %v2250_v31, 4  ;;  %v2265_v50 = vrot.slane %v2250_v31, 6 }
 0x81b   :  { %2505 = vtanh.f32 %v2251_v1  ;;  %v2258_v48 = vmul.f32 0.5, %v2256_v19  ;;  %v2267_v51 = vmul.f32 0.5, %v2265_v50 }
 0x81d   :  { %2507 = vtanh.f32 %v2258_v48 }
 0x81e   :  { %2509 = vtanh.f32 %v2262_v49 }
 0x81f   :  { %2511 = vtanh.f32 %v2267_v51 }
 0x828   :  { %v2506_v28 = vpop.eup %2505 }
 0x829   :  { %v2253_v16 = vmul.f32 0.5, %v2506_v28 }
 0x82a   :  { %v2508_v24 = vpop.eup %2507 }
 0x82b   :  { %v2254_v7 = vadd.f32 0.5, %v2253_v16  ;;  %v2260_v17 = vmul.f32 0.5, %v2508_v24  ;;  %v2510_v25 = vpop.eup %2509 }
 0x82c   :  { %v2512_v26 = vpop.eup %2511 }
 0x82d   :  { %v2261_v13 = vadd.f32 0.5, %v2260_v17  ;;  %v2272_v8 = vmul.f32 %v2510_v25, %v2254_v7  ;;  %v2269_v20 = vmul.f32 0.5, %v2512_v26 }
 0x82f   :  { %v2271_v32 = vmul.f32 %v2261_v13, %v2139_v44  ;;  %v2270_v21 = vadd.f32 0.5, %v2269_v20 }
 0x831   :  { %v2273_v4 = vadd.f32 %v2272_v8, %v2271_v32 }
 0x833   :  { %2513 = vtanh.f32 %v2273_v4  ;;  %2280 = vst [vmem:[#allocation4] sm:$0x3] %v2273_v4  ;;  %2285 = vst [vmem:[%s3392_s6] sm:$0x3] %v2273_v4 }
 0x840   :  { %v2514_v29 = vpop.eup %2513 }
 0x841   :  { %v2275_v34 = vmul.f32 %v2514_v29, %v2270_v21 }
 0x843   :  { %v2276_v35 = vpack.c.bf16 %v2275_v34, %v2275_v34  ;;  %2279 = vst [vmem:[#allocation3] sm:$0x3] %v2275_v34  ;;  %2284 = vst [vmem:[%s3391_s5] sm:$0x3] %v2275_v34 }
 0x845   :  { %2377 = vst [vmem:[%s3390_s4 + $0x7] sm:$0x1] %v2276_v35 }
 0x846   :  { %2298 = vsyncpa [#allocation6], 1 }
 0x847   :  { %2299 = vsyncpa [#allocation8], 1 }

// kernel: lstm_model_forward.4
= control target key start
LH: loop header
LB: loop body
LE: loop exit
PB: predicated region body
PF: predicated region fallthrough
CT: control target
= control target key end

     0   :  { %12 = vsyncpa [#allocation6], 0  ;;  %s2717_s21 = smov [#allocation5]   ;;  %s3820_s0 = inlined_call_operand.vmem [shape: bf16[8,2,128], index: 0, kind: input, shape index: {}]   ;;  %s3821_s1 = inlined_call_operand.vmem [shape: bf16[128,512], index: 1, kind: input, shape index: {}]   ;;  %s3822_s2 = inlined_call_operand.hbm [shape: bf16[128,512], index: 2, kind: input, shape index: {}]   ;;  %s3823_s3 = inlined_call_operand.vmem [shape: f32[1,512], index: 3, kind: input, shape index: {}]   ;;  %s3824_s4 = inlined_call_operand.vmem [shape: bf16[8,2,128], index: 4, kind: output, shape index: {0}]   ;;  %s3825_s5 = inlined_call_operand.vmem [shape: f32[2,128], index: 5, kind: output, shape index: {1}]   ;;  %s3826_s6 = inlined_call_operand.vmem [shape: f32[2,128], index: 6, kind: output, shape index: {2}]  }
   0x1   :  { %s22_s22 = sshll.u32 %s2717_s21, 4  ;;  %s23_s22 = int_to_ptr.vmem [resolvable:$true] %s22_s22 }
   0x2   :  { %s2703_s23 = scalar_lea.vmem %s23_s22, 4096  ;;  %p2708_p1 = scmp.lt.s32.totalorder %s23_s22, %s23_s22 }
   0x3   :  { %p2704_p0 = scmp.ne.s32.totalorder %s23_s22, %s2703_s23  ;;  %p2709_p2 = scmp.lt.s32.totalorder %s2703_s23, %s2703_s23 }
   0x5   :  { %p2710_p3 = por %p2709_p2, %p2708_p1 }
   0x7   :  { %p2711_p4 = pnand %p2710_p3, %p2704_p0 }
   0x9   :  { %2714 = shalt.err (!%p2711_p4)
}
   0xa   :  { %s2718_s24 = smov 256   ;;  %s2719_s25 = smov 16  }
   0xb   :  { %28 = dma.hbm_to_vmem [thread:$0]  %s3822_s2, 4096, %s23_s22, [#allocation6], %s2718_s24, %s2718_s24, %s2719_s25  }
   0xc   :  { %2715 = dma.done.wait [#allocation6], 4096  }
   0xd   :  { %2716 = vsyncadd [#allocation6], 4294963200  ;;  %v3827_v0 = vmov 0   ;;  %v2766_v1 = vld [vmem:[%s3821_s1 + $0xe4] ss:$16 sps:$4 sm:$0xff]   ;;  %v2721_v37 = vmov 0.0   ;;  %v108_v40 = vlaneseq }
   0xe   :  { %320 = vmatprep.mubr.bf16.mxu0 %v3827_v0  ;;  %361 = vmatprep.mubr.bf16.mxu1 %v3827_v0  ;;  %v2771_v2 = vld [vmem:[%s3821_s1 + $0xec] ss:$16 sps:$4 sm:$0xff]   ;;  %v2777_v3 = vld [vmem:[%s3821_s1 + $0xe0] ss:$16 sps:$4 sm:$0xff]   ;;  %v2782_v4 = vld [vmem:[%s3821_s1 + $0xe8] ss:$16 sps:$4 sm:$0xff]  }
   0xf   :  { %288 = vmatprep.subr.bf16.mxu0 %v2766_v1  ;;  %329 = vmatprep.subr.bf16.mxu1 %v2771_v2  ;;  %v2788_v5 = vld [vmem:[%s3821_s1 + $0xc4] ss:$16 sps:$4 sm:$0xff]   ;;  %v2795_v6 = vld [vmem:[%s3821_s1 + $0xcc] ss:$16 sps:$4 sm:$0xff]   ;;  %v2800_v7 = vld [vmem:[%s3821_s1 + $0xc0] ss:$16 sps:$4 sm:$0xff]  }
  0x10   :  { %289 = vmatpush1.bf16.msra.mxu0 %v2777_v3  ;;  %330 = vmatpush1.bf16.msra.mxu1 %v2782_v4  ;;  %v2806_v8 = vld [vmem:[%s3821_s1 + $0xc8] ss:$16 sps:$4 sm:$0xff]   ;;  %v2812_v9 = vld [vmem:[%s3821_s1 + $0xa4] ss:$16 sps:$4 sm:$0xff]   ;;  %v2817_v10 = vld [vmem:[%s3821_s1 + $0xac] ss:$16 sps:$4 sm:$0xff]  }
  0x11   :  { %290 = vmatprep.subr.bf16.mxu0 %v2788_v5  ;;  %331 = vmatprep.subr.bf16.mxu1 %v2795_v6  ;;  %v2822_v11 = vld [vmem:[%s3821_s1 + $0xa0] ss:$16 sps:$4 sm:$0xff]   ;;  %v2827_v12 = vld [vmem:[%s3821_s1 + $0xa8] ss:$16 sps:$4 sm:$0xff]   ;;  %v2834_v13 = vld [vmem:[%s3821_s1 + $0x84] ss:$16 sps:$4 sm:$0xff]  }
  0x12   :  { %v2841_v14 = vld [vmem:[%s3821_s1 + $0x8c] ss:$16 sps:$4 sm:$0xff]   ;;  %v2846_v15 = vld [vmem:[%s3821_s1 + $0x80] ss:$16 sps:$4 sm:$0xff]   ;;  %v2853_v16 = vld [vmem:[%s3821_s1 + $0x88] ss:$16 sps:$4 sm:$0xff]  }
  0x13   :  { %v2858_v17 = vld [vmem:[%s3821_s1 + $0x64] ss:$16 sps:$4 sm:$0xff]   ;;  %v2865_v18 = vld [vmem:[%s3821_s1 + $0x6c] ss:$16 sps:$4 sm:$0xff]   ;;  %v2870_v19 = vld [vmem:[%s3821_s1 + $0x60] ss:$16 sps:$4 sm:$0xff]  }
  0x14   :  { %291 = vmatpush1.bf16.msra.mxu0 %v2800_v7  ;;  %332 = vmatpush1.bf16.msra.mxu1 %v2806_v8  ;;  %v2875_v20 = vld [vmem:[%s3821_s1 + $0x68] ss:$16 sps:$4 sm:$0xff]   ;;  %v2882_v21 = vld [vmem:[%s3821_s1 + $0x44] ss:$16 sps:$4 sm:$0xff]   ;;  %v2889_v22 = vld [vmem:[%s3821_s1 + $0x4c] ss:$16 sps:$4 sm:$0xff]  }
  0x15   :  { %292 = vmatprep.subr.bf16.mxu0 %v2812_v9  ;;  %333 = vmatprep.subr.bf16.mxu1 %v2817_v10  ;;  %v2896_v23 = vld [vmem:[%s3821_s1 + $0x40] ss:$16 sps:$4 sm:$0xff]   ;;  %v2901_v24 = vld [vmem:[%s3821_s1 + $0x48] ss:$16 sps:$4 sm:$0xff]   ;;  %v2908_v25 = vld [vmem:[%s3821_s1 + $0x24] ss:$16 sps:$4 sm:$0xff]  }
  0x16   :  { %v2913_v26 = vld [vmem:[%s3821_s1 + $0x2c] ss:$16 sps:$4 sm:$0xff]   ;;  %v2918_v27 = vld [vmem:[%s3821_s1 + $0x20] ss:$16 sps:$4 sm:$0xff]   ;;  %v2923_v28 = vld [vmem:[%s3821_s1 + $0x28] ss:$16 sps:$4 sm:$0xff]  }
  0x17   :  { %v2928_v29 = vld [vmem:[%s3821_s1 + $0x4] ss:$16 sps:$4 sm:$0xff]   ;;  %v2933_v30 = vld [vmem:[%s3821_s1 + $0xc] ss:$16 sps:$4 sm:$0xff]   ;;  %v2942_v31 = vld [vmem:[%s3821_s1] ss:$16 sps:$4 sm:$0xff]  }
  0x18   :  { %293 = vmatpush1.bf16.msra.mxu0 %v2822_v11  ;;  %334 = vmatpush1.bf16.msra.mxu1 %v2827_v12  ;;  %v2947_v32 = vld [vmem:[%s3821_s1 + $0x8] ss:$16 sps:$4 sm:$0xff]   ;;  %v106_v33 = vld [vmem:[%s3820_s0] sm:$0x1]  ;;  %v2435_v34 = vld [vmem:[%s3820_s0 + $0x1] sm:$0x1] }
  0x19   :  { %294 = vmatprep.subr.bf16.mxu0 %v2834_v13  ;;  %335 = vmatprep.subr.bf16.mxu1 %v2841_v14  ;;  %v2436_v35 = vld [vmem:[%s3820_s0 + $0x2] sm:$0x1]  ;;  %v2437_v36 = vld [vmem:[%s3820_s0 + $0x3] sm:$0x1]  ;;  %39 = vst [vmem:[#allocation3] sm:$0x3] %v2721_v37 }
  0x1a   :  { %40 = vst [vmem:[#allocation4] sm:$0x3] %v2721_v37  ;;  %v2438_v38 = vld [vmem:[%s3820_s0 + $0x4] sm:$0x1]  ;;  %v2439_v39 = vld [vmem:[%s3820_s0 + $0x5] sm:$0x1] }
  0x1b   :  { %v109_v41 = vshrl.u32 %v108_v40, 7  ;;  %v105_v44 = vld [vmem:[%s3823_s3] sm:$0xf]  ;;  %v2722_v46 = vmov 1983009808  }
  0x1c   :  { %295 = vmatpush1.bf16.msra.mxu0 %v2846_v15  ;;  %336 = vmatpush1.bf16.msra.mxu1 %v2853_v16  ;;  %v377_v47 = vunpack.c.l.s4 %v2722_v46  ;;  %v2440_v51 = vld [vmem:[%s3820_s0 + $0x6] sm:$0x1]  ;;  %v3282_v37 = vld [vmem:[#allocation5 + $0x84] ss:$16 sps:$4 sm:$0xff]  }
  0x1d   :  { %296 = vmatprep.subr.bf16.mxu0 %v2858_v17  ;;  %337 = vmatprep.subr.bf16.mxu1 %v2865_v18  ;;  %v110_v42 = vsub.s32 0, %v109_v41  ;;  %v118_v43 = vsub.s32 2, %v109_v41  ;;  %v114_v45 = vsub.s32 1, %v109_v41  ;;  %v122_v48 = vsub.s32 3, %v109_v41  ;;  %v3308_v46 = vld [vmem:[#allocation5 + $0x60] ss:$16 sps:$4 sm:$0xff]  }
  0x1e   :  { %v378_v53 = vunpack.c.0.s8 %v377_v47  ;;  %v3310_v47 = vld [vmem:[#allocation5 + $0x68] ss:$16 sps:$4 sm:$0xff]  }
  0x1f   :  { %v3180_v49 = vrot.slane %v105_v44, %v110_v42  ;;  %v3182_v50 = vrot.slane %v105_v44, %v118_v43  ;;  %v3189_v52 = vrot.slane %v105_v44, %v114_v45  ;;  %v3191_v54 = vrot.slane %v105_v44, %v122_v48  ;;  %v3296_v42 = vld [vmem:[#allocation5 + $0x80] ss:$16 sps:$4 sm:$0xff]   ;;  %v3298_v43 = vld [vmem:[#allocation5 + $0x88] ss:$16 sps:$4 sm:$0xff]   ;;  %v3302_v44 = vld [vmem:[#allocation5 + $0x64] ss:$16 sps:$4 sm:$0xff]  }
  0x20   :  { %297 = vmatpush1.bf16.msra.mxu0 %v2870_v19  ;;  %338 = vmatpush1.bf16.msra.mxu1 %v2875_v20  ;;  %v3200_v62 = vsub.s32 %v378_v53, %v109_v41  ;;  %v3304_v45 = vld [vmem:[#allocation5 + $0x6c] ss:$16 sps:$4 sm:$0xff]   ;;  %v3314_v48 = vld [vmem:[#allocation5 + $0x44] ss:$16 sps:$4 sm:$0xff]   ;;  %v3320_v53 = vld [vmem:[#allocation5 + $0x40] ss:$16 sps:$4 sm:$0xff]  }
  0x21   :  { %298 = vmatprep.subr.bf16.mxu0 %v2882_v21  ;;  %339 = vmatprep.subr.bf16.mxu1 %v2889_v22 }
  0x24   :  { %299 = vmatpush1.bf16.msra.mxu0 %v2896_v23  ;;  %340 = vmatpush1.bf16.msra.mxu1 %v2901_v24 }
  0x25   :  { %300 = vmatprep.subr.bf16.mxu0 %v2908_v25  ;;  %341 = vmatprep.subr.bf16.mxu1 %v2913_v26 }
  0x28   :  { %301 = vmatpush1.bf16.msra.mxu0 %v2918_v27  ;;  %342 = vmatpush1.bf16.msra.mxu1 %v2923_v28 }
  0x29   :  { %302 = vmatprep.subr.bf16.mxu0 %v2928_v29  ;;  %343 = vmatprep.subr.bf16.mxu1 %v2933_v30 }
  0x2c   :  { %303 = vmatpush1.bf16.msra.mxu0 %v2942_v31  ;;  %344 = vmatpush1.bf16.msra.mxu1 %v2947_v32 }
  0x2d   :  { %395 = vmatprep.subr.bf16.mxu0 %v2766_v1  ;;  %436 = vmatprep.subr.bf16.mxu1 %v2771_v2 }
  0x2f   :  { %321 = vmatmul.mubr.bf16.vlgmr.msra.gmra.mxu0 %v106_v33  ;;  %362 = vmatmul.mubr.bf16.vlgmr.msra.gmra.mxu1 %v106_v33 }
  0x30   :  { %396 = vmatpush1.bf16.msra.mxu0 %v2777_v3  ;;  %437 = vmatpush1.bf16.msra.mxu1 %v2782_v4 }
  0x31   :  { %397 = vmatprep.subr.bf16.mxu0 %v2788_v5  ;;  %438 = vmatprep.subr.bf16.mxu1 %v2795_v6 }
  0x32   :  { %427 = vmatprep.mubr.bf16.mxu0 %v3827_v0  ;;  %468 = vmatprep.mubr.bf16.mxu1 %v3827_v0 }
  0x34   :  { %398 = vmatpush1.bf16.msra.mxu0 %v2800_v7  ;;  %439 = vmatpush1.bf16.msra.mxu1 %v2806_v8 }
  0x35   :  { %399 = vmatprep.subr.bf16.mxu0 %v2812_v9  ;;  %440 = vmatprep.subr.bf16.mxu1 %v2817_v10 }
  0x38   :  { %400 = vmatpush1.bf16.msra.mxu0 %v2822_v11  ;;  %441 = vmatpush1.bf16.msra.mxu1 %v2827_v12 }
  0x39   :  { %401 = vmatprep.subr.bf16.mxu0 %v2834_v13  ;;  %442 = vmatprep.subr.bf16.mxu1 %v2841_v14 }
  0x3c   :  { %402 = vmatpush1.bf16.msra.mxu0 %v2846_v15  ;;  %443 = vmatpush1.bf16.msra.mxu1 %v2853_v16 }
  0x3d   :  { %403 = vmatprep.subr.bf16.mxu0 %v2858_v17  ;;  %444 = vmatprep.subr.bf16.mxu1 %v2865_v18 }
  0x40   :  { %404 = vmatpush1.bf16.msra.mxu0 %v2870_v19  ;;  %445 = vmatpush1.bf16.msra.mxu1 %v2875_v20 }
  0x41   :  { %405 = vmatprep.subr.bf16.mxu0 %v2882_v21  ;;  %446 = vmatprep.subr.bf16.mxu1 %v2889_v22 }
  0x44   :  { %406 = vmatpush1.bf16.msra.mxu0 %v2896_v23  ;;  %447 = vmatpush1.bf16.msra.mxu1 %v2901_v24 }
  0x45   :  { %407 = vmatprep.subr.bf16.mxu0 %v2908_v25  ;;  %448 = vmatprep.subr.bf16.mxu1 %v2913_v26 }
  0x48   :  { %408 = vmatpush1.bf16.msra.mxu0 %v2918_v27  ;;  %449 = vmatpush1.bf16.msra.mxu1 %v2923_v28 }
  0x49   :  { %409 = vmatprep.subr.bf16.mxu0 %v2928_v29  ;;  %450 = vmatprep.subr.bf16.mxu1 %v2933_v30 }
  0x4c   :  { %410 = vmatpush1.bf16.msra.mxu0 %v2942_v31  ;;  %451 = vmatpush1.bf16.msra.mxu1 %v2947_v32 }
  0x4d   :  { %503 = vmatprep.subr.bf16.mxu0 %v2766_v1  ;;  %544 = vmatprep.subr.bf16.mxu1 %v2771_v2 }
  0x4f   :  { %428 = vmatmul.mubr.bf16.vlgmr.msra.gmra.mxu0 %v2435_v34  ;;  %469 = vmatmul.mubr.bf16.vlgmr.msra.gmra.mxu1 %v2435_v34 }
  0x50   :  { %504 = vmatpush1.bf16.msra.mxu0 %v2777_v3  ;;  %545 = vmatpush1.bf16.msra.mxu1 %v2782_v4 }
  0x51   :  { %505 = vmatprep.subr.bf16.mxu0 %v2788_v5  ;;  %546 = vmatprep.subr.bf16.mxu1 %v2795_v6 }
  0x52   :  { %535 = vmatprep.mubr.bf16.mxu0 %v3827_v0  ;;  %576 = vmatprep.mubr.bf16.mxu1 %v3827_v0 }
  0x54   :  { %506 = vmatpush1.bf16.msra.mxu0 %v2800_v7  ;;  %547 = vmatpush1.bf16.msra.mxu1 %v2806_v8 }
  0x55   :  { %507 = vmatprep.subr.bf16.mxu0 %v2812_v9  ;;  %548 = vmatprep.subr.bf16.mxu1 %v2817_v10 }
  0x58   :  { %508 = vmatpush1.bf16.msra.mxu0 %v2822_v11  ;;  %549 = vmatpush1.bf16.msra.mxu1 %v2827_v12 }
  0x59   :  { %509 = vmatprep.subr.bf16.mxu0 %v2834_v13  ;;  %550 = vmatprep.subr.bf16.mxu1 %v2841_v14 }
  0x5c   :  { %510 = vmatpush1.bf16.msra.mxu0 %v2846_v15  ;;  %551 = vmatpush1.bf16.msra.mxu1 %v2853_v16 }
  0x5d   :  { %511 = vmatprep.subr.bf16.mxu0 %v2858_v17  ;;  %552 = vmatprep.subr.bf16.mxu1 %v2865_v18 }
  0x60   :  { %512 = vmatpush1.bf16.msra.mxu0 %v2870_v19  ;;  %553 = vmatpush1.bf16.msra.mxu1 %v2875_v20 }
  0x61   :  { %513 = vmatprep.subr.bf16.mxu0 %v2882_v21  ;;  %554 = vmatprep.subr.bf16.mxu1 %v2889_v22 }
  0x64   :  { %514 = vmatpush1.bf16.msra.mxu0 %v2896_v23  ;;  %555 = vmatpush1.bf16.msra.mxu1 %v2901_v24 }
  0x65   :  { %515 = vmatprep.subr.bf16.mxu0 %v2908_v25  ;;  %556 = vmatprep.subr.bf16.mxu1 %v2913_v26 }
  0x68   :  { %516 = vmatpush1.bf16.msra.mxu0 %v2918_v27  ;;  %557 = vmatpush1.bf16.msra.mxu1 %v2923_v28 }
  0x69   :  { %517 = vmatprep.subr.bf16.mxu0 %v2928_v29  ;;  %558 = vmatprep.subr.bf16.mxu1 %v2933_v30 }
  0x6c   :  { %518 = vmatpush1.bf16.msra.mxu0 %v2942_v31  ;;  %559 = vmatpush1.bf16.msra.mxu1 %v2947_v32 }
  0x6d   :  { %611 = vmatprep.subr.bf16.mxu0 %v2766_v1  ;;  %652 = vmatprep.subr.bf16.mxu1 %v2771_v2 }
  0x6f   :  { %536 = vmatmul.mubr.bf16.vlgmr.msra.gmra.mxu0 %v2436_v35  ;;  %577 = vmatmul.mubr.bf16.vlgmr.msra.gmra.mxu1 %v2436_v35 }
  0x70   :  { %612 = vmatpush1.bf16.msra.mxu0 %v2777_v3  ;;  %653 = vmatpush1.bf16.msra.mxu1 %v2782_v4 }
  0x71   :  { %613 = vmatprep.subr.bf16.mxu0 %v2788_v5  ;;  %654 = vmatprep.subr.bf16.mxu1 %v2795_v6 }
  0x72   :  { %643 = vmatprep.mubr.bf16.mxu0 %v3827_v0  ;;  %684 = vmatprep.mubr.bf16.mxu1 %v3827_v0 }
  0x74   :  { %614 = vmatpush1.bf16.msra.mxu0 %v2800_v7  ;;  %655 = vmatpush1.bf16.msra.mxu1 %v2806_v8 }
  0x75   :  { %615 = vmatprep.subr.bf16.mxu0 %v2812_v9  ;;  %656 = vmatprep.subr.bf16.mxu1 %v2817_v10 }
  0x78   :  { %616 = vmatpush1.bf16.msra.mxu0 %v2822_v11  ;;  %657 = vmatpush1.bf16.msra.mxu1 %v2827_v12 }
  0x79   :  { %617 = vmatprep.subr.bf16.mxu0 %v2834_v13  ;;  %658 = vmatprep.subr.bf16.mxu1 %v2841_v14 }
  0x7c   :  { %618 = vmatpush1.bf16.msra.mxu0 %v2846_v15  ;;  %659 = vmatpush1.bf16.msra.mxu1 %v2853_v16 }
  0x7d   :  { %619 = vmatprep.subr.bf16.mxu0 %v2858_v17  ;;  %660 = vmatprep.subr.bf16.mxu1 %v2865_v18 }
  0x80   :  { %620 = vmatpush1.bf16.msra.mxu0 %v2870_v19  ;;  %661 = vmatpush1.bf16.msra.mxu1 %v2875_v20 }
  0x81   :  { %621 = vmatprep.subr.bf16.mxu0 %v2882_v21  ;;  %662 = vmatprep.subr.bf16.mxu1 %v2889_v22 }
  0x84   :  { %622 = vmatpush1.bf16.msra.mxu0 %v2896_v23  ;;  %663 = vmatpush1.bf16.msra.mxu1 %v2901_v24 }
  0x85   :  { %623 = vmatprep.subr.bf16.mxu0 %v2908_v25  ;;  %664 = vmatprep.subr.bf16.mxu1 %v2913_v26 }
  0x88   :  { %624 = vmatpush1.bf16.msra.mxu0 %v2918_v27  ;;  %665 = vmatpush1.bf16.msra.mxu1 %v2923_v28 }
  0x89   :  { %625 = vmatprep.subr.bf16.mxu0 %v2928_v29  ;;  %666 = vmatprep.subr.bf16.mxu1 %v2933_v30 }
  0x8c   :  { %626 = vmatpush1.bf16.msra.mxu0 %v2942_v31  ;;  %667 = vmatpush1.bf16.msra.mxu1 %v2947_v32 }
  0x8d   :  { %719 = vmatprep.subr.bf16.mxu0 %v2766_v1  ;;  %760 = vmatprep.subr.bf16.mxu1 %v2771_v2 }
  0x8f   :  { %644 = vmatmul.mubr.bf16.vlgmr.msra.gmra.mxu0 %v2437_v36  ;;  %685 = vmatmul.mubr.bf16.vlgmr.msra.gmra.mxu1 %v2437_v36 }
  0x90   :  { %720 = vmatpush1.bf16.msra.mxu0 %v2777_v3  ;;  %761 = vmatpush1.bf16.msra.mxu1 %v2782_v4 }
  0x91   :  { %721 = vmatprep.subr.bf16.mxu0 %v2788_v5  ;;  %762 = vmatprep.subr.bf16.mxu1 %v2795_v6 }
  0x92   :  { %751 = vmatprep.mubr.bf16.mxu0 %v3827_v0  ;;  %792 = vmatprep.mubr.bf16.mxu1 %v3827_v0 }
  0x94   :  { %722 = vmatpush1.bf16.msra.mxu0 %v2800_v7  ;;  %763 = vmatpush1.bf16.msra.mxu1 %v2806_v8 }
  0x95   :  { %723 = vmatprep.subr.bf16.mxu0 %v2812_v9  ;;  %764 = vmatprep.subr.bf16.mxu1 %v2817_v10 }
  0x98   :  { %724 = vmatpush1.bf16.msra.mxu0 %v2822_v11  ;;  %765 = vmatpush1.bf16.msra.mxu1 %v2827_v12 }
  0x99   :  { %725 = vmatprep.subr.bf16.mxu0 %v2834_v13  ;;  %766 = vmatprep.subr.bf16.mxu1 %v2841_v14 }
  0x9c   :  { %726 = vmatpush1.bf16.msra.mxu0 %v2846_v15  ;;  %767 = vmatpush1.bf16.msra.mxu1 %v2853_v16 }
  0x9d   :  { %727 = vmatprep.subr.bf16.mxu0 %v2858_v17  ;;  %768 = vmatprep.subr.bf16.mxu1 %v2865_v18 }
  0xa0   :  { %728 = vmatpush1.bf16.msra.mxu0 %v2870_v19  ;;  %769 = vmatpush1.bf16.msra.mxu1 %v2875_v20 }
  0xa1   :  { %729 = vmatprep.subr.bf16.mxu0 %v2882_v21  ;;  %770 = vmatprep.subr.bf16.mxu1 %v2889_v22 }
  0xa4   :  { %730 = vmatpush1.bf16.msra.mxu0 %v2896_v23  ;;  %771 = vmatpush1.bf16.msra.mxu1 %v2901_v24 }
  0xa5   :  { %731 = vmatprep.subr.bf16.mxu0 %v2908_v25  ;;  %772 = vmatprep.subr.bf16.mxu1 %v2913_v26 }
  0xa8   :  { %732 = vmatpush1.bf16.msra.mxu0 %v2918_v27  ;;  %773 = vmatpush1.bf16.msra.mxu1 %v2923_v28 }
  0xa9   :  { %733 = vmatprep.subr.bf16.mxu0 %v2928_v29  ;;  %774 = vmatprep.subr.bf16.mxu1 %v2933_v30 }
  0xac   :  { %734 = vmatpush1.bf16.msra.mxu0 %v2942_v31  ;;  %775 = vmatpush1.bf16.msra.mxu1 %v2947_v32 }
  0xad   :  { %827 = vmatprep.subr.bf16.mxu0 %v2766_v1  ;;  %868 = vmatprep.subr.bf16.mxu1 %v2771_v2 }
  0xaf   :  { %752 = vmatmul.mubr.bf16.vlgmr.msra.gmra.mxu0 %v2438_v38  ;;  %793 = vmatmul.mubr.bf16.vlgmr.msra.gmra.mxu1 %v2438_v38  ;;  %v3284_v38 = vld [vmem:[#allocation5 + $0x8c] ss:$16 sps:$4 sm:$0xff]  }
  0xb0   :  { %828 = vmatpush1.bf16.msra.mxu0 %v2777_v3  ;;  %869 = vmatpush1.bf16.msra.mxu1 %v2782_v4 }
  0xb1   :  { %829 = vmatprep.subr.bf16.mxu0 %v2788_v5  ;;  %870 = vmatprep.subr.bf16.mxu1 %v2795_v6 }
  0xb2   :  { %859 = vmatprep.mubr.bf16.mxu0 %v3827_v0  ;;  %900 = vmatprep.mubr.bf16.mxu1 %v3827_v0 }
  0xb4   :  { %830 = vmatpush1.bf16.msra.mxu0 %v2800_v7  ;;  %871 = vmatpush1.bf16.msra.mxu1 %v2806_v8 }
  0xb5   :  { %831 = vmatprep.subr.bf16.mxu0 %v2812_v9  ;;  %872 = vmatprep.subr.bf16.mxu1 %v2817_v10 }
  0xb8   :  { %832 = vmatpush1.bf16.msra.mxu0 %v2822_v11  ;;  %873 = vmatpush1.bf16.msra.mxu1 %v2827_v12 }
  0xb9   :  { %833 = vmatprep.subr.bf16.mxu0 %v2834_v13  ;;  %874 = vmatprep.subr.bf16.mxu1 %v2841_v14 }
  0xbc   :  { %834 = vmatpush1.bf16.msra.mxu0 %v2846_v15  ;;  %875 = vmatpush1.bf16.msra.mxu1 %v2853_v16 }
  0xbd   :  { %835 = vmatprep.subr.bf16.mxu0 %v2858_v17  ;;  %876 = vmatprep.subr.bf16.mxu1 %v2865_v18 }
  0xc0   :  { %836 = vmatpush1.bf16.msra.mxu0 %v2870_v19  ;;  %877 = vmatpush1.bf16.msra.mxu1 %v2875_v20 }
  0xc1   :  { %837 = vmatprep.subr.bf16.mxu0 %v2882_v21  ;;  %878 = vmatprep.subr.bf16.mxu1 %v2889_v22 }
  0xc4   :  { %838 = vmatpush1.bf16.msra.mxu0 %v2896_v23  ;;  %879 = vmatpush1.bf16.msra.mxu1 %v2901_v24 }
  0xc5   :  { %839 = vmatprep.subr.bf16.mxu0 %v2908_v25  ;;  %880 = vmatprep.subr.bf16.mxu1 %v2913_v26 }
  0xc8   :  { %840 = vmatpush1.bf16.msra.mxu0 %v2918_v27  ;;  %881 = vmatpush1.bf16.msra.mxu1 %v2923_v28 }
  0xc9   :  { %841 = vmatprep.subr.bf16.mxu0 %v2928_v29  ;;  %882 = vmatprep.subr.bf16.mxu1 %v2933_v30 }
  0xcc   :  { %842 = vmatpush1.bf16.msra.mxu0 %v2942_v31  ;;  %883 = vmatpush1.bf16.msra.mxu1 %v2947_v32 }
  0xcd   :  { %935 = vmatprep.subr.bf16.mxu0 %v2766_v1  ;;  %976 = vmatprep.subr.bf16.mxu1 %v2771_v2 }
  0xcf   :  { %860 = vmatmul.mubr.bf16.vlgmr.msra.gmra.mxu0 %v2439_v39  ;;  %901 = vmatmul.mubr.bf16.vlgmr.msra.gmra.mxu1 %v2439_v39 }
  0xd0   :  { %936 = vmatpush1.bf16.msra.mxu0 %v2777_v3  ;;  %977 = vmatpush1.bf16.msra.mxu1 %v2782_v4 }
  0xd1   :  { %937 = vmatprep.subr.bf16.mxu0 %v2788_v5  ;;  %978 = vmatprep.subr.bf16.mxu1 %v2795_v6 }
  0xd2   :  { %967 = vmatprep.mubr.bf16.mxu0 %v3827_v0  ;;  %1008 = vmatprep.mubr.bf16.mxu1 %v3827_v0 }
  0xd4   :  { %938 = vmatpush1.bf16.msra.mxu0 %v2800_v7  ;;  %979 = vmatpush1.bf16.msra.mxu1 %v2806_v8 }
  0xd5   :  { %939 = vmatprep.subr.bf16.mxu0 %v2812_v9  ;;  %980 = vmatprep.subr.bf16.mxu1 %v2817_v10 }
  0xd8   :  { %940 = vmatpush1.bf16.msra.mxu0 %v2822_v11  ;;  %981 = vmatpush1.bf16.msra.mxu1 %v2827_v12 }
  0xd9   :  { %941 = vmatprep.subr.bf16.mxu0 %v2834_v13  ;;  %982 = vmatprep.subr.bf16.mxu1 %v2841_v14 }
  0xdc   :  { %942 = vmatpush1.bf16.msra.mxu0 %v2846_v15  ;;  %983 = vmatpush1.bf16.msra.mxu1 %v2853_v16 }
  0xdd   :  { %943 = vmatprep.subr.bf16.mxu0 %v2858_v17  ;;  %984 = vmatprep.subr.bf16.mxu1 %v2865_v18 }
  0xe0   :  { %944 = vmatpush1.bf16.msra.mxu0 %v2870_v19  ;;  %985 = vmatpush1.bf16.msra.mxu1 %v2875_v20 }
  0xe1   :  { %945 = vmatprep.subr.bf16.mxu0 %v2882_v21  ;;  %986 = vmatprep.subr.bf16.mxu1 %v2889_v22 }
  0xe4   :  { %946 = vmatpush1.bf16.msra.mxu0 %v2896_v23  ;;  %987 = vmatpush1.bf16.msra.mxu1 %v2901_v24 }
  0xe5   :  { %947 = vmatprep.subr.bf16.mxu0 %v2908_v25  ;;  %988 = vmatprep.subr.bf16.mxu1 %v2913_v26 }
  0xe8   :  { %948 = vmatpush1.bf16.msra.mxu0 %v2918_v27  ;;  %989 = vmatpush1.bf16.msra.mxu1 %v2923_v28 }
  0xe9   :  { %949 = vmatprep.subr.bf16.mxu0 %v2928_v29  ;;  %990 = vmatprep.subr.bf16.mxu1 %v2933_v30 }
  0xec   :  { %950 = vmatpush1.bf16.msra.mxu0 %v2942_v31  ;;  %991 = vmatpush1.bf16.msra.mxu1 %v2947_v32 }
  0xed   :  { %1043 = vmatprep.subr.bf16.mxu0 %v2766_v1  ;;  %1084 = vmatprep.subr.bf16.mxu1 %v2771_v2 }
  0xef   :  { %v322_v55 = vpop.f32.mrf.mxu0  ;;  %v363_v56 = vpop.f32.mrf.mxu1  ;;  %968 = vmatmul.mubr.bf16.vlgmr.msra.gmra.mxu0 %v2440_v51  ;;  %1009 = vmatmul.mubr.bf16.vlgmr.msra.gmra.mxu1 %v2440_v51  ;;  %v3316_v51 = vld [vmem:[#allocation5 + $0x4c] ss:$16 sps:$4 sm:$0xff]  }
  0xf0   :  { %v323_v57 = vadd.f32 %v322_v55, %v3180_v49  ;;  %v364_v58 = vadd.f32 %v363_v56, %v3182_v50  ;;  %1044 = vmatpush1.bf16.msra.mxu0 %v2777_v3  ;;  %1085 = vmatpush1.bf16.msra.mxu1 %v2782_v4  ;;  %v3322_v55 = vld [vmem:[#allocation5 + $0x48] ss:$16 sps:$4 sm:$0xff]   ;;  %v3326_v56 = vld [vmem:[#allocation5 + $0x24] ss:$16 sps:$4 sm:$0xff]  }
  0xf1   :  { %v324_v59 = vpop.f32.mrf.mxu0  ;;  %v365_v60 = vpop.f32.mrf.mxu1  ;;  %1045 = vmatprep.subr.bf16.mxu0 %v2788_v5  ;;  %1086 = vmatprep.subr.bf16.mxu1 %v2795_v6 }
  0xf2   :  { %v325_v61 = vadd.f32 %v324_v59, %v3189_v52  ;;  %v366_v63 = vadd.f32 %v365_v60, %v3191_v54  ;;  %1075 = vmatprep.mubr.bf16.mxu0 %v3827_v0  ;;  %1116 = vmatprep.mubr.bf16.mxu1 %v3827_v0  ;;  %v3334_v59 = vld [vmem:[#allocation5 + $0x28] ss:$16 sps:$4 sm:$0xff]   ;;  %v3338_v60 = vld [vmem:[#allocation5 + $0x4] ss:$16 sps:$4 sm:$0xff]  }
  0xf3   :  { %v326_v1 = vpop.f32.mrf.mxu0  ;;  %v367_v2 = vpop.f32.mrf.mxu1 }
  0xf4   :  { %v374_v3 = vcombine.low %v323_v57, %v325_v61  ;;  %v375_v4 = vcombine.low %v364_v58, %v366_v63  ;;  %1046 = vmatpush1.bf16.msra.mxu0 %v2800_v7  ;;  %1087 = vmatpush1.bf16.msra.mxu1 %v2806_v8  ;;  %v3237_v7 = vld [vmem:[#allocation5 + $0xe4] ss:$16 sps:$4 sm:$0xff]   ;;  %v3239_v8 = vld [vmem:[#allocation5 + $0xec] ss:$16 sps:$4 sm:$0xff]   ;;  %v3332_v58 = vld [vmem:[#allocation5 + $0x20] ss:$16 sps:$4 sm:$0xff]  }
  0xf5   :  { %v327_v5 = vpop.f32.mrf.mxu0  ;;  %v368_v6 = vpop.f32.mrf.mxu1  ;;  %1047 = vmatprep.subr.bf16.mxu0 %v2812_v9  ;;  %1088 = vmatprep.subr.bf16.mxu1 %v2817_v10  ;;  %v2441_v9 = vld [vmem:[%s3820_s0 + $0x7] sm:$0x1]  ;;  %v3328_v57 = vld [vmem:[#allocation5 + $0x2c] ss:$16 sps:$4 sm:$0xff]   ;;  %v3346_v1 = vld [vmem:[#allocation5 + $0x8] ss:$16 sps:$4 sm:$0xff]  }
  0xf6   :  { %v3210_v33 = vrot.slane %v374_v3, %v3200_v62  ;;  %v3213_v34 = vrot.slane %v375_v4, %v3200_v62  ;;  %v3246_v10 = vld [vmem:[#allocation5 + $0xe0] ss:$16 sps:$4 sm:$0xff]   ;;  %v3340_v61 = vld [vmem:[#allocation5 + $0xc] ss:$16 sps:$4 sm:$0xff]  }
  0xf7   :  { %v3344_v63 = vld [vmem:[#allocation5] ss:$16 sps:$4 sm:$0xff]   ;;  %v1149_v2 = vld [vmem:[#allocation3] sm:$0x3] }
  0xf8   :  { %1048 = vmatpush1.bf16.msra.mxu0 %v2822_v11  ;;  %1089 = vmatpush1.bf16.msra.mxu1 %v2827_v12  ;;  %v3248_v11 = vld [vmem:[#allocation5 + $0xe8] ss:$16 sps:$4 sm:$0xff]   ;;  %v3252_v12 = vld [vmem:[#allocation5 + $0xc4] ss:$16 sps:$4 sm:$0xff]   ;;  %v1152_v3 = vpack.c.bf16 %v1149_v2, %v1149_v2 }
  0xf9   :  { %1049 = vmatprep.subr.bf16.mxu0 %v2834_v13  ;;  %1090 = vmatprep.subr.bf16.mxu1 %v2841_v14  ;;  %v3254_v13 = vld [vmem:[#allocation5 + $0xcc] ss:$16 sps:$4 sm:$0xff]  }
  0xfc   :  { %1050 = vmatpush1.bf16.msra.mxu0 %v2846_v15  ;;  %1091 = vmatpush1.bf16.msra.mxu1 %v2853_v16 }
  0xfd   :  { %1051 = vmatprep.subr.bf16.mxu0 %v2858_v17  ;;  %1092 = vmatprep.subr.bf16.mxu1 %v2865_v18  ;;  %v3260_v18 = vld [vmem:[#allocation5 + $0xc0] ss:$16 sps:$4 sm:$0xff]  }
 0x100   :  { %1052 = vmatpush1.bf16.msra.mxu0 %v2870_v19  ;;  %1093 = vmatpush1.bf16.msra.mxu1 %v2875_v20  ;;  %v3262_v19 = vld [vmem:[#allocation5 + $0xc8] ss:$16 sps:$4 sm:$0xff]  }
 0x101   :  { %1053 = vmatprep.subr.bf16.mxu0 %v2882_v21  ;;  %1094 = vmatprep.subr.bf16.mxu1 %v2889_v22  ;;  %v3266_v22 = vld [vmem:[#allocation5 + $0xa4] ss:$16 sps:$4 sm:$0xff]  }
 0x104   :  { %1054 = vmatpush1.bf16.msra.mxu0 %v2896_v23  ;;  %1095 = vmatpush1.bf16.msra.mxu1 %v2901_v24  ;;  %v3268_v23 = vld [vmem:[#allocation5 + $0xac] ss:$16 sps:$4 sm:$0xff]  }
 0x105   :  { %1055 = vmatprep.subr.bf16.mxu0 %v2908_v25  ;;  %1096 = vmatprep.subr.bf16.mxu1 %v2913_v26 }
 0x108   :  { %1056 = vmatpush1.bf16.msra.mxu0 %v2918_v27  ;;  %1097 = vmatpush1.bf16.msra.mxu1 %v2923_v28 }
 0x109   :  { %1057 = vmatprep.subr.bf16.mxu0 %v2928_v29  ;;  %1098 = vmatprep.subr.bf16.mxu1 %v2933_v30  ;;  %v3276_v30 = vld [vmem:[#allocation5 + $0xa0] ss:$16 sps:$4 sm:$0xff]  }
 0x10c   :  { %1058 = vmatpush1.bf16.msra.mxu0 %v2942_v31  ;;  %1099 = vmatpush1.bf16.msra.mxu1 %v2947_v32  ;;  %v3278_v31 = vld [vmem:[#allocation5 + $0xa8] ss:$16 sps:$4 sm:$0xff]  }
 0x10d   :  { %1313 = vmatprep.subr.bf16.mxu0 %v3237_v7  ;;  %1354 = vmatprep.subr.bf16.mxu1 %v3239_v8 }
 0x10f   :  { %v429_v14 = vpop.f32.mrf.mxu0  ;;  %v470_v15 = vpop.f32.mrf.mxu1  ;;  %1076 = vmatmul.mubr.bf16.vlgmr.msra.gmra.mxu0 %v2441_v9  ;;  %1117 = vmatmul.mubr.bf16.vlgmr.msra.gmra.mxu1 %v2441_v9 }
 0x110   :  { %v430_v16 = vadd.f32 %v429_v14, %v3180_v49  ;;  %v471_v17 = vadd.f32 %v470_v15, %v3182_v50  ;;  %1314 = vmatpush1.bf16.msra.mxu0 %v3246_v10  ;;  %1355 = vmatpush1.bf16.msra.mxu1 %v3248_v11 }
 0x111   :  { %v431_v20 = vpop.f32.mrf.mxu0  ;;  %v472_v21 = vpop.f32.mrf.mxu1  ;;  %1315 = vmatprep.subr.bf16.mxu0 %v3252_v12  ;;  %1356 = vmatprep.subr.bf16.mxu1 %v3254_v13 }
 0x112   :  { %v432_v24 = vadd.f32 %v431_v20, %v3189_v52  ;;  %v473_v25 = vadd.f32 %v472_v21, %v3191_v54  ;;  %1345 = vmatprep.mubr.bf16.mxu0 %v3827_v0  ;;  %1386 = vmatprep.mubr.bf16.mxu1 %v3827_v0 }
 0x113   :  { %v433_v26 = vpop.f32.mrf.mxu0  ;;  %v474_v27 = vpop.f32.mrf.mxu1 }
 0x114   :  { %v481_v28 = vcombine.low %v430_v16, %v432_v24  ;;  %v482_v29 = vcombine.low %v471_v17, %v473_v25  ;;  %1316 = vmatpush1.bf16.msra.mxu0 %v3260_v18  ;;  %1357 = vmatpush1.bf16.msra.mxu1 %v3262_v19 }
 0x115   :  { %v434_v32 = vpop.f32.mrf.mxu0  ;;  %v475_v36 = vpop.f32.mrf.mxu1  ;;  %1317 = vmatprep.subr.bf16.mxu0 %v3266_v22  ;;  %1358 = vmatprep.subr.bf16.mxu1 %v3268_v23 }
 0x116   :  { %v3287_v39 = vrot.slane %v481_v28, %v3200_v62  ;;  %v3290_v40 = vrot.slane %v482_v29, %v3200_v62 }
 0x118   :  { %1318 = vmatpush1.bf16.msra.mxu0 %v3276_v30  ;;  %1359 = vmatpush1.bf16.msra.mxu1 %v3278_v31 }
 0x119   :  { %1319 = vmatprep.subr.bf16.mxu0 %v3282_v37  ;;  %1360 = vmatprep.subr.bf16.mxu1 %v3284_v38 }
 0x11c   :  { %1320 = vmatpush1.bf16.msra.mxu0 %v3296_v42  ;;  %1361 = vmatpush1.bf16.msra.mxu1 %v3298_v43 }
 0x11d   :  { %1321 = vmatprep.subr.bf16.mxu0 %v3302_v44  ;;  %1362 = vmatprep.subr.bf16.mxu1 %v3304_v45 }
 0x120   :  { %1322 = vmatpush1.bf16.msra.mxu0 %v3308_v46  ;;  %1363 = vmatpush1.bf16.msra.mxu1 %v3310_v47 }
 0x121   :  { %1323 = vmatprep.subr.bf16.mxu0 %v3314_v48  ;;  %1364 = vmatprep.subr.bf16.mxu1 %v3316_v51 }
 0x124   :  { %1324 = vmatpush1.bf16.msra.mxu0 %v3320_v53  ;;  %1365 = vmatpush1.bf16.msra.mxu1 %v3322_v55 }
 0x125   :  { %1325 = vmatprep.subr.bf16.mxu0 %v3326_v56  ;;  %1366 = vmatprep.subr.bf16.mxu1 %v3328_v57 }
 0x128   :  { %1326 = vmatpush1.bf16.msra.mxu0 %v3332_v58  ;;  %1367 = vmatpush1.bf16.msra.mxu1 %v3334_v59 }
 0x129   :  { %1327 = vmatprep.subr.bf16.mxu0 %v3338_v60  ;;  %1368 = vmatprep.subr.bf16.mxu1 %v3340_v61 }
 0x12c   :  { %1328 = vmatpush1.bf16.msra.mxu0 %v3344_v63  ;;  %1369 = vmatpush1.bf16.msra.mxu1 %v3346_v1 }
 0x12d   :  { %1446 = vmatprep.subr.bf16.mxu0 %v3237_v7  ;;  %1487 = vmatprep.subr.bf16.mxu1 %v3239_v8 }
 0x12f   :  { %v537_v4 = vpop.f32.mrf.mxu0  ;;  %v578_v5 = vpop.f32.mrf.mxu1  ;;  %1346 = vmatmul.mubr.bf16.vlgmr.msra.gmra.mxu0 %v1152_v3  ;;  %1387 = vmatmul.mubr.bf16.vlgmr.msra.gmra.mxu1 %v1152_v3 }
 0x130   :  { %v538_v6 = vadd.f32 %v537_v4, %v3180_v49  ;;  %v579_v9 = vadd.f32 %v578_v5, %v3182_v50  ;;  %1447 = vmatpush1.bf16.msra.mxu0 %v3246_v10  ;;  %1488 = vmatpush1.bf16.msra.mxu1 %v3248_v11 }
 0x131   :  { %v539_v14 = vpop.f32.mrf.mxu0  ;;  %v580_v15 = vpop.f32.mrf.mxu1  ;;  %1448 = vmatprep.subr.bf16.mxu0 %v3252_v12  ;;  %1489 = vmatprep.subr.bf16.mxu1 %v3254_v13 }
 0x132   :  { %v540_v16 = vadd.f32 %v539_v14, %v3189_v52  ;;  %v581_v17 = vadd.f32 %v580_v15, %v3191_v54  ;;  %1478 = vmatprep.mubr.bf16.mxu0 %v3827_v0  ;;  %1519 = vmatprep.mubr.bf16.mxu1 %v3827_v0 }
 0x133   :  { %v541_v20 = vpop.f32.mrf.mxu0  ;;  %v582_v21 = vpop.f32.mrf.mxu1 }
 0x134   :  { %v589_v24 = vcombine.low %v538_v6, %v540_v16  ;;  %v590_v25 = vcombine.low %v579_v9, %v581_v17  ;;  %1449 = vmatpush1.bf16.msra.mxu0 %v3260_v18  ;;  %1490 = vmatpush1.bf16.msra.mxu1 %v3262_v19 }
 0x135   :  { %v542_v26 = vpop.f32.mrf.mxu0  ;;  %v583_v27 = vpop.f32.mrf.mxu1  ;;  %1450 = vmatprep.subr.bf16.mxu0 %v3266_v22  ;;  %1491 = vmatprep.subr.bf16.mxu1 %v3268_v23 }
 0x136   :  { %v3369_v28 = vrot.slane %v589_v24, %v3200_v62  ;;  %v3372_v29 = vrot.slane %v590_v25, %v3200_v62 }
 0x138   :  { %1451 = vmatpush1.bf16.msra.mxu0 %v3276_v30  ;;  %1492 = vmatpush1.bf16.msra.mxu1 %v3278_v31 }
 0x139   :  { %1452 = vmatprep.subr.bf16.mxu0 %v3282_v37  ;;  %1493 = vmatprep.subr.bf16.mxu1 %v3284_v38 }
 0x13c   :  { %1453 = vmatpush1.bf16.msra.mxu0 %v3296_v42  ;;  %1494 = vmatpush1.bf16.msra.mxu1 %v3298_v43 }
 0x13d   :  { %1454 = vmatprep.subr.bf16.mxu0 %v3302_v44  ;;  %1495 = vmatprep.subr.bf16.mxu1 %v3304_v45 }
 0x140   :  { %1455 = vmatpush1.bf16.msra.mxu0 %v3308_v46  ;;  %1496 = vmatpush1.bf16.msra.mxu1 %v3310_v47 }
 0x141   :  { %1456 = vmatprep.subr.bf16.mxu0 %v3314_v48  ;;  %1497 = vmatprep.subr.bf16.mxu1 %v3316_v51 }
 0x144   :  { %1457 = vmatpush1.bf16.msra.mxu0 %v3320_v53  ;;  %1498 = vmatpush1.bf16.msra.mxu1 %v3322_v55 }
 0x145   :  { %1458 = vmatprep.subr.bf16.mxu0 %v3326_v56  ;;  %1499 = vmatprep.subr.bf16.mxu1 %v3328_v57 }
 0x148   :  { %1459 = vmatpush1.bf16.msra.mxu0 %v3332_v58  ;;  %1500 = vmatpush1.bf16.msra.mxu1 %v3334_v59 }
 0x149   :  { %1460 = vmatprep.subr.bf16.mxu0 %v3338_v60  ;;  %1501 = vmatprep.subr.bf16.mxu1 %v3340_v61 }
 0x14c   :  { %1461 = vmatpush1.bf16.msra.mxu0 %v3344_v63  ;;  %1502 = vmatpush1.bf16.msra.mxu1 %v3346_v1 }
 0x14d   :  { %1580 = vmatprep.subr.bf16.mxu0 %v3237_v7  ;;  %1621 = vmatprep.subr.bf16.mxu1 %v3239_v8 }
 0x14f   :  { %v645_v36 = vpop.f32.mrf.mxu0  ;;  %v686_v2 = vpop.f32.mrf.mxu1 }
 0x150   :  { %v646_v3 = vadd.f32 %v645_v36, %v3180_v49  ;;  %v687_v4 = vadd.f32 %v686_v2, %v3182_v50 }
 0x151   :  { %v647_v5 = vpop.f32.mrf.mxu0  ;;  %v688_v6 = vpop.f32.mrf.mxu1 }
 0x152   :  { %v648_v9 = vadd.f32 %v647_v5, %v3189_v52  ;;  %v689_v14 = vadd.f32 %v688_v6, %v3191_v54 }
 0x153   :  { %v649_v15 = vpop.f32.mrf.mxu0  ;;  %v690_v16 = vpop.f32.mrf.mxu1 }
 0x154   :  { %v697_v17 = vcombine.low %v646_v3, %v648_v9  ;;  %v698_v20 = vcombine.low %v687_v4, %v689_v14 }
 0x155   :  { %v650_v21 = vpop.f32.mrf.mxu0  ;;  %v691_v24 = vpop.f32.mrf.mxu1 }
 0x156   :  { %v3405_v25 = vrot.slane %v697_v17, %v3200_v62  ;;  %v3408_v26 = vrot.slane %v698_v20, %v3200_v62 }
 0x16f   :  { %v753_v36 = vpop.f32.mrf.mxu0  ;;  %v794_v2 = vpop.f32.mrf.mxu1 }
 0x170   :  { %v754_v5 = vadd.f32 %v753_v36, %v3180_v49  ;;  %v795_v6 = vadd.f32 %v794_v2, %v3182_v50 }
 0x171   :  { %v755_v15 = vpop.f32.mrf.mxu0  ;;  %v796_v3 = vpop.f32.mrf.mxu1 }
 0x172   :  { %v756_v4 = vadd.f32 %v755_v15, %v3189_v52  ;;  %v797_v9 = vadd.f32 %v796_v3, %v3191_v54 }
 0x173   :  { %v757_v14 = vpop.f32.mrf.mxu0  ;;  %v798_v16 = vpop.f32.mrf.mxu1 }
 0x174   :  { %v805_v17 = vcombine.low %v754_v5, %v756_v4  ;;  %v806_v20 = vcombine.low %v795_v6, %v797_v9 }
 0x175   :  { %v758_v21 = vpop.f32.mrf.mxu0  ;;  %v799_v24 = vpop.f32.mrf.mxu1 }
 0x176   :  { %v3417_v27 = vrot.slane %v805_v17, %v3200_v62  ;;  %v3420_v32 = vrot.slane %v806_v20, %v3200_v62 }
 0x18f   :  { %v861_v2 = vpop.f32.mrf.mxu0  ;;  %v902_v41 = vpop.f32.mrf.mxu1 }
 0x190   :  { %v862_v15 = vadd.f32 %v861_v2, %v3180_v49  ;;  %v903_v3 = vadd.f32 %v902_v41, %v3182_v50 }
 0x191   :  { %v863_v14 = vpop.f32.mrf.mxu0  ;;  %v904_v5 = vpop.f32.mrf.mxu1 }
 0x192   :  { %v864_v6 = vadd.f32 %v863_v14, %v3189_v52  ;;  %v905_v4 = vadd.f32 %v904_v5, %v3191_v54 }
 0x193   :  { %v865_v9 = vpop.f32.mrf.mxu0  ;;  %v906_v16 = vpop.f32.mrf.mxu1 }
 0x194   :  { %v913_v17 = vcombine.low %v862_v15, %v864_v6  ;;  %v914_v20 = vcombine.low %v903_v3, %v905_v4 }
 0x195   :  { %v866_v21 = vpop.f32.mrf.mxu0  ;;  %v907_v24 = vpop.f32.mrf.mxu1 }
 0x196   :  { %v3429_v36 = vrot.slane %v913_v17, %v3200_v62  ;;  %v3432_v0 = vrot.slane %v914_v20, %v3200_v62 }
 0x198   :  { %3832 = vst [vmem:[#allocation8_spill] sm:$0xff] %v3429_v36  ;;  %3833 = vst [vmem:[#allocation9_spill] sm:$0xff] %v3432_v0 }
 0x1af   :  { %v969_v2 = vpop.f32.mrf.mxu0  ;;  %v1010_v35 = vpop.f32.mrf.mxu1 }
 0x1b0   :  { %v970_v14 = vadd.f32 %v969_v2, %v3180_v49  ;;  %v1011_v5 = vadd.f32 %v1010_v35, %v3182_v50 }
 0x1b1   :  { %v971_v9 = vpop.f32.mrf.mxu0  ;;  %v1012_v15 = vpop.f32.mrf.mxu1 }
 0x1b2   :  { %v972_v3 = vadd.f32 %v971_v9, %v3189_v52  ;;  %v1013_v6 = vadd.f32 %v1012_v15, %v3191_v54 }
 0x1b3   :  { %v973_v4 = vpop.f32.mrf.mxu0  ;;  %v1014_v16 = vpop.f32.mrf.mxu1 }
 0x1b4   :  { %v1021_v17 = vcombine.low %v970_v14, %v972_v3  ;;  %v1022_v20 = vcombine.low %v1011_v5, %v1013_v6 }
 0x1b5   :  { %v974_v21 = vpop.f32.mrf.mxu0  ;;  %v1015_v24 = vpop.f32.mrf.mxu1 }
 0x1b6   :  { %v3441_v41 = vrot.slane %v1021_v17, %v3200_v62  ;;  %v3444_v0 = vrot.slane %v1022_v20, %v3200_v62 }
 0x1b8   :  { %3834 = vst [vmem:[#allocation10_spill] sm:$0xff] %v3444_v0 }
 0x1cf   :  { %v1077_v2 = vpop.f32.mrf.mxu0  ;;  %v1118_v36 = vpop.f32.mrf.mxu1 }
 0x1d0   :  { %v1078_v9 = vadd.f32 %v1077_v2, %v3180_v49  ;;  %v1119_v15 = vadd.f32 %v1118_v36, %v3182_v50 }
 0x1d1   :  { %v1079_v4 = vpop.f32.mrf.mxu0  ;;  %v1120_v14 = vpop.f32.mrf.mxu1 }
 0x1d2   :  { %v1080_v5 = vadd.f32 %v1079_v4, %v3189_v52  ;;  %v1121_v3 = vadd.f32 %v1120_v14, %v3191_v54 }
 0x1d3   :  { %v1081_v6 = vpop.f32.mrf.mxu0  ;;  %v1122_v16 = vpop.f32.mrf.mxu1 }
 0x1d4   :  { %v1129_v17 = vcombine.low %v1078_v9, %v1080_v5  ;;  %v1130_v20 = vcombine.low %v1119_v15, %v1121_v3 }
 0x1d5   :  { %v1082_v21 = vpop.f32.mrf.mxu0  ;;  %v1123_v24 = vpop.f32.mrf.mxu1 }
 0x1d6   :  { %v3453_v35 = vrot.slane %v1129_v17, %v3200_v62  ;;  %v3456_v0 = vrot.slane %v1130_v20, %v3200_v62  ;;  %v3835_v17 = vcombine.low %v3210_v33, %v3213_v34 }
 0x1ef   :  { %v1347_v50 = vpop.f32.mrf.mxu0  ;;  %v1388_v36 = vpop.f32.mrf.mxu1 }
 0x1f1   :  { %v1349_v52 = vpop.f32.mrf.mxu0  ;;  %v1390_v2 = vpop.f32.mrf.mxu1 }
 0x1f2   :  { %v1399_v54 = vcombine.low %v1347_v50, %v1349_v52  ;;  %v1400_v4 = vcombine.low %v1388_v36, %v1390_v2 }
 0x1f3   :  { %v1351_v14 = vpop.f32.mrf.mxu0  ;;  %v1392_v9 = vpop.f32.mrf.mxu1 }
 0x1f4   :  { %v1407_v15 = vrot.slane %v1399_v54, %v3200_v62  ;;  %v1414_v5 = vrot.slane %v1400_v4, %v3200_v62 }
 0x1f5   :  { %v1352_v3 = vpop.f32.mrf.mxu0  ;;  %v1393_v6 = vpop.f32.mrf.mxu1 }
 0x1f6   :  { %v1415_v16 = vcombine.low %v1407_v15, %v1414_v5  ;;  %v1150_v15 = vld [vmem:[#allocation4] sm:$0x3] }
 0x1f8   :  { %v1417_v20 = vadd.f32 %v1415_v16, %v3835_v17 }
 0x1fa   :  { %v1418_v21 = vmul.f32 0.5, %v1417_v20  ;;  %v1423_v24 = vrot.slane %v1417_v20, 2  ;;  %v1429_v50 = vrot.slane %v1417_v20, 4  ;;  %v1432_v36 = vrot.slane %v1417_v20, 6 }
 0x1fc   :  { %2583 = vtanh.f32 %v1418_v21  ;;  %v1425_v49 = vmul.f32 0.5, %v1423_v24  ;;  %v1434_v52 = vmul.f32 0.5, %v1432_v36 }
 0x1fe   :  { %2585 = vtanh.f32 %v1425_v49 }
 0x1ff   :  { %2587 = vtanh.f32 %v1429_v50  ;;  %v3836_v50 = vmov 0  }
 0x200   :  { %2589 = vtanh.f32 %v1434_v52 }
 0x209   :  { %v2584_v2 = vpop.eup %2583 }
 0x20a   :  { %v1420_v54 = vmul.f32 0.5, %v2584_v2 }
 0x20b   :  { %v2586_v14 = vpop.eup %2585 }
 0x20c   :  { %v1421_v4 = vadd.f32 0.5, %v1420_v54  ;;  %v1427_v9 = vmul.f32 0.5, %v2586_v14  ;;  %v2588_v3 = vpop.eup %2587 }
 0x20d   :  { %v2590_v49 = vpop.eup %2589 }
 0x20e   :  { %v1428_v5 = vadd.f32 0.5, %v1427_v9  ;;  %v1439_v34 = vmul.f32 %v2588_v3, %v1421_v4  ;;  %v1436_v16 = vmul.f32 0.5, %v2590_v49 }
 0x210   :  { %v1438_v33 = vmul.f32 %v1428_v5, %v1150_v15  ;;  %v1437_v17 = vadd.f32 0.5, %v1436_v16  ;;  %v3837_v16 = vcombine.low %v3287_v39, %v3290_v40 }
 0x212   :  { %v3465_v6 = vadd.f32 %v1439_v34, %v1438_v33 }
 0x214   :  { %2591 = vtanh.f32 %v3465_v6 }
 0x221   :  { %v2592_v20 = vpop.eup %2591 }
 0x222   :  { %v1442_v21 = vmul.f32 %v2592_v20, %v1437_v17 }
 0x224   :  { %v1443_v24 = vpack.c.bf16 %v1442_v21, %v1442_v21 }
 0x226   :  { %1444 = vst [vmem:[%s3824_s4] sm:$0x1] %v1443_v24  ;;  %1479 = vmatmul.mubr.bf16.vlgmr.msra.gmra.mxu0 %v1443_v24  ;;  %1520 = vmatmul.mubr.bf16.vlgmr.msra.gmra.mxu1 %v1443_v24 }
 0x227   :  { %1581 = vmatpush1.bf16.msra.mxu0 %v3246_v10  ;;  %1622 = vmatpush1.bf16.msra.mxu1 %v3248_v11 }
 0x228   :  { %1582 = vmatprep.subr.bf16.mxu0 %v3252_v12  ;;  %1623 = vmatprep.subr.bf16.mxu1 %v3254_v13 }
 0x229   :  { %1612 = vmatprep.mubr.bf16.mxu0 %v3836_v50  ;;  %1653 = vmatprep.mubr.bf16.mxu1 %v3836_v50 }
 0x22b   :  { %1583 = vmatpush1.bf16.msra.mxu0 %v3260_v18  ;;  %1624 = vmatpush1.bf16.msra.mxu1 %v3262_v19 }
 0x22c   :  { %1584 = vmatprep.subr.bf16.mxu0 %v3266_v22  ;;  %1625 = vmatprep.subr.bf16.mxu1 %v3268_v23 }
 0x22f   :  { %1585 = vmatpush1.bf16.msra.mxu0 %v3276_v30  ;;  %1626 = vmatpush1.bf16.msra.mxu1 %v3278_v31 }
 0x230   :  { %1586 = vmatprep.subr.bf16.mxu0 %v3282_v37  ;;  %1627 = vmatprep.subr.bf16.mxu1 %v3284_v38 }
 0x233   :  { %1587 = vmatpush1.bf16.msra.mxu0 %v3296_v42  ;;  %1628 = vmatpush1.bf16.msra.mxu1 %v3298_v43 }
 0x234   :  { %1588 = vmatprep.subr.bf16.mxu0 %v3302_v44  ;;  %1629 = vmatprep.subr.bf16.mxu1 %v3304_v45 }
 0x237   :  { %1589 = vmatpush1.bf16.msra.mxu0 %v3308_v46  ;;  %1630 = vmatpush1.bf16.msra.mxu1 %v3310_v47 }
 0x238   :  { %1590 = vmatprep.subr.bf16.mxu0 %v3314_v48  ;;  %1631 = vmatprep.subr.bf16.mxu1 %v3316_v51 }
 0x23b   :  { %1591 = vmatpush1.bf16.msra.mxu0 %v3320_v53  ;;  %1632 = vmatpush1.bf16.msra.mxu1 %v3322_v55 }
 0x23c   :  { %1592 = vmatprep.subr.bf16.mxu0 %v3326_v56  ;;  %1633 = vmatprep.subr.bf16.mxu1 %v3328_v57 }
 0x23f   :  { %1593 = vmatpush1.bf16.msra.mxu0 %v3332_v58  ;;  %1634 = vmatpush1.bf16.msra.mxu1 %v3334_v59 }
 0x240   :  { %1594 = vmatprep.subr.bf16.mxu0 %v3338_v60  ;;  %1635 = vmatprep.subr.bf16.mxu1 %v3340_v61 }
 0x243   :  { %1595 = vmatpush1.bf16.msra.mxu0 %v3344_v63  ;;  %1636 = vmatpush1.bf16.msra.mxu1 %v3346_v1 }
 0x244   :  { %1714 = vmatprep.subr.bf16.mxu0 %v3237_v7  ;;  %1755 = vmatprep.subr.bf16.mxu1 %v3239_v8 }
 0x2e6   :  { %v1480_v36 = vpop.f32.mrf.mxu0  ;;  %v1521_v52 = vpop.f32.mrf.mxu1 }
 0x2e8   :  { %v1482_v2 = vpop.f32.mrf.mxu0  ;;  %v1523_v54 = vpop.f32.mrf.mxu1 }
 0x2e9   :  { %v1532_v14 = vcombine.low %v1480_v36, %v1482_v2  ;;  %v1533_v4 = vcombine.low %v1521_v52, %v1523_v54 }
 0x2ea   :  { %v1484_v9 = vpop.f32.mrf.mxu0  ;;  %v1525_v15 = vpop.f32.mrf.mxu1 }
 0x2eb   :  { %v1540_v5 = vrot.slane %v1532_v14, %v3200_v62  ;;  %v1547_v3 = vrot.slane %v1533_v4, %v3200_v62 }
 0x2ec   :  { %v1485_v33 = vpop.f32.mrf.mxu0  ;;  %v1526_v34 = vpop.f32.mrf.mxu1 }
 0x2ed   :  { %v1548_v49 = vcombine.low %v1540_v5, %v1547_v3 }
 0x2ef   :  { %v1550_v17 = vadd.f32 %v1548_v49, %v3837_v16 }
 0x2f1   :  { %v1551_v20 = vmul.f32 0.5, %v1550_v17  ;;  %v1556_v21 = vrot.slane %v1550_v17, 2  ;;  %v1562_v36 = vrot.slane %v1550_v17, 4  ;;  %v1565_v52 = vrot.slane %v1550_v17, 6 }
 0x2f3   :  { %2593 = vtanh.f32 %v1551_v20  ;;  %v1558_v24 = vmul.f32 0.5, %v1556_v21  ;;  %v1567_v2 = vmul.f32 0.5, %v1565_v52 }
 0x2f5   :  { %2595 = vtanh.f32 %v1558_v24 }
 0x2f6   :  { %2597 = vtanh.f32 %v1562_v36 }
 0x2f7   :  { %2599 = vtanh.f32 %v1567_v2 }
 0x300   :  { %v2594_v54 = vpop.eup %2593 }
 0x301   :  { %v1553_v14 = vmul.f32 0.5, %v2594_v54 }
 0x302   :  { %v2596_v9 = vpop.eup %2595 }
 0x303   :  { %v1554_v4 = vadd.f32 0.5, %v1553_v14  ;;  %v1560_v15 = vmul.f32 0.5, %v2596_v9  ;;  %v2598_v3 = vpop.eup %2597 }
 0x304   :  { %v2600_v34 = vpop.eup %2599 }
 0x305   :  { %v1561_v5 = vadd.f32 0.5, %v1560_v15  ;;  %v1572_v40 = vmul.f32 %v2598_v3, %v1554_v4  ;;  %v1569_v49 = vmul.f32 0.5, %v2600_v34 }
 0x307   :  { %v1571_v39 = vmul.f32 %v1561_v5, %v3465_v6  ;;  %v1570_v16 = vadd.f32 0.5, %v1569_v49 }
 0x309   :  { %v3511_v33 = vadd.f32 %v1572_v40, %v1571_v39  ;;  %v3838_v40 = vcombine.low %v3369_v28, %v3372_v29 }
 0x30b   :  { %2601 = vtanh.f32 %v3511_v33 }
 0x318   :  { %v2602_v17 = vpop.eup %2601 }
 0x319   :  { %v1575_v20 = vmul.f32 %v2602_v17, %v1570_v16 }
 0x31b   :  { %v1576_v21 = vpack.c.bf16 %v1575_v20, %v1575_v20 }
 0x31d   :  { %2474 = vst [vmem:[%s3824_s4 + $0x1] sm:$0x1] %v1576_v21  ;;  %1613 = vmatmul.mubr.bf16.vlgmr.msra.gmra.mxu0 %v1576_v21  ;;  %1654 = vmatmul.mubr.bf16.vlgmr.msra.gmra.mxu1 %v1576_v21 }
 0x31e   :  { %1715 = vmatpush1.bf16.msra.mxu0 %v3246_v10  ;;  %1756 = vmatpush1.bf16.msra.mxu1 %v3248_v11 }
 0x31f   :  { %1716 = vmatprep.subr.bf16.mxu0 %v3252_v12  ;;  %1757 = vmatprep.subr.bf16.mxu1 %v3254_v13 }
 0x320   :  { %1746 = vmatprep.mubr.bf16.mxu0 %v3836_v50  ;;  %1787 = vmatprep.mubr.bf16.mxu1 %v3836_v50 }
 0x322   :  { %1717 = vmatpush1.bf16.msra.mxu0 %v3260_v18  ;;  %1758 = vmatpush1.bf16.msra.mxu1 %v3262_v19 }
 0x323   :  { %1718 = vmatprep.subr.bf16.mxu0 %v3266_v22  ;;  %1759 = vmatprep.subr.bf16.mxu1 %v3268_v23 }
 0x326   :  { %1719 = vmatpush1.bf16.msra.mxu0 %v3276_v30  ;;  %1760 = vmatpush1.bf16.msra.mxu1 %v3278_v31 }
 0x327   :  { %1720 = vmatprep.subr.bf16.mxu0 %v3282_v37  ;;  %1761 = vmatprep.subr.bf16.mxu1 %v3284_v38 }
 0x32a   :  { %1721 = vmatpush1.bf16.msra.mxu0 %v3296_v42  ;;  %1762 = vmatpush1.bf16.msra.mxu1 %v3298_v43 }
 0x32b   :  { %1722 = vmatprep.subr.bf16.mxu0 %v3302_v44  ;;  %1763 = vmatprep.subr.bf16.mxu1 %v3304_v45 }
 0x32e   :  { %1723 = vmatpush1.bf16.msra.mxu0 %v3308_v46  ;;  %1764 = vmatpush1.bf16.msra.mxu1 %v3310_v47 }
 0x32f   :  { %1724 = vmatprep.subr.bf16.mxu0 %v3314_v48  ;;  %1765 = vmatprep.subr.bf16.mxu1 %v3316_v51 }
 0x332   :  { %1725 = vmatpush1.bf16.msra.mxu0 %v3320_v53  ;;  %1766 = vmatpush1.bf16.msra.mxu1 %v3322_v55 }
 0x333   :  { %1726 = vmatprep.subr.bf16.mxu0 %v3326_v56  ;;  %1767 = vmatprep.subr.bf16.mxu1 %v3328_v57 }
 0x336   :  { %1727 = vmatpush1.bf16.msra.mxu0 %v3332_v58  ;;  %1768 = vmatpush1.bf16.msra.mxu1 %v3334_v59 }
 0x337   :  { %1728 = vmatprep.subr.bf16.mxu0 %v3338_v60  ;;  %1769 = vmatprep.subr.bf16.mxu1 %v3340_v61 }
 0x33a   :  { %1729 = vmatpush1.bf16.msra.mxu0 %v3344_v63  ;;  %1770 = vmatpush1.bf16.msra.mxu1 %v3346_v1 }
 0x33b   :  { %1848 = vmatprep.subr.bf16.mxu0 %v3237_v7  ;;  %1889 = vmatprep.subr.bf16.mxu1 %v3239_v8 }
 0x3dd   :  { %v1614_v6 = vpop.f32.mrf.mxu0  ;;  %v1655_v24 = vpop.f32.mrf.mxu1 }
 0x3df   :  { %v1616_v36 = vpop.f32.mrf.mxu0  ;;  %v1657_v52 = vpop.f32.mrf.mxu1 }
 0x3e0   :  { %v1666_v2 = vcombine.low %v1614_v6, %v1616_v36  ;;  %v1667_v54 = vcombine.low %v1655_v24, %v1657_v52 }
 0x3e1   :  { %v1618_v14 = vpop.f32.mrf.mxu0  ;;  %v1659_v9 = vpop.f32.mrf.mxu1 }
 0x3e2   :  { %v1674_v4 = vrot.slane %v1666_v2, %v3200_v62  ;;  %v1681_v15 = vrot.slane %v1667_v54, %v3200_v62 }
 0x3e3   :  { %v1619_v5 = vpop.f32.mrf.mxu0  ;;  %v1660_v3 = vpop.f32.mrf.mxu1 }
 0x3e4   :  { %v1682_v39 = vcombine.low %v1674_v4, %v1681_v15 }
 0x3e6   :  { %v1684_v34 = vadd.f32 %v1682_v39, %v3838_v40 }
 0x3e8   :  { %v1685_v49 = vmul.f32 0.5, %v1684_v34  ;;  %v1690_v16 = vrot.slane %v1684_v34, 2  ;;  %v1696_v20 = vrot.slane %v1684_v34, 4  ;;  %v1699_v21 = vrot.slane %v1684_v34, 6 }
 0x3ea   :  { %2603 = vtanh.f32 %v1685_v49  ;;  %v1692_v17 = vmul.f32 0.5, %v1690_v16  ;;  %v1701_v6 = vmul.f32 0.5, %v1699_v21 }
 0x3ec   :  { %2605 = vtanh.f32 %v1692_v17 }
 0x3ed   :  { %2607 = vtanh.f32 %v1696_v20 }
 0x3ee   :  { %2609 = vtanh.f32 %v1701_v6 }
 0x3f7   :  { %v2604_v24 = vpop.eup %2603 }
 0x3f8   :  { %v1687_v36 = vmul.f32 0.5, %v2604_v24 }
 0x3f9   :  { %v2606_v52 = vpop.eup %2605 }
 0x3fa   :  { %v1688_v2 = vadd.f32 0.5, %v1687_v36  ;;  %v1694_v54 = vmul.f32 0.5, %v2606_v52  ;;  %v2608_v9 = vpop.eup %2607 }
 0x3fb   :  { %v2610_v15 = vpop.eup %2609 }
 0x3fc   :  { %v1695_v14 = vadd.f32 0.5, %v1694_v54  ;;  %v1706_v29 = vmul.f32 %v2608_v9, %v1688_v2  ;;  %v1703_v5 = vmul.f32 0.5, %v2610_v15 }
 0x3fe   :  { %v1705_v28 = vmul.f32 %v1695_v14, %v3511_v33  ;;  %v1704_v3 = vadd.f32 0.5, %v1703_v5 }
 0x400   :  { %v3557_v4 = vadd.f32 %v1706_v29, %v1705_v28 }
 0x402   :  { %2611 = vtanh.f32 %v3557_v4 }
 0x40f   :  { %v2612_v39 = vpop.eup %2611 }
 0x410   :  { %v1709_v40 = vmul.f32 %v2612_v39, %v1704_v3 }
 0x412   :  { %v1710_v34 = vpack.c.bf16 %v1709_v40, %v1709_v40 }
 0x414   :  { %2475 = vst [vmem:[%s3824_s4 + $0x2] sm:$0x1] %v1710_v34  ;;  %1747 = vmatmul.mubr.bf16.vlgmr.msra.gmra.mxu0 %v1710_v34  ;;  %1788 = vmatmul.mubr.bf16.vlgmr.msra.gmra.mxu1 %v1710_v34 }
 0x415   :  { %1849 = vmatpush1.bf16.msra.mxu0 %v3246_v10  ;;  %1890 = vmatpush1.bf16.msra.mxu1 %v3248_v11 }
 0x416   :  { %1850 = vmatprep.subr.bf16.mxu0 %v3252_v12  ;;  %1891 = vmatprep.subr.bf16.mxu1 %v3254_v13 }
 0x417   :  { %1880 = vmatprep.mubr.bf16.mxu0 %v3836_v50  ;;  %1921 = vmatprep.mubr.bf16.mxu1 %v3836_v50 }
 0x419   :  { %1851 = vmatpush1.bf16.msra.mxu0 %v3260_v18  ;;  %1892 = vmatpush1.bf16.msra.mxu1 %v3262_v19 }
 0x41a   :  { %1852 = vmatprep.subr.bf16.mxu0 %v3266_v22  ;;  %1893 = vmatprep.subr.bf16.mxu1 %v3268_v23 }
 0x41d   :  { %1853 = vmatpush1.bf16.msra.mxu0 %v3276_v30  ;;  %1894 = vmatpush1.bf16.msra.mxu1 %v3278_v31 }
 0x41e   :  { %1854 = vmatprep.subr.bf16.mxu0 %v3282_v37  ;;  %1895 = vmatprep.subr.bf16.mxu1 %v3284_v38 }
 0x421   :  { %1855 = vmatpush1.bf16.msra.mxu0 %v3296_v42  ;;  %1896 = vmatpush1.bf16.msra.mxu1 %v3298_v43 }
 0x422   :  { %1856 = vmatprep.subr.bf16.mxu0 %v3302_v44  ;;  %1897 = vmatprep.subr.bf16.mxu1 %v3304_v45 }
 0x425   :  { %1857 = vmatpush1.bf16.msra.mxu0 %v3308_v46  ;;  %1898 = vmatpush1.bf16.msra.mxu1 %v3310_v47 }
 0x426   :  { %1858 = vmatprep.subr.bf16.mxu0 %v3314_v48  ;;  %1899 = vmatprep.subr.bf16.mxu1 %v3316_v51 }
 0x429   :  { %1859 = vmatpush1.bf16.msra.mxu0 %v3320_v53  ;;  %1900 = vmatpush1.bf16.msra.mxu1 %v3322_v55 }
 0x42a   :  { %1860 = vmatprep.subr.bf16.mxu0 %v3326_v56  ;;  %1901 = vmatprep.subr.bf16.mxu1 %v3328_v57 }
 0x42d   :  { %1861 = vmatpush1.bf16.msra.mxu0 %v3332_v58  ;;  %1902 = vmatpush1.bf16.msra.mxu1 %v3334_v59 }
 0x42e   :  { %1862 = vmatprep.subr.bf16.mxu0 %v3338_v60  ;;  %1903 = vmatprep.subr.bf16.mxu1 %v3340_v61 }
 0x431   :  { %1863 = vmatpush1.bf16.msra.mxu0 %v3344_v63  ;;  %1904 = vmatpush1.bf16.msra.mxu1 %v3346_v1 }
 0x432   :  { %1982 = vmatprep.subr.bf16.mxu0 %v3237_v7  ;;  %2023 = vmatprep.subr.bf16.mxu1 %v3239_v8  ;;  %v3839_v7 = vcombine.low %v3405_v25, %v3408_v26 }
 0x4d4   :  { %v1748_v33 = vpop.f32.mrf.mxu0  ;;  %v1789_v49 = vpop.f32.mrf.mxu1 }
 0x4d6   :  { %v1750_v16 = vpop.f32.mrf.mxu0  ;;  %v1791_v17 = vpop.f32.mrf.mxu1 }
 0x4d7   :  { %v1800_v20 = vcombine.low %v1748_v33, %v1750_v16  ;;  %v1801_v21 = vcombine.low %v1789_v49, %v1791_v17 }
 0x4d8   :  { %v1752_v6 = vpop.f32.mrf.mxu0  ;;  %v1793_v24 = vpop.f32.mrf.mxu1 }
 0x4d9   :  { %v1808_v36 = vrot.slane %v1800_v20, %v3200_v62  ;;  %v1815_v52 = vrot.slane %v1801_v21, %v3200_v62 }
 0x4da   :  { %v1753_v2 = vpop.f32.mrf.mxu0  ;;  %v1794_v54 = vpop.f32.mrf.mxu1 }
 0x4db   :  { %v1816_v14 = vcombine.low %v1808_v36, %v1815_v52 }
 0x4dd   :  { %v1818_v9 = vadd.f32 %v1816_v14, %v3839_v7 }
 0x4df   :  { %v1819_v8 = vmul.f32 0.5, %v1818_v9  ;;  %v1824_v28 = vrot.slane %v1818_v9, 2  ;;  %v1830_v15 = vrot.slane %v1818_v9, 4  ;;  %v1833_v5 = vrot.slane %v1818_v9, 6 }
 0x4e1   :  { %2613 = vtanh.f32 %v1819_v8  ;;  %v1826_v29 = vmul.f32 0.5, %v1824_v28  ;;  %v1835_v3 = vmul.f32 0.5, %v1833_v5  ;;  %v3665_v5 = vld [vmem:[#allocation5 + $0xc4] ss:$16 sps:$4 sm:$0xff]  }
 0x4e3   :  { %2615 = vtanh.f32 %v1826_v29  ;;  %v3659_v29 = vld [vmem:[#allocation5 + $0xe0] ss:$16 sps:$4 sm:$0xff]  }
 0x4e4   :  { %2617 = vtanh.f32 %v1830_v15  ;;  %v3662_v15 = vld [vmem:[#allocation5 + $0xe8] ss:$16 sps:$4 sm:$0xff]  }
 0x4e5   :  { %2619 = vtanh.f32 %v1835_v3  ;;  %v3668_v3 = vld [vmem:[#allocation5 + $0xcc] ss:$16 sps:$4 sm:$0xff]  }
 0x4ee   :  { %v2614_v39 = vpop.eup %2613 }
 0x4ef   :  { %v1821_v40 = vmul.f32 0.5, %v2614_v39  ;;  %v3673_v39 = vld [vmem:[#allocation5 + $0xc0] ss:$16 sps:$4 sm:$0xff]  }
 0x4f0   :  { %v2616_v34 = vpop.eup %2615 }
 0x4f1   :  { %v1822_v33 = vadd.f32 0.5, %v1821_v40  ;;  %v1828_v49 = vmul.f32 0.5, %v2616_v34  ;;  %v2618_v17 = vpop.eup %2617  ;;  %v3676_v40 = vld [vmem:[#allocation5 + $0xc8] ss:$16 sps:$4 sm:$0xff]   ;;  %v3679_v34 = vld [vmem:[#allocation5 + $0xa4] ss:$16 sps:$4 sm:$0xff]  }
 0x4f2   :  { %v2620_v21 = vpop.eup %2619 }
 0x4f3   :  { %v1829_v16 = vadd.f32 0.5, %v1828_v49  ;;  %v1840_v26 = vmul.f32 %v2618_v17, %v1822_v33  ;;  %v1837_v6 = vmul.f32 0.5, %v2620_v21  ;;  %v3682_v33 = vld [vmem:[#allocation5 + $0xac] ss:$16 sps:$4 sm:$0xff]   ;;  %v3685_v49 = vld [vmem:[#allocation5 + $0xa0] ss:$16 sps:$4 sm:$0xff]  }
 0x4f4   :  { %v3691_v17 = vld [vmem:[#allocation5 + $0x84] ss:$16 sps:$4 sm:$0xff]  }
 0x4f5   :  { %v1839_v25 = vmul.f32 %v1829_v16, %v3557_v4  ;;  %v1838_v24 = vadd.f32 0.5, %v1837_v6  ;;  %v3688_v16 = vld [vmem:[#allocation5 + $0xa8] ss:$16 sps:$4 sm:$0xff]   ;;  %v3703_v21 = vld [vmem:[#allocation5 + $0x64] ss:$16 sps:$4 sm:$0xff]  }
 0x4f6   :  { %v3706_v6 = vld [vmem:[#allocation5 + $0x6c] ss:$16 sps:$4 sm:$0xff]  }
 0x4f7   :  { %v3603_v20 = vadd.f32 %v1840_v26, %v1839_v25  ;;  %v3694_v25 = vld [vmem:[#allocation5 + $0x8c] ss:$16 sps:$4 sm:$0xff]   ;;  %v3697_v26 = vld [vmem:[#allocation5 + $0x80] ss:$16 sps:$4 sm:$0xff]  }
 0x4f9   :  { %2621 = vtanh.f32 %v3603_v20 }
 0x506   :  { %v2622_v36 = vpop.eup %2621 }
 0x507   :  { %v1843_v52 = vmul.f32 %v2622_v36, %v1838_v24  ;;  %v3709_v24 = vld [vmem:[#allocation5 + $0x60] ss:$16 sps:$4 sm:$0xff]   ;;  %v3712_v36 = vld [vmem:[#allocation5 + $0x68] ss:$16 sps:$4 sm:$0xff]  }
 0x509   :  { %v1844_v2 = vpack.c.bf16 %v1843_v52, %v1843_v52  ;;  %v3715_v52 = vld [vmem:[#allocation5 + $0x44] ss:$16 sps:$4 sm:$0xff]  }
 0x50b   :  { %2476 = vst [vmem:[%s3824_s4 + $0x3] sm:$0x1] %v1844_v2  ;;  %1881 = vmatmul.mubr.bf16.vlgmr.msra.gmra.mxu0 %v1844_v2  ;;  %1922 = vmatmul.mubr.bf16.vlgmr.msra.gmra.mxu1 %v1844_v2  ;;  %v3718_v2 = vld [vmem:[#allocation5 + $0x4c] ss:$16 sps:$4 sm:$0xff]  }
 0x50c   :  { %1983 = vmatpush1.bf16.msra.mxu0 %v3246_v10  ;;  %2024 = vmatpush1.bf16.msra.mxu1 %v3248_v11  ;;  %v3641_v10 = vld [vmem:[#allocation5 + $0xe4] ss:$16 sps:$4 sm:$0xff]   ;;  %v3644_v11 = vld [vmem:[#allocation5 + $0xec] ss:$16 sps:$4 sm:$0xff]  }
 0x50d   :  { %1984 = vmatprep.subr.bf16.mxu0 %v3252_v12  ;;  %2025 = vmatprep.subr.bf16.mxu1 %v3254_v13 }
 0x50e   :  { %2014 = vmatprep.mubr.bf16.mxu0 %v3836_v50  ;;  %2055 = vmatprep.mubr.bf16.mxu1 %v3836_v50 }
 0x510   :  { %1985 = vmatpush1.bf16.msra.mxu0 %v3260_v18  ;;  %2026 = vmatpush1.bf16.msra.mxu1 %v3262_v19 }
 0x511   :  { %1986 = vmatprep.subr.bf16.mxu0 %v3266_v22  ;;  %2027 = vmatprep.subr.bf16.mxu1 %v3268_v23 }
 0x514   :  { %1987 = vmatpush1.bf16.msra.mxu0 %v3276_v30  ;;  %2028 = vmatpush1.bf16.msra.mxu1 %v3278_v31 }
 0x515   :  { %1988 = vmatprep.subr.bf16.mxu0 %v3282_v37  ;;  %2029 = vmatprep.subr.bf16.mxu1 %v3284_v38 }
 0x518   :  { %1989 = vmatpush1.bf16.msra.mxu0 %v3296_v42  ;;  %2030 = vmatpush1.bf16.msra.mxu1 %v3298_v43 }
 0x519   :  { %1990 = vmatprep.subr.bf16.mxu0 %v3302_v44  ;;  %2031 = vmatprep.subr.bf16.mxu1 %v3304_v45  ;;  %v3840_v45 = vcombine.low %v3417_v27, %v3420_v32 }
 0x51c   :  { %1991 = vmatpush1.bf16.msra.mxu0 %v3308_v46  ;;  %2032 = vmatpush1.bf16.msra.mxu1 %v3310_v47 }
 0x51d   :  { %1992 = vmatprep.subr.bf16.mxu0 %v3314_v48  ;;  %2033 = vmatprep.subr.bf16.mxu1 %v3316_v51 }
 0x520   :  { %1993 = vmatpush1.bf16.msra.mxu0 %v3320_v53  ;;  %2034 = vmatpush1.bf16.msra.mxu1 %v3322_v55 }
 0x521   :  { %1994 = vmatprep.subr.bf16.mxu0 %v3326_v56  ;;  %2035 = vmatprep.subr.bf16.mxu1 %v3328_v57 }
 0x524   :  { %1995 = vmatpush1.bf16.msra.mxu0 %v3332_v58  ;;  %2036 = vmatpush1.bf16.msra.mxu1 %v3334_v59 }
 0x525   :  { %1996 = vmatprep.subr.bf16.mxu0 %v3338_v60  ;;  %2037 = vmatprep.subr.bf16.mxu1 %v3340_v61 }
 0x528   :  { %1997 = vmatpush1.bf16.msra.mxu0 %v3344_v63  ;;  %2038 = vmatpush1.bf16.msra.mxu1 %v3346_v1 }
 0x529   :  { %2116 = vmatprep.subr.bf16.mxu0 %v3641_v10  ;;  %2157 = vmatprep.subr.bf16.mxu1 %v3644_v11 }
 0x5cb   :  { %v1882_v12 = vpop.f32.mrf.mxu0  ;;  %v1923_v13 = vpop.f32.mrf.mxu1 }
 0x5cd   :  { %v1884_v18 = vpop.f32.mrf.mxu0  ;;  %v1925_v19 = vpop.f32.mrf.mxu1 }
 0x5ce   :  { %v1934_v22 = vcombine.low %v1882_v12, %v1884_v18  ;;  %v1935_v23 = vcombine.low %v1923_v13, %v1925_v19  ;;  %v3721_v12 = vld [vmem:[#allocation5 + $0x40] ss:$16 sps:$4 sm:$0xff]   ;;  %v3724_v13 = vld [vmem:[#allocation5 + $0x48] ss:$16 sps:$4 sm:$0xff]   ;;  %v3727_v18 = vld [vmem:[#allocation5 + $0x24] ss:$16 sps:$4 sm:$0xff]  }
 0x5cf   :  { %v1886_v30 = vpop.f32.mrf.mxu0  ;;  %v1927_v31 = vpop.f32.mrf.mxu1  ;;  %v3730_v19 = vld [vmem:[#allocation5 + $0x2c] ss:$16 sps:$4 sm:$0xff]  }
 0x5d0   :  { %v1942_v37 = vrot.slane %v1934_v22, %v3200_v62  ;;  %v1949_v38 = vrot.slane %v1935_v23, %v3200_v62  ;;  %v3733_v22 = vld [vmem:[#allocation5 + $0x20] ss:$16 sps:$4 sm:$0xff]   ;;  %v3736_v23 = vld [vmem:[#allocation5 + $0x28] ss:$16 sps:$4 sm:$0xff]   ;;  %v3739_v30 = vld [vmem:[#allocation5 + $0x4] ss:$16 sps:$4 sm:$0xff]  }
 0x5d1   :  { %v1887_v42 = vpop.f32.mrf.mxu0  ;;  %v1928_v43 = vpop.f32.mrf.mxu1  ;;  %v3742_v31 = vld [vmem:[#allocation5 + $0xc] ss:$16 sps:$4 sm:$0xff]  }
 0x5d2   :  { %v1950_v44 = vcombine.low %v1942_v37, %v1949_v38  ;;  %v3745_v37 = vld [vmem:[#allocation5] ss:$16 sps:$4 sm:$0xff]   ;;  %v3748_v38 = vld [vmem:[#allocation5 + $0x8] ss:$16 sps:$4 sm:$0xff]  }
 0x5d4   :  { %v1952_v46 = vadd.f32 %v1950_v44, %v3840_v45 }
 0x5d6   :  { %v1953_v47 = vmul.f32 0.5, %v1952_v46  ;;  %v1958_v48 = vrot.slane %v1952_v46, 2  ;;  %v1964_v53 = vrot.slane %v1952_v46, 4  ;;  %v1967_v55 = vrot.slane %v1952_v46, 6 }
 0x5d8   :  { %2623 = vtanh.f32 %v1953_v47  ;;  %v1960_v51 = vmul.f32 0.5, %v1958_v48  ;;  %v1969_v56 = vmul.f32 0.5, %v1967_v55 }
 0x5da   :  { %2625 = vtanh.f32 %v1960_v51 }
 0x5db   :  { %2627 = vtanh.f32 %v1964_v53 }
 0x5dc   :  { %2629 = vtanh.f32 %v1969_v56 }
 0x5e5   :  { %v2624_v57 = vpop.eup %2623 }
 0x5e6   :  { %v1955_v58 = vmul.f32 0.5, %v2624_v57 }
 0x5e7   :  { %v2626_v59 = vpop.eup %2625 }
 0x5e8   :  { %v1956_v60 = vadd.f32 0.5, %v1955_v58  ;;  %v1962_v61 = vmul.f32 0.5, %v2626_v59  ;;  %v2628_v1 = vpop.eup %2627  ;;  %v3841_v59 = vld [vmem:[#allocation8_spill] sm:$0xff] }
 0x5e9   :  { %v2630_v54 = vpop.eup %2629 }
 0x5ea   :  { %v1963_v63 = vadd.f32 0.5, %v1962_v61  ;;  %v1974_v27 = vmul.f32 %v2628_v1, %v1956_v60  ;;  %v1971_v14 = vmul.f32 0.5, %v2630_v54  ;;  %v3842_v60 = vld [vmem:[#allocation9_spill] sm:$0xff] }
 0x5ec   :  { %v1973_v32 = vmul.f32 %v1963_v63, %v3603_v20  ;;  %v1972_v7 = vadd.f32 0.5, %v1971_v14  ;;  %v3700_v20 = vld [vmem:[#allocation5 + $0x88] ss:$16 sps:$4 sm:$0xff]  }
 0x5ee   :  { %v3653_v4 = vadd.f32 %v1974_v27, %v1973_v32 }
 0x5f0   :  { %2631 = vtanh.f32 %v3653_v4 }
 0x5fd   :  { %v2632_v9 = vpop.eup %2631 }
 0x5fe   :  { %v1977_v8 = vmul.f32 %v2632_v9, %v1972_v7 }
 0x600   :  { %v1978_v28 = vpack.c.bf16 %v1977_v8, %v1977_v8 }
 0x602   :  { %2477 = vst [vmem:[%s3824_s4 + $0x4] sm:$0x1] %v1978_v28  ;;  %2015 = vmatmul.mubr.bf16.vlgmr.msra.gmra.mxu0 %v1978_v28  ;;  %2056 = vmatmul.mubr.bf16.vlgmr.msra.gmra.mxu1 %v1978_v28 }
 0x603   :  { %2117 = vmatpush1.bf16.msra.mxu0 %v3659_v29  ;;  %2158 = vmatpush1.bf16.msra.mxu1 %v3662_v15 }
 0x604   :  { %2118 = vmatprep.subr.bf16.mxu0 %v3665_v5  ;;  %2159 = vmatprep.subr.bf16.mxu1 %v3668_v3 }
 0x605   :  { %2148 = vmatprep.mubr.bf16.mxu0 %v3836_v50  ;;  %2189 = vmatprep.mubr.bf16.mxu1 %v3836_v50 }
 0x607   :  { %2119 = vmatpush1.bf16.msra.mxu0 %v3673_v39  ;;  %2160 = vmatpush1.bf16.msra.mxu1 %v3676_v40 }
 0x608   :  { %2120 = vmatprep.subr.bf16.mxu0 %v3679_v34  ;;  %2161 = vmatprep.subr.bf16.mxu1 %v3682_v33 }
 0x60b   :  { %2121 = vmatpush1.bf16.msra.mxu0 %v3685_v49  ;;  %2162 = vmatpush1.bf16.msra.mxu1 %v3688_v16 }
 0x60c   :  { %2122 = vmatprep.subr.bf16.mxu0 %v3691_v17  ;;  %2163 = vmatprep.subr.bf16.mxu1 %v3694_v25 }
 0x60f   :  { %2123 = vmatpush1.bf16.msra.mxu0 %v3697_v26  ;;  %2164 = vmatpush1.bf16.msra.mxu1 %v3700_v20 }
 0x610   :  { %2124 = vmatprep.subr.bf16.mxu0 %v3703_v21  ;;  %2165 = vmatprep.subr.bf16.mxu1 %v3706_v6 }
 0x613   :  { %2125 = vmatpush1.bf16.msra.mxu0 %v3709_v24  ;;  %2166 = vmatpush1.bf16.msra.mxu1 %v3712_v36 }
 0x614   :  { %2126 = vmatprep.subr.bf16.mxu0 %v3715_v52  ;;  %2167 = vmatprep.subr.bf16.mxu1 %v3718_v2 }
 0x617   :  { %2127 = vmatpush1.bf16.msra.mxu0 %v3721_v12  ;;  %2168 = vmatpush1.bf16.msra.mxu1 %v3724_v13 }
 0x618   :  { %2128 = vmatprep.subr.bf16.mxu0 %v3727_v18  ;;  %2169 = vmatprep.subr.bf16.mxu1 %v3730_v19 }
 0x61b   :  { %2129 = vmatpush1.bf16.msra.mxu0 %v3733_v22  ;;  %2170 = vmatpush1.bf16.msra.mxu1 %v3736_v23 }
 0x61c   :  { %2130 = vmatprep.subr.bf16.mxu0 %v3739_v30  ;;  %2171 = vmatprep.subr.bf16.mxu1 %v3742_v31 }
 0x61f   :  { %2131 = vmatpush1.bf16.msra.mxu0 %v3745_v37  ;;  %2172 = vmatpush1.bf16.msra.mxu1 %v3748_v38 }
 0x620   :  { %2250 = vmatprep.subr.bf16.mxu0 %v3641_v10  ;;  %2291 = vmatprep.subr.bf16.mxu1 %v3644_v11  ;;  %v3843_v10 = vcombine.low %v3841_v59, %v3842_v60 }
 0x6c2   :  { %v2016_v42 = vpop.f32.mrf.mxu0  ;;  %v2057_v43 = vpop.f32.mrf.mxu1 }
 0x6c4   :  { %v2018_v44 = vpop.f32.mrf.mxu0  ;;  %v2059_v45 = vpop.f32.mrf.mxu1 }
 0x6c5   :  { %v2068_v46 = vcombine.low %v2016_v42, %v2018_v44  ;;  %v2069_v47 = vcombine.low %v2057_v43, %v2059_v45 }
 0x6c6   :  { %v2020_v48 = vpop.f32.mrf.mxu0  ;;  %v2061_v51 = vpop.f32.mrf.mxu1 }
 0x6c7   :  { %v2076_v53 = vrot.slane %v2068_v46, %v3200_v62  ;;  %v2083_v55 = vrot.slane %v2069_v47, %v3200_v62 }
 0x6c8   :  { %v2021_v56 = vpop.f32.mrf.mxu0  ;;  %v2062_v57 = vpop.f32.mrf.mxu1 }
 0x6c9   :  { %v2084_v58 = vcombine.low %v2076_v53, %v2083_v55 }
 0x6cb   :  { %v2086_v61 = vadd.f32 %v2084_v58, %v3843_v10 }
 0x6cd   :  { %v2087_v11 = vmul.f32 0.5, %v2086_v61  ;;  %v2092_v63 = vrot.slane %v2086_v61, 2  ;;  %v2098_v32 = vrot.slane %v2086_v61, 4  ;;  %v2101_v27 = vrot.slane %v2086_v61, 6 }
 0x6cf   :  { %2633 = vtanh.f32 %v2087_v11  ;;  %v2094_v1 = vmul.f32 0.5, %v2092_v63  ;;  %v2103_v54 = vmul.f32 0.5, %v2101_v27 }
 0x6d1   :  { %2635 = vtanh.f32 %v2094_v1 }
 0x6d2   :  { %2637 = vtanh.f32 %v2098_v32 }
 0x6d3   :  { %2639 = vtanh.f32 %v2103_v54 }
 0x6dc   :  { %v2634_v14 = vpop.eup %2633 }
 0x6dd   :  { %v2089_v7 = vmul.f32 0.5, %v2634_v14 }
 0x6de   :  { %v2636_v9 = vpop.eup %2635 }
 0x6df   :  { %v2090_v8 = vadd.f32 0.5, %v2089_v7  ;;  %v2096_v28 = vmul.f32 0.5, %v2636_v9  ;;  %v2638_v43 = vpop.eup %2637 }
 0x6e0   :  { %v2640_v47 = vpop.eup %2639 }
 0x6e1   :  { %v2097_v42 = vadd.f32 0.5, %v2096_v28  ;;  %v2108_v45 = vmul.f32 %v2638_v43, %v2090_v8  ;;  %v2105_v48 = vmul.f32 0.5, %v2640_v47  ;;  %v3846_v43 = vcombine.low %v3453_v35, %v3456_v0 }
 0x6e3   :  { %v2107_v44 = vmul.f32 %v2097_v42, %v3653_v4  ;;  %v2106_v51 = vadd.f32 0.5, %v2105_v48 }
 0x6e5   :  { %v3759_v46 = vadd.f32 %v2108_v45, %v2107_v44 }
 0x6e7   :  { %2641 = vtanh.f32 %v3759_v46 }
 0x6f4   :  { %v2642_v53 = vpop.eup %2641 }
 0x6f5   :  { %v2111_v55 = vmul.f32 %v2642_v53, %v2106_v51 }
 0x6f7   :  { %v2112_v56 = vpack.c.bf16 %v2111_v55, %v2111_v55 }
 0x6f9   :  { %2478 = vst [vmem:[%s3824_s4 + $0x5] sm:$0x1] %v2112_v56  ;;  %2149 = vmatmul.mubr.bf16.vlgmr.msra.gmra.mxu0 %v2112_v56  ;;  %2190 = vmatmul.mubr.bf16.vlgmr.msra.gmra.mxu1 %v2112_v56 }
 0x6fa   :  { %2251 = vmatpush1.bf16.msra.mxu0 %v3659_v29  ;;  %2292 = vmatpush1.bf16.msra.mxu1 %v3662_v15 }
 0x6fb   :  { %2252 = vmatprep.subr.bf16.mxu0 %v3665_v5  ;;  %2293 = vmatprep.subr.bf16.mxu1 %v3668_v3 }
 0x6fc   :  { %2282 = vmatprep.mubr.bf16.mxu0 %v3836_v50  ;;  %2323 = vmatprep.mubr.bf16.mxu1 %v3836_v50 }
 0x6fe   :  { %2253 = vmatpush1.bf16.msra.mxu0 %v3673_v39  ;;  %2294 = vmatpush1.bf16.msra.mxu1 %v3676_v40 }
 0x6ff   :  { %2254 = vmatprep.subr.bf16.mxu0 %v3679_v34  ;;  %2295 = vmatprep.subr.bf16.mxu1 %v3682_v33 }
 0x702   :  { %2255 = vmatpush1.bf16.msra.mxu0 %v3685_v49  ;;  %2296 = vmatpush1.bf16.msra.mxu1 %v3688_v16 }
 0x703   :  { %2256 = vmatprep.subr.bf16.mxu0 %v3691_v17  ;;  %2297 = vmatprep.subr.bf16.mxu1 %v3694_v25  ;;  %v3844_v25 = vld [vmem:[#allocation10_spill] sm:$0xff] }
 0x706   :  { %2257 = vmatpush1.bf16.msra.mxu0 %v3697_v26  ;;  %2298 = vmatpush1.bf16.msra.mxu1 %v3700_v20  ;;  %v3845_v26 = vcombine.low %v3441_v41, %v3844_v25 }
 0x707   :  { %2258 = vmatprep.subr.bf16.mxu0 %v3703_v21  ;;  %2299 = vmatprep.subr.bf16.mxu1 %v3706_v6 }
 0x70a   :  { %2259 = vmatpush1.bf16.msra.mxu0 %v3709_v24  ;;  %2300 = vmatpush1.bf16.msra.mxu1 %v3712_v36 }
 0x70b   :  { %2260 = vmatprep.subr.bf16.mxu0 %v3715_v52  ;;  %2301 = vmatprep.subr.bf16.mxu1 %v3718_v2 }
 0x70e   :  { %2261 = vmatpush1.bf16.msra.mxu0 %v3721_v12  ;;  %2302 = vmatpush1.bf16.msra.mxu1 %v3724_v13 }
 0x70f   :  { %2262 = vmatprep.subr.bf16.mxu0 %v3727_v18  ;;  %2303 = vmatprep.subr.bf16.mxu1 %v3730_v19 }
 0x712   :  { %2263 = vmatpush1.bf16.msra.mxu0 %v3733_v22  ;;  %2304 = vmatpush1.bf16.msra.mxu1 %v3736_v23 }
 0x713   :  { %2264 = vmatprep.subr.bf16.mxu0 %v3739_v30  ;;  %2305 = vmatprep.subr.bf16.mxu1 %v3742_v31 }
 0x716   :  { %2265 = vmatpush1.bf16.msra.mxu0 %v3745_v37  ;;  %2306 = vmatpush1.bf16.msra.mxu1 %v3748_v38 }
 0x7b9   :  { %v2150_v50 = vpop.f32.mrf.mxu0  ;;  %v2191_v4 = vpop.f32.mrf.mxu1 }
 0x7bb   :  { %v2152_v29 = vpop.f32.mrf.mxu0  ;;  %v2193_v15 = vpop.f32.mrf.mxu1 }
 0x7bc   :  { %v2202_v5 = vcombine.low %v2150_v50, %v2152_v29  ;;  %v2203_v3 = vcombine.low %v2191_v4, %v2193_v15 }
 0x7bd   :  { %v2154_v39 = vpop.f32.mrf.mxu0  ;;  %v2195_v40 = vpop.f32.mrf.mxu1 }
 0x7be   :  { %v2210_v34 = vrot.slane %v2202_v5, %v3200_v62  ;;  %v2217_v33 = vrot.slane %v2203_v3, %v3200_v62 }
 0x7bf   :  { %v2155_v49 = vpop.f32.mrf.mxu0  ;;  %v2196_v16 = vpop.f32.mrf.mxu1 }
 0x7c0   :  { %v2218_v17 = vcombine.low %v2210_v34, %v2217_v33 }
 0x7c2   :  { %v2220_v20 = vadd.f32 %v2218_v17, %v3845_v26 }
 0x7c4   :  { %v2221_v21 = vmul.f32 0.5, %v2220_v20  ;;  %v2226_v6 = vrot.slane %v2220_v20, 2  ;;  %v2232_v36 = vrot.slane %v2220_v20, 4  ;;  %v2235_v52 = vrot.slane %v2220_v20, 6 }
 0x7c6   :  { %2643 = vtanh.f32 %v2221_v21  ;;  %v2228_v24 = vmul.f32 0.5, %v2226_v6  ;;  %v2237_v2 = vmul.f32 0.5, %v2235_v52 }
 0x7c8   :  { %2645 = vtanh.f32 %v2228_v24 }
 0x7c9   :  { %2647 = vtanh.f32 %v2232_v36 }
 0x7ca   :  { %2649 = vtanh.f32 %v2237_v2 }
 0x7d3   :  { %v2644_v12 = vpop.eup %2643 }
 0x7d4   :  { %v2223_v13 = vmul.f32 0.5, %v2644_v12 }
 0x7d5   :  { %v2646_v18 = vpop.eup %2645 }
 0x7d6   :  { %v2224_v19 = vadd.f32 0.5, %v2223_v13  ;;  %v2230_v22 = vmul.f32 0.5, %v2646_v18  ;;  %v2648_v30 = vpop.eup %2647 }
 0x7d7   :  { %v2650_v38 = vpop.eup %2649 }
 0x7d8   :  { %v2231_v23 = vadd.f32 0.5, %v2230_v22  ;;  %v2242_v31 = vmul.f32 %v2648_v30, %v2224_v19  ;;  %v2239_v57 = vmul.f32 0.5, %v2650_v38 }
 0x7da   :  { %v2241_v41 = vmul.f32 %v2231_v23, %v3759_v46  ;;  %v2240_v58 = vadd.f32 0.5, %v2239_v57 }
 0x7dc   :  { %v2243_v37 = vadd.f32 %v2242_v31, %v2241_v41 }
 0x7de   :  { %2651 = vtanh.f32 %v2243_v37 }
 0x7eb   :  { %v2652_v59 = vpop.eup %2651 }
 0x7ec   :  { %v2245_v60 = vmul.f32 %v2652_v59, %v2240_v58 }
 0x7ee   :  { %v2246_v10 = vpack.c.bf16 %v2245_v60, %v2245_v60 }
 0x7f0   :  { %2479 = vst [vmem:[%s3824_s4 + $0x6] sm:$0x1] %v2246_v10  ;;  %2283 = vmatmul.mubr.bf16.vlgmr.msra.gmra.mxu0 %v2246_v10  ;;  %2324 = vmatmul.mubr.bf16.vlgmr.msra.gmra.mxu1 %v2246_v10 }
 0x8b0   :  { %v2284_v61 = vpop.f32.mrf.mxu0  ;;  %v2325_v11 = vpop.f32.mrf.mxu1 }
 0x8b2   :  { %v2286_v63 = vpop.f32.mrf.mxu0  ;;  %v2327_v1 = vpop.f32.mrf.mxu1 }
 0x8b3   :  { %v2336_v32 = vcombine.low %v2284_v61, %v2286_v63  ;;  %v2337_v27 = vcombine.low %v2325_v11, %v2327_v1 }
 0x8b4   :  { %v2288_v54 = vpop.f32.mrf.mxu0  ;;  %v2329_v14 = vpop.f32.mrf.mxu1 }
 0x8b5   :  { %v2344_v7 = vrot.slane %v2336_v32, %v3200_v62  ;;  %v2351_v9 = vrot.slane %v2337_v27, %v3200_v62 }
 0x8b6   :  { %v2289_v8 = vpop.f32.mrf.mxu0  ;;  %v2330_v28 = vpop.f32.mrf.mxu1 }
 0x8b7   :  { %v2352_v42 = vcombine.low %v2344_v7, %v2351_v9 }
 0x8b9   :  { %v2354_v44 = vadd.f32 %v2352_v42, %v3846_v43 }
 0x8bb   :  { %v2355_v45 = vmul.f32 0.5, %v2354_v44  ;;  %v2360_v46 = vrot.slane %v2354_v44, 2  ;;  %v2366_v48 = vrot.slane %v2354_v44, 4  ;;  %v2369_v51 = vrot.slane %v2354_v44, 6 }
 0x8bd   :  { %2653 = vtanh.f32 %v2355_v45  ;;  %v2362_v47 = vmul.f32 0.5, %v2360_v46  ;;  %v2371_v53 = vmul.f32 0.5, %v2369_v51 }
 0x8bf   :  { %2655 = vtanh.f32 %v2362_v47 }
 0x8c0   :  { %2657 = vtanh.f32 %v2366_v48 }
 0x8c1   :  { %2659 = vtanh.f32 %v2371_v53 }
 0x8ca   :  { %v2654_v55 = vpop.eup %2653 }
 0x8cb   :  { %v2357_v56 = vmul.f32 0.5, %v2654_v55 }
 0x8cc   :  { %v2656_v50 = vpop.eup %2655 }
 0x8cd   :  { %v2358_v62 = vadd.f32 0.5, %v2357_v56  ;;  %v2364_v4 = vmul.f32 0.5, %v2656_v50  ;;  %v2658_v15 = vpop.eup %2657 }
 0x8ce   :  { %v2660_v3 = vpop.eup %2659 }
 0x8cf   :  { %v2365_v29 = vadd.f32 0.5, %v2364_v4  ;;  %v2376_v0 = vmul.f32 %v2658_v15, %v2358_v62  ;;  %v2373_v39 = vmul.f32 0.5, %v2660_v3 }
 0x8d1   :  { %v2375_v5 = vmul.f32 %v2365_v29, %v2243_v37  ;;  %v2374_v40 = vadd.f32 0.5, %v2373_v39 }
 0x8d3   :  { %v2377_v35 = vadd.f32 %v2376_v0, %v2375_v5 }
 0x8d5   :  { %2661 = vtanh.f32 %v2377_v35  ;;  %2384 = vst [vmem:[#allocation4] sm:$0x3] %v2377_v35  ;;  %2389 = vst [vmem:[%s3826_s6] sm:$0x3] %v2377_v35 }
 0x8e2   :  { %v2662_v34 = vpop.eup %2661 }
 0x8e3   :  { %v2379_v33 = vmul.f32 %v2662_v34, %v2374_v40 }
 0x8e5   :  { %v2380_v49 = vpack.c.bf16 %v2379_v33, %v2379_v33  ;;  %2383 = vst [vmem:[#allocation3] sm:$0x3] %v2379_v33  ;;  %2388 = vst [vmem:[%s3825_s5] sm:$0x3] %v2379_v33 }
 0x8e7   :  { %2480 = vst [vmem:[%s3824_s4 + $0x7] sm:$0x1] %v2380_v49 }
 0x8e8   :  { %2402 = vsyncpa [#allocation6], 1 }

</bundles_post_ra>
